<compile_context>
chip_gen: v5e
topology: v5e:2x2
jax: 0.10.0
libtpu: 0.0.40
codegen_flags: <defaults>
</compile_context>

<pallas_src>
from functools import partial

import numpy as np
import jax
import jax.numpy as jnp
from jax import lax
from jax.experimental import pallas as pl
from jax.experimental.pallas import tpu as pltpu

_PRIMES = (1, 2654435761, 805459861, 3674653429, 2097192037, 1434869437, 2165219737)


def _i32_wrap(v: int) -> int:
    """Reinterpret a uint32 constant as int32 (same bit pattern)."""
    v = v & 0xFFFFFFFF
    return v - (1 << 32) if v >= (1 << 31) else v


def _make_offsets(num_dim, resolutions, log2_hashmap_size):
    """Exactly reproduces GridEncoder.__init__ offsets_list construction."""
    max_params = 2 ** log2_hashmap_size
    offsets, offset = [], 0
    for R in resolutions:
        p = min(max_params, int(R) ** num_dim)
        p = int(np.ceil(p / 8) * 8)
        offsets.append(offset)
        offset += p
    offsets.append(offset)
    return offsets


def _grid_encode_kernel(res_ref, mask_ref, hash_ref, stride_ref,   # SMEM scalar prefetch
                        x_ref, emb_ref, out_ref, *,
                        num_dim, hmap_pad, n_tile, kc):
    """One grid step = (level-in-group, point-tile).

    x_ref   : (num_dim, n_tile)    f32   points, lane-dense
    emb_ref : (cpad, hmap_pad)     bf16  binarized (+/-1) sub-table of this level
    out_ref : (cpad, n_tile)       f32   level output, features x points (lane-dense)
    """
    lvl = pl.program_id(0)

    # TODO(synk): scale = R-1 / floor (align_corners-like) matches the in-file
    # reference; verify against the exact CUDA gridencoder convention if needed.
    scale = (res_ref[lvl] - 1).astype(jnp.float32)
    mask = mask_ref[lvl]                              # hmap - 1 (hash mask / clamp)
    uh = hash_ref[lvl]                                # 1 if hashed level else 0

    # Per-point corner bases / interpolation fractions, lane-dense (1, n_tile).
    pos_grid, frac = [], []
    for d in range(num_dim):
        p = x_ref[d:d + 1, :] * scale
        pg = jnp.floor(p)
        pos_grid.append(pg.astype(jnp.int32))
        frac.append(p - pg)

    # Per-corner indices / weights (tile-invariant across the K-chunk loop).
    idx_list, w_list = [], []
    for corner in range(2 ** num_dim):
        w = None
        coords = []
        for d in range(num_dim):
            if (corner >> d) & 1:
                wd = frac[d]
                coords.append(pos_grid[d] + 1)
            else:
                wd = 1.0 - frac[d]
                coords.append(pos_grid[d])
            w = wd if w is None else w * wd

        # fast_hash: XOR of coord*prime in uint32 arithmetic (int32 wraps bit-
        # identically); hmap is a power of two on hashed levels, so & (hmap-1)
        # equals the uint32 modulo.
        idx_h = coords[0] * jnp.int32(_i32_wrap(_PRIMES[0]))
        for d in range(1, num_dim):
            idx_h = idx_h ^ (coords[d] * jnp.int32(_i32_wrap(_PRIMES[d])))
        idx_h = idx_h & mask

        # Dense level: row-major strides (0 for hashed levels, unused there).
        idx_d = coords[0] * stride_ref[lvl * num_dim + 0]
        for d in range(1, num_dim):
            idx_d = idx_d + coords[d] * stride_ref[lvl * num_dim + d]
        idx_d = jnp.minimum(idx_d, mask)

        idx_list.append(idx_h * uh + idx_d * (1 - uh))
        w_list.append(w)

    def scatter(row_iota):
        # Weighted one-hot scatter: wmat[idx, point] += w, all 2^D corners while
        # the K-strip is live; built in f32 (v5e VALU), fed to the MXU in bf16.
        wmat = jnp.zeros(row_iota.shape, jnp.float32)
        for idx, w in zip(idx_list, w_list):
            wmat = wmat + jnp.where(row_iota == idx, w, 0.0)
        return wmat.astype(jnp.bfloat16)

    n_chunks = hmap_pad // kc
    if n_chunks == 1:
        row = jax.lax.broadcasted_iota(jnp.int32, (hmap_pad, n_tile), 0)
        acc = jnp.dot(emb_ref[...], scatter(row),
                      preferred_element_type=jnp.float32)
    else:
        # K-chunked accumulation keeps temporaries at O(kc * n_tile) bytes.
        def body(c, acc):
            base = pl.multiple_of(c * kc, kc)
            row = jax.lax.broadcasted_iota(jnp.int32, (kc, n_tile), 0) + base
            part = jnp.dot(emb_ref[:, pl.ds(base, kc)], scatter(row),
                           preferred_element_type=jnp.float32)
            return acc + part

        acc = lax.fori_loop(0, n_chunks, body,
                            jnp.zeros(out_ref.shape, jnp.float32))

    out_ref[...] = acc.astype(out_ref.dtype)


def grid_encoder_forward(inputs, params, *, num_dim, n_features,
                         resolutions, log2_hashmap_size,
                         n_tile=512, k_chunk=2048):
    """Pallas implementation of GridEncoder.forward (ste_binary=True path).

    TODO(synk): binary_vxl / PV voxel pruning, min/max_level_id sub-ranges, a
    true gather path for very large hashed levels, and the backward pass
    (grad_embeddings, dy_dx) of the CUDA extension are not implemented.
    """
    offsets = _make_offsets(num_dim, resolutions, log2_hashmap_size)
    table_size = offsets[-1]
    assert params.shape == (table_size, n_features)
    assert n_tile % 128 == 0 and k_chunk % 128 == 0

    n_levels = len(resolutions)
    resolutions = tuple(int(r) for r in resolutions)
    cpad = int(np.ceil(n_features / 8) * 8)            # sublane-aligned feature dim

    # ----- STE_binary hoisted out of the kernel (x >= 0 ? +1 : -1, 0 -> +1) -----
    emb_bin = jnp.where(params >= 0.0, 1.0, -1.0).astype(jnp.bfloat16)  # +/-1 exact in bf16

    # ----- per-level metadata + grouping by padded sub-table width -----
    level_meta = []      # (R, hmap, use_hash, strides, group_pad)
    groups = {}          # group_pad -> [level ids]
    for lvl in range(n_levels):
        R = resolutions[lvl]
        hmap = offsets[lvl + 1] - offsets[lvl]
        use_hash = (R ** num_dim) > hmap
        if use_hash:
            # & (hmap-1) == uint32 % hmap only if hmap is a power of two.
            assert hmap & (hmap - 1) == 0, "hashed level size must be a power of two"
            strides = [0] * num_dim
        else:
            strides, s = [], 1
            for _ in range(num_dim):
                strides.append(s if s <= hmap else 0)
                s *= R
        pad128 = int(np.ceil(hmap / 128) * 128)
        pad = pad128 if pad128 <= k_chunk else int(np.ceil(hmap / k_chunk) * k_chunk)
        level_meta.append((R, hmap, 1 if use_hash else 0, strides, pad))
        groups.setdefault(pad, []).append(lvl)

    # ----- points: flatten, pad to a tile multiple, transpose to lane-dense -----
    prefix_shape = inputs.shape[:-1]
    x = inputs.reshape(-1, num_dim).astype(jnp.float32)
    N = x.shape[0]
    n_pad = int(np.ceil(max(N, 1) / n_tile) * n_tile)
    if n_pad != N:
        x = jnp.pad(x, ((0, n_pad - N), (0, 0)))
    xt = x.T                                                             # (num_dim, n_pad)
    n_pt_tiles = n_pad // n_tile

    out_levels = [None] * n_levels
    for hmap_pad, lvls in sorted(groups.items()):
        ng = len(lvls)
        kc = min(hmap_pad, k_chunk)

        res_arr = jnp.asarray([level_meta[l][0] for l in lvls], jnp.int32)
        mask_arr = jnp.asarray([level_meta[l][1] - 1 for l in lvls], jnp.int32)
        hash_arr = jnp.asarray([level_meta[l][2] for l in lvls], jnp.int32)
        stride_arr = jnp.asarray(sum([level_meta[l][3] for l in lvls], []), jnp.int32)

        tabs = []
        for l in lvls:
            base, end = offsets[l], offsets[l + 1]
            sub = emb_bin[base:end].T                                    # (C, hmap)
            sub = jnp.pad(sub, ((0, cpad - n_features), (0, hmap_pad - (end - base))))
            tabs.append(sub)
        emb_packed = jnp.stack(tabs, axis=0)                             # (ng, cpad, hmap_pad)

        kernel = partial(_grid_encode_kernel, num_dim=num_dim,
                         hmap_pad=hmap_pad, n_tile=n_tile, kc=kc)

        flops = (2 * cpad * hmap_pad * n_tile
                 + (2 ** num_dim) * 3 * hmap_pad * n_tile) * ng * n_pt_tiles
        bytes_accessed = (emb_packed.size * 2
                          + ng * xt.size * 4
                          + ng * cpad * n_pad * 4)

        out_g = pl.pallas_call(
            kernel,
            out_shape=jax.ShapeDtypeStruct((ng, cpad, n_pad), jnp.float32),
            grid_spec=pltpu.PrefetchScalarGridSpec(
                num_scalar_prefetch=4,
                grid=(ng, n_pt_tiles),                # level outer -> sub-table reused
                in_specs=[
                    pl.BlockSpec((num_dim, n_tile), lambda l, i, *_: (0, i)),
                    pl.BlockSpec((None, cpad, hmap_pad), lambda l, i, *_: (l, 0, 0)),
                ],
                out_specs=pl.BlockSpec((None, cpad, n_tile), lambda l, i, *_: (l, 0, i)),
            ),
            compiler_params=pltpu.CompilerParams(
                # No cross-iteration state: both axes are shard-able (v7x 2 TCs).
                dimension_semantics=("parallel", "parallel"),
                vmem_limit_bytes=64 * 1024 * 1024),
            cost_estimate=pl.CostEstimate(flops=int(flops), transcendentals=0,
                                          bytes_accessed=int(bytes_accessed)),
        )(res_arr, mask_arr, hash_arr, stride_arr, xt, emb_packed)

        for j, l in enumerate(lvls):
            out_levels[l] = out_g[j]

    # (L, cpad, n_pad) lane-dense slab -> torch layout (N, L * n_features).
    out = jnp.stack(out_levels, axis=0)
    out = out[:, :n_features, :].transpose(2, 0, 1).reshape(n_pad, n_levels * n_features)[:N]
    return out.reshape(tuple(prefix_shape) + (n_levels * n_features,))


def grid_encoder_reference(inputs, params, *, num_dim, n_features,
                           resolutions, log2_hashmap_size):
    """Plain-JAX reference (f32 weights) for the correctness check."""
    offsets = _make_offsets(num_dim, resolutions, log2_hashmap_size)
    prefix_shape = inputs.shape[:-1]
    x = inputs.reshape(-1, num_dim).astype(jnp.float32)
    emb = jnp.where(params >= 0.0, 1.0, -1.0).astype(jnp.float32)

    level_outs = []
    for lvl, R in enumerate(resolutions):
        R = int(R)
        base = offsets[lvl]
        hmap = offsets[lvl + 1] - offsets[lvl]
        use_hash = (R ** num_dim) > hmap
        scale = float(R - 1)

        p = x * scale
        pg = jnp.floor(p)
        frac = p - pg
        pg = pg.astype(jnp.int32)

        acc = jnp.zeros((x.shape[0], n_features), jnp.float32)
        for corner in range(2 ** num_dim):
            w = jnp.ones((x.shape[0], 1), jnp.float32)
            coords = []
            for d in range(num_dim):
                if (corner >> d) & 1:
                    w = w * frac[:, d:d + 1]
                    coords.append(pg[:, d:d + 1] + 1)
                else:
                    w = w * (1.0 - frac[:, d:d + 1])
                    coords.append(pg[:, d:d + 1])
            if use_hash:
                idx = jnp.zeros_like(coords[0])
                for d in range(num_dim):
                    idx = idx ^ (coords[d] * jnp.int32(_i32_wrap(_PRIMES[d])))
                idx = idx & jnp.int32(hmap - 1)
            else:
                idx = jnp.zeros_like(coords[0])
                stride = 1
                for d in range(num_dim):
                    if stride <= hmap:
                        idx = idx + coords[d] * jnp.int32(stride)
                        stride *= R
                idx = jnp.minimum(idx, jnp.int32(hmap - 1))
            gidx = (idx + jnp.int32(base))[:, 0]
            acc = acc + w * jnp.take(emb, gidx, axis=0)
        level_outs.append(acc)

    out = jnp.concatenate(level_outs, axis=-1)
    return out.reshape(tuple(prefix_shape) + (len(resolutions) * n_features,))


if __name__ == "__main__":
    # Small, deterministic config consistent with GridEncoder.__init__
    num_dim = 3
    n_features = 2
    resolutions = (4, 6, 8, 12)
    log2_hashmap_size = 9          # 512 entries max -> last level uses the hash path

    offsets = _make_offsets(num_dim, resolutions, log2_hashmap_size)
    table_size = offsets[-1]

    key = jax.random.PRNGKey(0)
    k_params, k_x = jax.random.split(key)

    # params init: uniform(-1e-4, 1e-4) as in reset_parameters()
    params = jax.random.uniform(k_params, (table_size, n_features),
                                jnp.float32, minval=-1e-4, maxval=1e-4)
    # inputs in [0, 1), prefix shape (2, 64) -> N = 128 flattened points
    x = jax.random.uniform(k_x, (2, 64, num_dim), jnp.float32)

    ref = grid_encoder_reference(x, params, num_dim=num_dim, n_features=n_features,
                                 resolutions=resolutions,
                                 log2_hashmap_size=log2_hashmap_size)
    ref = jax.block_until_ready(ref)

    # Run 1: defaults (n_tile=512, k_chunk=2048 -> single-chunk path per group).
    out = grid_encoder_forward(x, params, num_dim=num_dim, n_features=n_features,
                               resolutions=resolutions,
                               log2_hashmap_size=log2_hashmap_size)
    out = jax.block_until_ready(out)
    assert out.shape == (2, 64, len(resolutions) * n_features), out.shape
    # bf16 MXU weight quantization (~2^-9 rel) -> tolerance relaxed to 1e-2.
    np.testing.assert_allclose(np.asarray(out), np.asarray(ref), rtol=0, atol=1e-2)

    # Run 2: exercise the K-chunked fori_loop path (small chunks, smaller tile).
    out2 = grid_encoder_forward(x, params, num_dim=num_dim, n_features=n_features,
                                resolutions=resolutions,
                                log2_hashmap_size=log2_hashmap_size,
                                n_tile=256, k_chunk=128)
    out2 = jax.block_until_ready(out2)
    np.testing.assert_allclose(np.asarray(out2), np.asarray(ref), rtol=0, atol=1e-2)

    print("KERNEL_OK")
</pallas_src>

<mosaic_0001>
module attributes {stable_mosaic.version = 11 : i64} {
  func.func @_grid_encode_kernel(%arg0: i32, %arg1: i32, %arg2: memref<1xi32, #tpu.memory_space<smem>>, %arg3: memref<1xi32, #tpu.memory_space<smem>>, %arg4: memref<1xi32, #tpu.memory_space<smem>>, %arg5: memref<3xi32, #tpu.memory_space<smem>>, %arg6: memref<3x512xf32, #tpu.memory_space<vmem>>, %arg7: memref<1x8x128xbf16, #tpu.memory_space<vmem>>, %arg8: memref<1x8x512xf32, #tpu.memory_space<vmem>>) attributes {dimension_semantics = [#tpu.dimension_semantics<parallel>, #tpu.dimension_semantics<parallel>], iteration_bounds = array<i64: 1, 1>, scalar_prefetch = 4 : i64, scratch_operands = 0 : i64, tpu.core_type = #tpu.core_type<tc>, window_params = [{transform_indices = @transform_0, window_bounds = array<i64: 3, 512>}, {transform_indices = @transform_1, window_bounds = array<i64: 1, 8, 128>}, {transform_indices = @transform_2, window_bounds = array<i64: 1, 8, 512>}]} {
    %0 = arith.index_cast %arg0 : i32 to index
    %1 = memref.load %arg2[%0] : memref<1xi32, #tpu.memory_space<smem>>
    %c1_i32 = arith.constant 1 : i32
    %2 = arith.subi %1, %c1_i32 : i32
    %3 = arith.sitofp %2 : i32 to f32
    %4 = arith.index_cast %arg0 : i32 to index
    %5 = memref.load %arg3[%4] : memref<1xi32, #tpu.memory_space<smem>>
    %6 = arith.index_cast %arg0 : i32 to index
    %7 = memref.load %arg4[%6] : memref<1xi32, #tpu.memory_space<smem>>
    %c0 = arith.constant 0 : index
    %c0_0 = arith.constant 0 : index
    %8 = vector.load %arg6[%c0, %c0_0] : memref<3x512xf32, #tpu.memory_space<vmem>>, vector<1x512xf32>
    %9 = vector.broadcast %3 : f32 to vector<1x512xf32>
    %10 = arith.mulf %8, %9 : vector<1x512xf32>
    %11 = math.floor %10 : vector<1x512xf32>
    %12 = arith.fptosi %11 : vector<1x512xf32> to vector<1x512xi32>
    %13 = arith.subf %10, %11 : vector<1x512xf32>
    %c1 = arith.constant 1 : index
    %c0_1 = arith.constant 0 : index
    %14 = vector.load %arg6[%c1, %c0_1] : memref<3x512xf32, #tpu.memory_space<vmem>>, vector<1x512xf32>
    %15 = vector.broadcast %3 : f32 to vector<1x512xf32>
    %16 = arith.mulf %14, %15 : vector<1x512xf32>
    %17 = math.floor %16 : vector<1x512xf32>
    %18 = arith.fptosi %17 : vector<1x512xf32> to vector<1x512xi32>
    %19 = arith.subf %16, %17 : vector<1x512xf32>
    %c2 = arith.constant 2 : index
    %c0_2 = arith.constant 0 : index
    %20 = vector.load %arg6[%c2, %c0_2] : memref<3x512xf32, #tpu.memory_space<vmem>>, vector<1x512xf32>
    %21 = vector.broadcast %3 : f32 to vector<1x512xf32>
    %22 = arith.mulf %20, %21 : vector<1x512xf32>
    %23 = math.floor %22 : vector<1x512xf32>
    %24 = arith.fptosi %23 : vector<1x512xf32> to vector<1x512xi32>
    %25 = arith.subf %22, %23 : vector<1x512xf32>
    %cst = arith.constant 1.000000e+00 : f32
    %26 = vector.broadcast %cst : f32 to vector<1x512xf32>
    %27 = arith.subf %26, %13 : vector<1x512xf32>
    %cst_3 = arith.constant 1.000000e+00 : f32
    %28 = vector.broadcast %cst_3 : f32 to vector<1x512xf32>
    %29 = arith.subf %28, %19 : vector<1x512xf32>
    %30 = arith.mulf %27, %29 : vector<1x512xf32>
    %cst_4 = arith.constant 1.000000e+00 : f32
    %31 = vector.broadcast %cst_4 : f32 to vector<1x512xf32>
    %32 = arith.subf %31, %25 : vector<1x512xf32>
    %33 = arith.mulf %30, %32 : vector<1x512xf32>
    %c1_i32_5 = arith.constant 1 : i32
    %34 = vector.broadcast %c1_i32_5 : i32 to vector<1x512xi32>
    %35 = arith.muli %12, %34 : vector<1x512xi32>
    %c-1640531535_i32 = arith.constant -1640531535 : i32
    %36 = vector.broadcast %c-1640531535_i32 : i32 to vector<1x512xi32>
    %37 = arith.muli %18, %36 : vector<1x512xi32>
    %38 = arith.xori %35, %37 : vector<1x512xi32>
    %c805459861_i32 = arith.constant 805459861 : i32
    %39 = vector.broadcast %c805459861_i32 : i32 to vector<1x512xi32>
    %40 = arith.muli %24, %39 : vector<1x512xi32>
    %41 = arith.xori %38, %40 : vector<1x512xi32>
    %42 = vector.broadcast %5 : i32 to vector<1x512xi32>
    %43 = arith.andi %41, %42 : vector<1x512xi32>
    %c3_i32 = arith.constant 3 : i32
    %44 = arith.muli %arg0, %c3_i32 : i32
    %c0_i32 = arith.constant 0 : i32
    %45 = arith.addi %44, %c0_i32 : i32
    %46 = arith.index_cast %45 : i32 to index
    %47 = memref.load %arg5[%46] : memref<3xi32, #tpu.memory_space<smem>>
    %48 = vector.broadcast %47 : i32 to vector<1x512xi32>
    %49 = arith.muli %12, %48 : vector<1x512xi32>
    %c3_i32_6 = arith.constant 3 : i32
    %50 = arith.muli %arg0, %c3_i32_6 : i32
    %c1_i32_7 = arith.constant 1 : i32
    %51 = arith.addi %50, %c1_i32_7 : i32
    %52 = arith.index_cast %51 : i32 to index
    %53 = memref.load %arg5[%52] : memref<3xi32, #tpu.memory_space<smem>>
    %54 = vector.broadcast %53 : i32 to vector<1x512xi32>
    %55 = arith.muli %18, %54 : vector<1x512xi32>
    %56 = arith.addi %49, %55 : vector<1x512xi32>
    %c3_i32_8 = arith.constant 3 : i32
    %57 = arith.muli %arg0, %c3_i32_8 : i32
    %c2_i32 = arith.constant 2 : i32
    %58 = arith.addi %57, %c2_i32 : i32
    %59 = arith.index_cast %58 : i32 to index
    %60 = memref.load %arg5[%59] : memref<3xi32, #tpu.memory_space<smem>>
    %61 = vector.broadcast %60 : i32 to vector<1x512xi32>
    %62 = arith.muli %24, %61 : vector<1x512xi32>
    %63 = arith.addi %56, %62 : vector<1x512xi32>
    %64 = vector.broadcast %5 : i32 to vector<1x512xi32>
    %65 = arith.minsi %63, %64 : vector<1x512xi32>
    %66 = vector.broadcast %7 : i32 to vector<1x512xi32>
    %67 = arith.muli %43, %66 : vector<1x512xi32>
    %c1_i32_9 = arith.constant 1 : i32
    %68 = arith.subi %c1_i32_9, %7 : i32
    %69 = vector.broadcast %68 : i32 to vector<1x512xi32>
    %70 = arith.muli %65, %69 : vector<1x512xi32>
    %71 = arith.addi %67, %70 : vector<1x512xi32>
    %c1_i32_10 = arith.constant 1 : i32
    %72 = vector.broadcast %c1_i32_10 : i32 to vector<1x512xi32>
    %73 = arith.addi %12, %72 : vector<1x512xi32>
    %cst_11 = arith.constant 1.000000e+00 : f32
    %74 = vector.broadcast %cst_11 : f32 to vector<1x512xf32>
    %75 = arith.subf %74, %19 : vector<1x512xf32>
    %76 = arith.mulf %13, %75 : vector<1x512xf32>
    %cst_12 = arith.constant 1.000000e+00 : f32
    %77 = vector.broadcast %cst_12 : f32 to vector<1x512xf32>
    %78 = arith.subf %77, %25 : vector<1x512xf32>
    %79 = arith.mulf %76, %78 : vector<1x512xf32>
    %c1_i32_13 = arith.constant 1 : i32
    %80 = vector.broadcast %c1_i32_13 : i32 to vector<1x512xi32>
    %81 = arith.muli %73, %80 : vector<1x512xi32>
    %c-1640531535_i32_14 = arith.constant -1640531535 : i32
    %82 = vector.broadcast %c-1640531535_i32_14 : i32 to vector<1x512xi32>
    %83 = arith.muli %18, %82 : vector<1x512xi32>
    %84 = arith.xori %81, %83 : vector<1x512xi32>
    %c805459861_i32_15 = arith.constant 805459861 : i32
    %85 = vector.broadcast %c805459861_i32_15 : i32 to vector<1x512xi32>
    %86 = arith.muli %24, %85 : vector<1x512xi32>
    %87 = arith.xori %84, %86 : vector<1x512xi32>
    %88 = vector.broadcast %5 : i32 to vector<1x512xi32>
    %89 = arith.andi %87, %88 : vector<1x512xi32>
    %c3_i32_16 = arith.constant 3 : i32
    %90 = arith.muli %arg0, %c3_i32_16 : i32
    %c0_i32_17 = arith.constant 0 : i32
    %91 = arith.addi %90, %c0_i32_17 : i32
    %92 = arith.index_cast %91 : i32 to index
    %93 = memref.load %arg5[%92] : memref<3xi32, #tpu.memory_space<smem>>
    %94 = vector.broadcast %93 : i32 to vector<1x512xi32>
    %95 = arith.muli %73, %94 : vector<1x512xi32>
    %c3_i32_18 = arith.constant 3 : i32
    %96 = arith.muli %arg0, %c3_i32_18 : i32
    %c1_i32_19 = arith.constant 1 : i32
    %97 = arith.addi %96, %c1_i32_19 : i32
    %98 = arith.index_cast %97 : i32 to index
    %99 = memref.load %arg5[%98] : memref<3xi32, #tpu.memory_space<smem>>
    %100 = vector.broadcast %99 : i32 to vector<1x512xi32>
    %101 = arith.muli %18, %100 : vector<1x512xi32>
    %102 = arith.addi %95, %101 : vector<1x512xi32>
    %c3_i32_20 = arith.constant 3 : i32
    %103 = arith.muli %arg0, %c3_i32_20 : i32
    %c2_i32_21 = arith.constant 2 : i32
    %104 = arith.addi %103, %c2_i32_21 : i32
    %105 = arith.index_cast %104 : i32 to index
    %106 = memref.load %arg5[%105] : memref<3xi32, #tpu.memory_space<smem>>
    %107 = vector.broadcast %106 : i32 to vector<1x512xi32>
    %108 = arith.muli %24, %107 : vector<1x512xi32>
    %109 = arith.addi %102, %108 : vector<1x512xi32>
    %110 = vector.broadcast %5 : i32 to vector<1x512xi32>
    %111 = arith.minsi %109, %110 : vector<1x512xi32>
    %112 = vector.broadcast %7 : i32 to vector<1x512xi32>
    %113 = arith.muli %89, %112 : vector<1x512xi32>
    %c1_i32_22 = arith.constant 1 : i32
    %114 = arith.subi %c1_i32_22, %7 : i32
    %115 = vector.broadcast %114 : i32 to vector<1x512xi32>
    %116 = arith.muli %111, %115 : vector<1x512xi32>
    %117 = arith.addi %113, %116 : vector<1x512xi32>
    %cst_23 = arith.constant 1.000000e+00 : f32
    %118 = vector.broadcast %cst_23 : f32 to vector<1x512xf32>
    %119 = arith.subf %118, %13 : vector<1x512xf32>
    %c1_i32_24 = arith.constant 1 : i32
    %120 = vector.broadcast %c1_i32_24 : i32 to vector<1x512xi32>
    %121 = arith.addi %18, %120 : vector<1x512xi32>
    %122 = arith.mulf %119, %19 : vector<1x512xf32>
    %cst_25 = arith.constant 1.000000e+00 : f32
    %123 = vector.broadcast %cst_25 : f32 to vector<1x512xf32>
    %124 = arith.subf %123, %25 : vector<1x512xf32>
    %125 = arith.mulf %122, %124 : vector<1x512xf32>
    %c1_i32_26 = arith.constant 1 : i32
    %126 = vector.broadcast %c1_i32_26 : i32 to vector<1x512xi32>
    %127 = arith.muli %12, %126 : vector<1x512xi32>
    %c-1640531535_i32_27 = arith.constant -1640531535 : i32
    %128 = vector.broadcast %c-1640531535_i32_27 : i32 to vector<1x512xi32>
    %129 = arith.muli %121, %128 : vector<1x512xi32>
    %130 = arith.xori %127, %129 : vector<1x512xi32>
    %c805459861_i32_28 = arith.constant 805459861 : i32
    %131 = vector.broadcast %c805459861_i32_28 : i32 to vector<1x512xi32>
    %132 = arith.muli %24, %131 : vector<1x512xi32>
    %133 = arith.xori %130, %132 : vector<1x512xi32>
    %134 = vector.broadcast %5 : i32 to vector<1x512xi32>
    %135 = arith.andi %133, %134 : vector<1x512xi32>
    %c3_i32_29 = arith.constant 3 : i32
    %136 = arith.muli %arg0, %c3_i32_29 : i32
    %c0_i32_30 = arith.constant 0 : i32
    %137 = arith.addi %136, %c0_i32_30 : i32
    %138 = arith.index_cast %137 : i32 to index
    %139 = memref.load %arg5[%138] : memref<3xi32, #tpu.memory_space<smem>>
    %140 = vector.broadcast %139 : i32 to vector<1x512xi32>
    %141 = arith.muli %12, %140 : vector<1x512xi32>
    %c3_i32_31 = arith.constant 3 : i32
    %142 = arith.muli %arg0, %c3_i32_31 : i32
    %c1_i32_32 = arith.constant 1 : i32
    %143 = arith.addi %142, %c1_i32_32 : i32
    %144 = arith.index_cast %143 : i32 to index
    %145 = memref.load %arg5[%144] : memref<3xi32, #tpu.memory_space<smem>>
    %146 = vector.broadcast %145 : i32 to vector<1x512xi32>
    %147 = arith.muli %121, %146 : vector<1x512xi32>
    %148 = arith.addi %141, %147 : vector<1x512xi32>
    %c3_i32_33 = arith.constant 3 : i32
    %149 = arith.muli %arg0, %c3_i32_33 : i32
    %c2_i32_34 = arith.constant 2 : i32
    %150 = arith.addi %149, %c2_i32_34 : i32
    %151 = arith.index_cast %150 : i32 to index
    %152 = memref.load %arg5[%151] : memref<3xi32, #tpu.memory_space<smem>>
    %153 = vector.broadcast %152 : i32 to vector<1x512xi32>
    %154 = arith.muli %24, %153 : vector<1x512xi32>
    %155 = arith.addi %148, %154 : vector<1x512xi32>
    %156 = vector.broadcast %5 : i32 to vector<1x512xi32>
    %157 = arith.minsi %155, %156 : vector<1x512xi32>
    %158 = vector.broadcast %7 : i32 to vector<1x512xi32>
    %159 = arith.muli %135, %158 : vector<1x512xi32>
    %c1_i32_35 = arith.constant 1 : i32
    %160 = arith.subi %c1_i32_35, %7 : i32
    %161 = vector.broadcast %160 : i32 to vector<1x512xi32>
    %162 = arith.muli %157, %161 : vector<1x512xi32>
    %163 = arith.addi %159, %162 : vector<1x512xi32>
    %c1_i32_36 = arith.constant 1 : i32
    %164 = vector.broadcast %c1_i32_36 : i32 to vector<1x512xi32>
    %165 = arith.addi %12, %164 : vector<1x512xi32>
    %c1_i32_37 = arith.constant 1 : i32
    %166 = vector.broadcast %c1_i32_37 : i32 to vector<1x512xi32>
    %167 = arith.addi %18, %166 : vector<1x512xi32>
    %168 = arith.mulf %13, %19 : vector<1x512xf32>
    %cst_38 = arith.constant 1.000000e+00 : f32
    %169 = vector.broadcast %cst_38 : f32 to vector<1x512xf32>
    %170 = arith.subf %169, %25 : vector<1x512xf32>
    %171 = arith.mulf %168, %170 : vector<1x512xf32>
    %c1_i32_39 = arith.constant 1 : i32
    %172 = vector.broadcast %c1_i32_39 : i32 to vector<1x512xi32>
    %173 = arith.muli %165, %172 : vector<1x512xi32>
    %c-1640531535_i32_40 = arith.constant -1640531535 : i32
    %174 = vector.broadcast %c-1640531535_i32_40 : i32 to vector<1x512xi32>
    %175 = arith.muli %167, %174 : vector<1x512xi32>
    %176 = arith.xori %173, %175 : vector<1x512xi32>
    %c805459861_i32_41 = arith.constant 805459861 : i32
    %177 = vector.broadcast %c805459861_i32_41 : i32 to vector<1x512xi32>
    %178 = arith.muli %24, %177 : vector<1x512xi32>
    %179 = arith.xori %176, %178 : vector<1x512xi32>
    %180 = vector.broadcast %5 : i32 to vector<1x512xi32>
    %181 = arith.andi %179, %180 : vector<1x512xi32>
    %c3_i32_42 = arith.constant 3 : i32
    %182 = arith.muli %arg0, %c3_i32_42 : i32
    %c0_i32_43 = arith.constant 0 : i32
    %183 = arith.addi %182, %c0_i32_43 : i32
    %184 = arith.index_cast %183 : i32 to index
    %185 = memref.load %arg5[%184] : memref<3xi32, #tpu.memory_space<smem>>
    %186 = vector.broadcast %185 : i32 to vector<1x512xi32>
    %187 = arith.muli %165, %186 : vector<1x512xi32>
    %c3_i32_44 = arith.constant 3 : i32
    %188 = arith.muli %arg0, %c3_i32_44 : i32
    %c1_i32_45 = arith.constant 1 : i32
    %189 = arith.addi %188, %c1_i32_45 : i32
    %190 = arith.index_cast %189 : i32 to index
    %191 = memref.load %arg5[%190] : memref<3xi32, #tpu.memory_space<smem>>
    %192 = vector.broadcast %191 : i32 to vector<1x512xi32>
    %193 = arith.muli %167, %192 : vector<1x512xi32>
    %194 = arith.addi %187, %193 : vector<1x512xi32>
    %c3_i32_46 = arith.constant 3 : i32
    %195 = arith.muli %arg0, %c3_i32_46 : i32
    %c2_i32_47 = arith.constant 2 : i32
    %196 = arith.addi %195, %c2_i32_47 : i32
    %197 = arith.index_cast %196 : i32 to index
    %198 = memref.load %arg5[%197] : memref<3xi32, #tpu.memory_space<smem>>
    %199 = vector.broadcast %198 : i32 to vector<1x512xi32>
    %200 = arith.muli %24, %199 : vector<1x512xi32>
    %201 = arith.addi %194, %200 : vector<1x512xi32>
    %202 = vector.broadcast %5 : i32 to vector<1x512xi32>
    %203 = arith.minsi %201, %202 : vector<1x512xi32>
    %204 = vector.broadcast %7 : i32 to vector<1x512xi32>
    %205 = arith.muli %181, %204 : vector<1x512xi32>
    %c1_i32_48 = arith.constant 1 : i32
    %206 = arith.subi %c1_i32_48, %7 : i32
    %207 = vector.broadcast %206 : i32 to vector<1x512xi32>
    %208 = arith.muli %203, %207 : vector<1x512xi32>
    %209 = arith.addi %205, %208 : vector<1x512xi32>
    %cst_49 = arith.constant 1.000000e+00 : f32
    %210 = vector.broadcast %cst_49 : f32 to vector<1x512xf32>
    %211 = arith.subf %210, %13 : vector<1x512xf32>
    %cst_50 = arith.constant 1.000000e+00 : f32
    %212 = vector.broadcast %cst_50 : f32 to vector<1x512xf32>
    %213 = arith.subf %212, %19 : vector<1x512xf32>
    %214 = arith.mulf %211, %213 : vector<1x512xf32>
    %c1_i32_51 = arith.constant 1 : i32
    %215 = vector.broadcast %c1_i32_51 : i32 to vector<1x512xi32>
    %216 = arith.addi %24, %215 : vector<1x512xi32>
    %217 = arith.mulf %214, %25 : vector<1x512xf32>
    %c1_i32_52 = arith.constant 1 : i32
    %218 = vector.broadcast %c1_i32_52 : i32 to vector<1x512xi32>
    %219 = arith.muli %12, %218 : vector<1x512xi32>
    %c-1640531535_i32_53 = arith.constant -1640531535 : i32
    %220 = vector.broadcast %c-1640531535_i32_53 : i32 to vector<1x512xi32>
    %221 = arith.muli %18, %220 : vector<1x512xi32>
    %222 = arith.xori %219, %221 : vector<1x512xi32>
    %c805459861_i32_54 = arith.constant 805459861 : i32
    %223 = vector.broadcast %c805459861_i32_54 : i32 to vector<1x512xi32>
    %224 = arith.muli %216, %223 : vector<1x512xi32>
    %225 = arith.xori %222, %224 : vector<1x512xi32>
    %226 = vector.broadcast %5 : i32 to vector<1x512xi32>
    %227 = arith.andi %225, %226 : vector<1x512xi32>
    %c3_i32_55 = arith.constant 3 : i32
    %228 = arith.muli %arg0, %c3_i32_55 : i32
    %c0_i32_56 = arith.constant 0 : i32
    %229 = arith.addi %228, %c0_i32_56 : i32
    %230 = arith.index_cast %229 : i32 to index
    %231 = memref.load %arg5[%230] : memref<3xi32, #tpu.memory_space<smem>>
    %232 = vector.broadcast %231 : i32 to vector<1x512xi32>
    %233 = arith.muli %12, %232 : vector<1x512xi32>
    %c3_i32_57 = arith.constant 3 : i32
    %234 = arith.muli %arg0, %c3_i32_57 : i32
    %c1_i32_58 = arith.constant 1 : i32
    %235 = arith.addi %234, %c1_i32_58 : i32
    %236 = arith.index_cast %235 : i32 to index
    %237 = memref.load %arg5[%236] : memref<3xi32, #tpu.memory_space<smem>>
    %238 = vector.broadcast %237 : i32 to vector<1x512xi32>
    %239 = arith.muli %18, %238 : vector<1x512xi32>
    %240 = arith.addi %233, %239 : vector<1x512xi32>
    %c3_i32_59 = arith.constant 3 : i32
    %241 = arith.muli %arg0, %c3_i32_59 : i32
    %c2_i32_60 = arith.constant 2 : i32
    %242 = arith.addi %241, %c2_i32_60 : i32
    %243 = arith.index_cast %242 : i32 to index
    %244 = memref.load %arg5[%243] : memref<3xi32, #tpu.memory_space<smem>>
    %245 = vector.broadcast %244 : i32 to vector<1x512xi32>
    %246 = arith.muli %216, %245 : vector<1x512xi32>
    %247 = arith.addi %240, %246 : vector<1x512xi32>
    %248 = vector.broadcast %5 : i32 to vector<1x512xi32>
    %249 = arith.minsi %247, %248 : vector<1x512xi32>
    %250 = vector.broadcast %7 : i32 to vector<1x512xi32>
    %251 = arith.muli %227, %250 : vector<1x512xi32>
    %c1_i32_61 = arith.constant 1 : i32
    %252 = arith.subi %c1_i32_61, %7 : i32
    %253 = vector.broadcast %252 : i32 to vector<1x512xi32>
    %254 = arith.muli %249, %253 : vector<1x512xi32>
    %255 = arith.addi %251, %254 : vector<1x512xi32>
    %c1_i32_62 = arith.constant 1 : i32
    %256 = vector.broadcast %c1_i32_62 : i32 to vector<1x512xi32>
    %257 = arith.addi %12, %256 : vector<1x512xi32>
    %cst_63 = arith.constant 1.000000e+00 : f32
    %258 = vector.broadcast %cst_63 : f32 to vector<1x512xf32>
    %259 = arith.subf %258, %19 : vector<1x512xf32>
    %260 = arith.mulf %13, %259 : vector<1x512xf32>
    %c1_i32_64 = arith.constant 1 : i32
    %261 = vector.broadcast %c1_i32_64 : i32 to vector<1x512xi32>
    %262 = arith.addi %24, %261 : vector<1x512xi32>
    %263 = arith.mulf %260, %25 : vector<1x512xf32>
    %c1_i32_65 = arith.constant 1 : i32
    %264 = vector.broadcast %c1_i32_65 : i32 to vector<1x512xi32>
    %265 = arith.muli %257, %264 : vector<1x512xi32>
    %c-1640531535_i32_66 = arith.constant -1640531535 : i32
    %266 = vector.broadcast %c-1640531535_i32_66 : i32 to vector<1x512xi32>
    %267 = arith.muli %18, %266 : vector<1x512xi32>
    %268 = arith.xori %265, %267 : vector<1x512xi32>
    %c805459861_i32_67 = arith.constant 805459861 : i32
    %269 = vector.broadcast %c805459861_i32_67 : i32 to vector<1x512xi32>
    %270 = arith.muli %262, %269 : vector<1x512xi32>
    %271 = arith.xori %268, %270 : vector<1x512xi32>
    %272 = vector.broadcast %5 : i32 to vector<1x512xi32>
    %273 = arith.andi %271, %272 : vector<1x512xi32>
    %c3_i32_68 = arith.constant 3 : i32
    %274 = arith.muli %arg0, %c3_i32_68 : i32
    %c0_i32_69 = arith.constant 0 : i32
    %275 = arith.addi %274, %c0_i32_69 : i32
    %276 = arith.index_cast %275 : i32 to index
    %277 = memref.load %arg5[%276] : memref<3xi32, #tpu.memory_space<smem>>
    %278 = vector.broadcast %277 : i32 to vector<1x512xi32>
    %279 = arith.muli %257, %278 : vector<1x512xi32>
    %c3_i32_70 = arith.constant 3 : i32
    %280 = arith.muli %arg0, %c3_i32_70 : i32
    %c1_i32_71 = arith.constant 1 : i32
    %281 = arith.addi %280, %c1_i32_71 : i32
    %282 = arith.index_cast %281 : i32 to index
    %283 = memref.load %arg5[%282] : memref<3xi32, #tpu.memory_space<smem>>
    %284 = vector.broadcast %283 : i32 to vector<1x512xi32>
    %285 = arith.muli %18, %284 : vector<1x512xi32>
    %286 = arith.addi %279, %285 : vector<1x512xi32>
    %c3_i32_72 = arith.constant 3 : i32
    %287 = arith.muli %arg0, %c3_i32_72 : i32
    %c2_i32_73 = arith.constant 2 : i32
    %288 = arith.addi %287, %c2_i32_73 : i32
    %289 = arith.index_cast %288 : i32 to index
    %290 = memref.load %arg5[%289] : memref<3xi32, #tpu.memory_space<smem>>
    %291 = vector.broadcast %290 : i32 to vector<1x512xi32>
    %292 = arith.muli %262, %291 : vector<1x512xi32>
    %293 = arith.addi %286, %292 : vector<1x512xi32>
    %294 = vector.broadcast %5 : i32 to vector<1x512xi32>
    %295 = arith.minsi %293, %294 : vector<1x512xi32>
    %296 = vector.broadcast %7 : i32 to vector<1x512xi32>
    %297 = arith.muli %273, %296 : vector<1x512xi32>
    %c1_i32_74 = arith.constant 1 : i32
    %298 = arith.subi %c1_i32_74, %7 : i32
    %299 = vector.broadcast %298 : i32 to vector<1x512xi32>
    %300 = arith.muli %295, %299 : vector<1x512xi32>
    %301 = arith.addi %297, %300 : vector<1x512xi32>
    %cst_75 = arith.constant 1.000000e+00 : f32
    %302 = vector.broadcast %cst_75 : f32 to vector<1x512xf32>
    %303 = arith.subf %302, %13 : vector<1x512xf32>
    %c1_i32_76 = arith.constant 1 : i32
    %304 = vector.broadcast %c1_i32_76 : i32 to vector<1x512xi32>
    %305 = arith.addi %18, %304 : vector<1x512xi32>
    %306 = arith.mulf %303, %19 : vector<1x512xf32>
    %c1_i32_77 = arith.constant 1 : i32
    %307 = vector.broadcast %c1_i32_77 : i32 to vector<1x512xi32>
    %308 = arith.addi %24, %307 : vector<1x512xi32>
    %309 = arith.mulf %306, %25 : vector<1x512xf32>
    %c1_i32_78 = arith.constant 1 : i32
    %310 = vector.broadcast %c1_i32_78 : i32 to vector<1x512xi32>
    %311 = arith.muli %12, %310 : vector<1x512xi32>
    %c-1640531535_i32_79 = arith.constant -1640531535 : i32
    %312 = vector.broadcast %c-1640531535_i32_79 : i32 to vector<1x512xi32>
    %313 = arith.muli %305, %312 : vector<1x512xi32>
    %314 = arith.xori %311, %313 : vector<1x512xi32>
    %c805459861_i32_80 = arith.constant 805459861 : i32
    %315 = vector.broadcast %c805459861_i32_80 : i32 to vector<1x512xi32>
    %316 = arith.muli %308, %315 : vector<1x512xi32>
    %317 = arith.xori %314, %316 : vector<1x512xi32>
    %318 = vector.broadcast %5 : i32 to vector<1x512xi32>
    %319 = arith.andi %317, %318 : vector<1x512xi32>
    %c3_i32_81 = arith.constant 3 : i32
    %320 = arith.muli %arg0, %c3_i32_81 : i32
    %c0_i32_82 = arith.constant 0 : i32
    %321 = arith.addi %320, %c0_i32_82 : i32
    %322 = arith.index_cast %321 : i32 to index
    %323 = memref.load %arg5[%322] : memref<3xi32, #tpu.memory_space<smem>>
    %324 = vector.broadcast %323 : i32 to vector<1x512xi32>
    %325 = arith.muli %12, %324 : vector<1x512xi32>
    %c3_i32_83 = arith.constant 3 : i32
    %326 = arith.muli %arg0, %c3_i32_83 : i32
    %c1_i32_84 = arith.constant 1 : i32
    %327 = arith.addi %326, %c1_i32_84 : i32
    %328 = arith.index_cast %327 : i32 to index
    %329 = memref.load %arg5[%328] : memref<3xi32, #tpu.memory_space<smem>>
    %330 = vector.broadcast %329 : i32 to vector<1x512xi32>
    %331 = arith.muli %305, %330 : vector<1x512xi32>
    %332 = arith.addi %325, %331 : vector<1x512xi32>
    %c3_i32_85 = arith.constant 3 : i32
    %333 = arith.muli %arg0, %c3_i32_85 : i32
    %c2_i32_86 = arith.constant 2 : i32
    %334 = arith.addi %333, %c2_i32_86 : i32
    %335 = arith.index_cast %334 : i32 to index
    %336 = memref.load %arg5[%335] : memref<3xi32, #tpu.memory_space<smem>>
    %337 = vector.broadcast %336 : i32 to vector<1x512xi32>
    %338 = arith.muli %308, %337 : vector<1x512xi32>
    %339 = arith.addi %332, %338 : vector<1x512xi32>
    %340 = vector.broadcast %5 : i32 to vector<1x512xi32>
    %341 = arith.minsi %339, %340 : vector<1x512xi32>
    %342 = vector.broadcast %7 : i32 to vector<1x512xi32>
    %343 = arith.muli %319, %342 : vector<1x512xi32>
    %c1_i32_87 = arith.constant 1 : i32
    %344 = arith.subi %c1_i32_87, %7 : i32
    %345 = vector.broadcast %344 : i32 to vector<1x512xi32>
    %346 = arith.muli %341, %345 : vector<1x512xi32>
    %347 = arith.addi %343, %346 : vector<1x512xi32>
    %c1_i32_88 = arith.constant 1 : i32
    %348 = vector.broadcast %c1_i32_88 : i32 to vector<1x512xi32>
    %349 = arith.addi %12, %348 : vector<1x512xi32>
    %c1_i32_89 = arith.constant 1 : i32
    %350 = vector.broadcast %c1_i32_89 : i32 to vector<1x512xi32>
    %351 = arith.addi %18, %350 : vector<1x512xi32>
    %352 = arith.mulf %13, %19 : vector<1x512xf32>
    %c1_i32_90 = arith.constant 1 : i32
    %353 = vector.broadcast %c1_i32_90 : i32 to vector<1x512xi32>
    %354 = arith.addi %24, %353 : vector<1x512xi32>
    %355 = arith.mulf %352, %25 : vector<1x512xf32>
    %c1_i32_91 = arith.constant 1 : i32
    %356 = vector.broadcast %c1_i32_91 : i32 to vector<1x512xi32>
    %357 = arith.muli %349, %356 : vector<1x512xi32>
    %c-1640531535_i32_92 = arith.constant -1640531535 : i32
    %358 = vector.broadcast %c-1640531535_i32_92 : i32 to vector<1x512xi32>
    %359 = arith.muli %351, %358 : vector<1x512xi32>
    %360 = arith.xori %357, %359 : vector<1x512xi32>
    %c805459861_i32_93 = arith.constant 805459861 : i32
    %361 = vector.broadcast %c805459861_i32_93 : i32 to vector<1x512xi32>
    %362 = arith.muli %354, %361 : vector<1x512xi32>
    %363 = arith.xori %360, %362 : vector<1x512xi32>
    %364 = vector.broadcast %5 : i32 to vector<1x512xi32>
    %365 = arith.andi %363, %364 : vector<1x512xi32>
    %c3_i32_94 = arith.constant 3 : i32
    %366 = arith.muli %arg0, %c3_i32_94 : i32
    %c0_i32_95 = arith.constant 0 : i32
    %367 = arith.addi %366, %c0_i32_95 : i32
    %368 = arith.index_cast %367 : i32 to index
    %369 = memref.load %arg5[%368] : memref<3xi32, #tpu.memory_space<smem>>
    %370 = vector.broadcast %369 : i32 to vector<1x512xi32>
    %371 = arith.muli %349, %370 : vector<1x512xi32>
    %c3_i32_96 = arith.constant 3 : i32
    %372 = arith.muli %arg0, %c3_i32_96 : i32
    %c1_i32_97 = arith.constant 1 : i32
    %373 = arith.addi %372, %c1_i32_97 : i32
    %374 = arith.index_cast %373 : i32 to index
    %375 = memref.load %arg5[%374] : memref<3xi32, #tpu.memory_space<smem>>
    %376 = vector.broadcast %375 : i32 to vector<1x512xi32>
    %377 = arith.muli %351, %376 : vector<1x512xi32>
    %378 = arith.addi %371, %377 : vector<1x512xi32>
    %c3_i32_98 = arith.constant 3 : i32
    %379 = arith.muli %arg0, %c3_i32_98 : i32
    %c2_i32_99 = arith.constant 2 : i32
    %380 = arith.addi %379, %c2_i32_99 : i32
    %381 = arith.index_cast %380 : i32 to index
    %382 = memref.load %arg5[%381] : memref<3xi32, #tpu.memory_space<smem>>
    %383 = vector.broadcast %382 : i32 to vector<1x512xi32>
    %384 = arith.muli %354, %383 : vector<1x512xi32>
    %385 = arith.addi %378, %384 : vector<1x512xi32>
    %386 = vector.broadcast %5 : i32 to vector<1x512xi32>
    %387 = arith.minsi %385, %386 : vector<1x512xi32>
    %388 = vector.broadcast %7 : i32 to vector<1x512xi32>
    %389 = arith.muli %365, %388 : vector<1x512xi32>
    %c1_i32_100 = arith.constant 1 : i32
    %390 = arith.subi %c1_i32_100, %7 : i32
    %391 = vector.broadcast %390 : i32 to vector<1x512xi32>
    %392 = arith.muli %387, %391 : vector<1x512xi32>
    %393 = arith.addi %389, %392 : vector<1x512xi32>
    %394 = tpu.iota {dimensions = array<i32: 0>} : vector<128x512xi32>
    %c0_101 = arith.constant 0 : index
    %c0_102 = arith.constant 0 : index
    %c0_103 = arith.constant 0 : index
    %395 = vector.load %arg7[%c0_101, %c0_102, %c0_103] : memref<1x8x128xbf16, #tpu.memory_space<vmem>>, vector<1x8x128xbf16>
    %396 = vector.shape_cast %395 : vector<1x8x128xbf16> to vector<8x128xbf16>
    %cst_104 = arith.constant 0.000000e+00 : f32
    %397 = vector.broadcast %cst_104 : f32 to vector<128x512xf32>
    %398 = vector.broadcast %71 : vector<1x512xi32> to vector<128x512xi32>
    %399 = arith.cmpi eq, %394, %398 : vector<128x512xi32>
    %cst_105 = arith.constant 0.000000e+00 : f32
    %400 = vector.shape_cast %33 : vector<1x512xf32> to vector<1x512xf32>
    %401 = vector.broadcast %400 : vector<1x512xf32> to vector<128x512xf32>
    %402 = vector.broadcast %cst_105 : f32 to vector<128x512xf32>
    %403 = arith.select %399, %401, %402 : vector<128x512xi1>, vector<128x512xf32>
    %404 = arith.addf %397, %403 : vector<128x512xf32>
    %405 = vector.broadcast %117 : vector<1x512xi32> to vector<128x512xi32>
    %406 = arith.cmpi eq, %394, %405 : vector<128x512xi32>
    %cst_106 = arith.constant 0.000000e+00 : f32
    %407 = vector.shape_cast %79 : vector<1x512xf32> to vector<1x512xf32>
    %408 = vector.broadcast %407 : vector<1x512xf32> to vector<128x512xf32>
    %409 = vector.broadcast %cst_106 : f32 to vector<128x512xf32>
    %410 = arith.select %406, %408, %409 : vector<128x512xi1>, vector<128x512xf32>
    %411 = arith.addf %404, %410 : vector<128x512xf32>
    %412 = vector.broadcast %163 : vector<1x512xi32> to vector<128x512xi32>
    %413 = arith.cmpi eq, %394, %412 : vector<128x512xi32>
    %cst_107 = arith.constant 0.000000e+00 : f32
    %414 = vector.shape_cast %125 : vector<1x512xf32> to vector<1x512xf32>
    %415 = vector.broadcast %414 : vector<1x512xf32> to vector<128x512xf32>
    %416 = vector.broadcast %cst_107 : f32 to vector<128x512xf32>
    %417 = arith.select %413, %415, %416 : vector<128x512xi1>, vector<128x512xf32>
    %418 = arith.addf %411, %417 : vector<128x512xf32>
    %419 = vector.broadcast %209 : vector<1x512xi32> to vector<128x512xi32>
    %420 = arith.cmpi eq, %394, %419 : vector<128x512xi32>
    %cst_108 = arith.constant 0.000000e+00 : f32
    %421 = vector.shape_cast %171 : vector<1x512xf32> to vector<1x512xf32>
    %422 = vector.broadcast %421 : vector<1x512xf32> to vector<128x512xf32>
    %423 = vector.broadcast %cst_108 : f32 to vector<128x512xf32>
    %424 = arith.select %420, %422, %423 : vector<128x512xi1>, vector<128x512xf32>
    %425 = arith.addf %418, %424 : vector<128x512xf32>
    %426 = vector.broadcast %255 : vector<1x512xi32> to vector<128x512xi32>
    %427 = arith.cmpi eq, %394, %426 : vector<128x512xi32>
    %cst_109 = arith.constant 0.000000e+00 : f32
    %428 = vector.shape_cast %217 : vector<1x512xf32> to vector<1x512xf32>
    %429 = vector.broadcast %428 : vector<1x512xf32> to vector<128x512xf32>
    %430 = vector.broadcast %cst_109 : f32 to vector<128x512xf32>
    %431 = arith.select %427, %429, %430 : vector<128x512xi1>, vector<128x512xf32>
    %432 = arith.addf %425, %431 : vector<128x512xf32>
    %433 = vector.broadcast %301 : vector<1x512xi32> to vector<128x512xi32>
    %434 = arith.cmpi eq, %394, %433 : vector<128x512xi32>
    %cst_110 = arith.constant 0.000000e+00 : f32
    %435 = vector.shape_cast %263 : vector<1x512xf32> to vector<1x512xf32>
    %436 = vector.broadcast %435 : vector<1x512xf32> to vector<128x512xf32>
    %437 = vector.broadcast %cst_110 : f32 to vector<128x512xf32>
    %438 = arith.select %434, %436, %437 : vector<128x512xi1>, vector<128x512xf32>
    %439 = arith.addf %432, %438 : vector<128x512xf32>
    %440 = vector.broadcast %347 : vector<1x512xi32> to vector<128x512xi32>
    %441 = arith.cmpi eq, %394, %440 : vector<128x512xi32>
    %cst_111 = arith.constant 0.000000e+00 : f32
    %442 = vector.shape_cast %309 : vector<1x512xf32> to vector<1x512xf32>
    %443 = vector.broadcast %442 : vector<1x512xf32> to vector<128x512xf32>
    %444 = vector.broadcast %cst_111 : f32 to vector<128x512xf32>
    %445 = arith.select %441, %443, %444 : vector<128x512xi1>, vector<128x512xf32>
    %446 = arith.addf %439, %445 : vector<128x512xf32>
    %447 = vector.broadcast %393 : vector<1x512xi32> to vector<128x512xi32>
    %448 = arith.cmpi eq, %394, %447 : vector<128x512xi32>
    %cst_112 = arith.constant 0.000000e+00 : f32
    %449 = vector.shape_cast %355 : vector<1x512xf32> to vector<1x512xf32>
    %450 = vector.broadcast %449 : vector<1x512xf32> to vector<128x512xf32>
    %451 = vector.broadcast %cst_112 : f32 to vector<128x512xf32>
    %452 = arith.select %448, %450, %451 : vector<128x512xi1>, vector<128x512xf32>
    %453 = arith.addf %446, %452 : vector<128x512xf32>
    %454 = arith.truncf %453 : vector<128x512xf32> to vector<128x512xbf16>
    %cst_113 = arith.constant dense<0.000000e+00> : vector<8x512xf32>
    %455 = tpu.matmul %396, %454, %cst_113 {dimension_numbers = #tpu.dot_dimension_numbers<[1], [0], [0], [1], [0, 0, 1, 1], [], []>} : vector<8x128xbf16>, vector<128x512xbf16>, vector<8x512xf32> -> vector<8x512xf32>
    %c0_114 = arith.constant 0 : index
    %c0_115 = arith.constant 0 : index
    %c0_116 = arith.constant 0 : index
    %456 = vector.load %arg8[%c0_114, %c0_115, %c0_116] : memref<1x8x512xf32, #tpu.memory_space<vmem>>, vector<1x8x512xf32>
    %457 = vector.shape_cast %456 : vector<1x8x512xf32> to vector<8x512xf32>
    %458 = vector.shape_cast %455 : vector<8x512xf32> to vector<1x8x512xf32>
    tpu.vector_store %arg8[%c0_114, %c0_115, %c0_116], %458 {strides = array<i32>} : memref<1x8x512xf32, #tpu.memory_space<vmem>>, vector<1x8x512xf32>,
    return
  }
  func.func @transform_0(%arg0: i32, %arg1: i32, %arg2: memref<1xi32, #tpu.memory_space<smem>>, %arg3: memref<1xi32, #tpu.memory_space<smem>>, %arg4: memref<1xi32, #tpu.memory_space<smem>>, %arg5: memref<3xi32, #tpu.memory_space<smem>>) -> (i32, i32) {
    %c0_i32 = arith.constant 0 : i32
    %c0_i32_0 = arith.constant 0 : i32
    return %c0_i32, %arg1 : i32, i32
  }
  func.func @transform_1(%arg0: i32, %arg1: i32, %arg2: memref<1xi32, #tpu.memory_space<smem>>, %arg3: memref<1xi32, #tpu.memory_space<smem>>, %arg4: memref<1xi32, #tpu.memory_space<smem>>, %arg5: memref<3xi32, #tpu.memory_space<smem>>) -> (i32, i32, i32) {
    %c0_i32 = arith.constant 0 : i32
    %c0_i32_0 = arith.constant 0 : i32
    %c0_i32_1 = arith.constant 0 : i32
    return %arg0, %c0_i32, %c0_i32_0 : i32, i32, i32
  }
  func.func @transform_2(%arg0: i32, %arg1: i32, %arg2: memref<1xi32, #tpu.memory_space<smem>>, %arg3: memref<1xi32, #tpu.memory_space<smem>>, %arg4: memref<1xi32, #tpu.memory_space<smem>>, %arg5: memref<3xi32, #tpu.memory_space<smem>>) -> (i32, i32, i32) {
    %c0_i32 = arith.constant 0 : i32
    %c0_i32_0 = arith.constant 0 : i32
    return %arg0, %c0_i32, %arg1 : i32, i32, i32
  }
}

</mosaic_0001>

<bundles_post_ra>
// kernel: tpu_custom_call.1
= control target key start
LH: loop header
LB: loop body
LE: loop exit
PB: predicated region body
PF: predicated region fallthrough
CT: control target
= control target key end

     0   :  { %s2018_s24 = smov [#allocation6]   ;;  %s3919_s0 = inlined_call_operand.<no memory space> [shape: s32[1], index: 0, kind: input, shape index: {}]   ;;  %s3920_s1 = inlined_call_operand.<no memory space> [shape: s32[1], index: 1, kind: input, shape index: {}]   ;;  %s3921_s2 = inlined_call_operand.<no memory space> [shape: s32[1], index: 2, kind: input, shape index: {}]   ;;  %s3922_s3 = inlined_call_operand.vmem [shape: s32[3], index: 3, kind: input, shape index: {}]   ;;  %s3923_s4 = inlined_call_operand.hbm [shape: f32[3,512], index: 4, kind: input, shape index: {}]   ;;  %s3924_s5 = inlined_call_operand.vmem [shape: bf16[1,8,128], index: 5, kind: input, shape index: {}]   ;;  %s3925_s6 = inlined_call_operand.hbm [shape: f32[1,8,512], index: 6, kind: output, shape index: {}]  }
   0x1   :  { %s15_s23 = sshll.u32 %s3922_s3, 4  ;;  %s16_s23 = int_to_ptr.vmem [resolvable:$true] %s15_s23 }
   0x2   :  { %18 = dma.vmem_to_smem %s16_s23, 16, %s2018_s24, [#allocation2] }
   0x3   :  { %2012 = dma.done.wait [#allocation2], 16 }
   0x4   :  { %2013 = vsyncadd [#allocation2], 4294967280 }
   0x5   :  { %21 = sfence }
   0x6   :  { %22 = vsyncpa [#allocation8], 0 }
   0x7   :  { %23 = vsyncpa [#allocation9], 0  ;;  %s29_s27 = sshll.u32 %s3923_s4, 4  ;;  %s2019_s28 = smov [#allocation7]   ;;  %s30_s27 = int_to_ptr.hbm [resolvable:$true] %s29_s27 }
   0x8   :  { %s31_s29 = sshll.u32 %s2019_s28, 4  ;;  %s32_s29 = int_to_ptr.vmem [resolvable:$true] %s31_s29 }
   0x9   :  { %34 = dma.hbm_to_vmem [thread:$0]  %s30_s27, 256, %s32_s29, [#allocation8]  }
   0xa   :  { %2014 = dma.done.wait [#allocation8], 256  }
   0xb   :  { %2015 = vsyncadd [#allocation8], 4294967040  ;;  %s1940_s7 = sadd.s32 4294967295, %s3919_s0  ;;  %s2065_s9 = sld [smem:[#allocation6]]  ;;  %v177_v1 = vlaneseq  ;;  %v2077_v8 = vstv %s3920_s1  ;;  %v2084_v12 = vstv %s3921_s2 }
   0xc   :  { %s43_s8 = scvt.s32.f32 %s1940_s7  ;;  %s2067_s10 = sld [smem:[#allocation6 + $0x1]]  ;;  %v46_v2 = vld [vmem:[#allocation7] ss:$4 sm:$0xf] }
   0xd   :  { %s2069_s11 = sld [smem:[#allocation6 + $0x2]]  ;;  %s93_s13 = ssub.s32 1, %s3921_s2  ;;  %v53_v3 = vld [vmem:[#allocation7 + $0x1] ss:$4 sm:$0xf]  ;;  %v2079_v9 = vshrl.u32 %v177_v1, 7 }
   0xe   :  { %v47_v0 = vstv %s43_s8  ;;  %v59_v6 = vld [vmem:[#allocation7 + $0x2] ss:$4 sm:$0xf]  ;;  %v2086_v13 = vstv %s93_s13  ;;  %s1930_s20 = sshll.u32 %s3925_s6, 4  ;;  %s1931_s20 = int_to_ptr.hbm [resolvable:$true] %s1930_s20 }
   0xf   :  { %v48_v4 = vmul.f32 %v47_v0, %v46_v2  ;;  %v54_v5 = vmul.f32 %v53_v3, %v47_v0  ;;  %v60_v7 = vmul.f32 %v59_v6, %v47_v0  ;;  %4096 = vst [vmem:[#allocation14_spill] sm:$0xff] %v2079_v9  ;;  %v2094_v24 = vadd.s32 112, %v2079_v9 }
  0x10   :  { %v2097_v25 = vadd.s32 120, %v2079_v9 }
  0x11   :  { %v49_v10 = vfloor.f32 %v48_v4  ;;  %v55_v11 = vfloor.f32 %v54_v5  ;;  %v61_v14 = vfloor.f32 %v60_v7  ;;  %v77_v15 = vstv %s2065_s9 }
  0x12   :  { %v81_v16 = vstv %s2067_s10 }
  0x13   :  { %v86_v17 = vstv %s2069_s11  ;;  %v1944_v18 = vcvt.f32.s32 %v49_v10  ;;  %v51_v19 = vsub.f32 %v48_v4, %v49_v10  ;;  %v1946_v20 = vcvt.f32.s32 %v55_v11 }
  0x14   :  { %v57_v21 = vsub.f32 %v54_v5, %v55_v11  ;;  %v1948_v22 = vcvt.f32.s32 %v61_v14  ;;  %v2091_v23 = vsub.f32 %v60_v7, %v61_v14 }
  0x15   :  { %v64_v26 = vsub.f32 1.0, %v51_v19  ;;  %v69_v28 = vmul.u32 2654435761, %v1946_v20  ;;  %v78_v29 = vmul.u32 %v1944_v18, %v77_v15  ;;  %v82_v32 = vmul.u32 %v1946_v20, %v81_v16 }
  0x16   :  { %v65_v27 = vsub.f32 1.0, %v57_v21  ;;  %v67_v30 = vsub.f32 1.0, %v2091_v23  ;;  %v71_v31 = vmul.u32 805459861, %v1948_v22  ;;  %v87_v33 = vmul.u32 %v1948_v22, %v86_v17 }
  0x17   :  { %v2102_v35 = vxor.u32 %v1944_v18, %v69_v28  ;;  %v97_v36 = vadd.s32 1, %v1944_v18  ;;  %v83_v38 = vadd.s32 %v82_v32, %v78_v29  ;;  %v111_v39 = vadd.s32 1, %v1946_v20 }
  0x18   :  { %v66_v34 = vmul.f32 %v65_v27, %v64_v26  ;;  %v98_v37 = vmul.f32 %v65_v27, %v51_v19  ;;  %v112_v40 = vmul.f32 %v64_v26, %v57_v21  ;;  %v126_v41 = vmul.f32 %v57_v21, %v51_v19 }
  0x19   :  { %v72_v43 = vxor.u32 %v71_v31, %v2102_v35  ;;  %v100_v45 = vxor.u32 %v97_v36, %v69_v28  ;;  %v88_v46 = vadd.s32 %v87_v33, %v83_v38  ;;  %v103_v47 = vmul.u32 %v97_v36, %v77_v15 }
  0x1a   :  { %v2104_v42 = vmul.f32 %v67_v30, %v66_v34  ;;  %v2107_v44 = vmul.f32 %v98_v37, %v67_v30  ;;  %v2109_v48 = vmul.f32 %v112_v40, %v67_v30  ;;  %v114_v49 = vmul.u32 2654435761, %v111_v39 }
  0x1b   :  { %v74_v50 = vand.u32 %v2077_v8, %v72_v43  ;;  %v101_v51 = vxor.u32 %v100_v45, %v71_v31  ;;  %v118_v52 = vmul.u32 %v111_v39, %v81_v16  ;;  %v2112_v53 = vmul.f32 %v126_v41, %v67_v30 }
  0x1c   :  { %vm89_vm0 = vcmp.lt.s32.totalorder %v88_v46, %v2077_v8  ;;  %v104_v54 = vadd.s32 %v103_v47, %v82_v32  ;;  %v115_v55 = vxor.u32 %v1944_v18, %v114_v49  ;;  %v2115_v56 = vxor.u32 %v114_v49, %v97_v36 }
  0x1d   :  { %v90_v57 = vsel %vm89_vm0, %v88_v46, %v2077_v8  ;;  %v92_v58 = vmul.u32 %v2084_v12, %v74_v50  ;;  %v102_v59 = vand.u32 %v101_v51, %v2077_v8  ;;  %v119_v60 = vadd.s32 %v118_v52, %v78_v29 }
  0x1e   :  { %v95_v61 = vmul.u32 %v2086_v13, %v90_v57  ;;  %v105_v62 = vadd.s32 %v104_v54, %v87_v33  ;;  %v116_v63 = vxor.u32 %v115_v55, %v71_v31  ;;  %v129_v0 = vxor.u32 %v2115_v56, %v71_v31 }
  0x1f   :  { %v108_v1 = vmul.u32 %v102_v59, %v2084_v12  ;;  %v120_v2 = vadd.s32 %v119_v60, %v87_v33  ;;  %v131_v3 = vadd.s32 %v118_v52, %v103_v47  ;;  %v138_v4 = vadd.s32 1, %v1948_v22 }
  0x20   :  { %v96_v5 = vadd.s32 %v95_v61, %v92_v58  ;;  %vm106_vm1 = vcmp.lt.s32.totalorder %v105_v62, %v2077_v8  ;;  %v117_v6 = vand.u32 %v116_v63, %v2077_v8  ;;  %v130_v7 = vand.u32 %v129_v0, %v2077_v8 }
  0x21   :  { %v107_v10 = vsel %vm106_vm1, %v105_v62, %v2077_v8  ;;  %vm121_vm2 = vcmp.lt.s32.totalorder %v120_v2, %v2077_v8  ;;  %v132_v11 = vadd.s32 %v131_v3, %v87_v33  ;;  %v2129_v14 = vmul.f32 %v66_v34, %v2091_v23 }
  0x22   :  { %v109_v15 = vmul.u32 %v107_v10, %v2086_v13  ;;  %v122_v16 = vsel %vm121_vm2, %v120_v2, %v2077_v8  ;;  %v123_v18 = vmul.u32 %v117_v6, %v2084_v12  ;;  %v135_v19 = vmul.u32 %v130_v7, %v2084_v12 }
  0x23   :  { %v124_v20 = vmul.u32 %v122_v16, %v2086_v13  ;;  %vm133_vm3 = vcmp.lt.s32.totalorder %v132_v11, %v2077_v8  ;;  %v140_v21 = vmul.u32 805459861, %v138_v4  ;;  %v143_v22 = vmul.u32 %v138_v4, %v86_v17 }
  0x24   :  { %v110_v26 = vadd.s32 %v109_v15, %v108_v1  ;;  %v134_v27 = vsel %vm133_vm3, %v132_v11, %v2077_v8  ;;  %v2141_v28 = vmul.f32 %v98_v37, %v2091_v23  ;;  %v2144_v29 = vmul.f32 %v112_v40, %v2091_v23 }
  0x25   :  { %v125_v30 = vadd.s32 %v124_v20, %v123_v18  ;;  %v136_v31 = vmul.u32 %v134_v27, %v2086_v13  ;;  %v141_v32 = vxor.u32 %v140_v21, %v2102_v35  ;;  %v144_v33 = vadd.s32 %v143_v22, %v83_v38 }
  0x26   :  { %v151_v34 = vxor.u32 %v140_v21, %v100_v45  ;;  %v153_v36 = vadd.s32 %v143_v22, %v104_v54  ;;  %v160_v39 = vxor.u32 %v140_v21, %v115_v55  ;;  %v162_v43 = vadd.s32 %v143_v22, %v119_v60 }
  0x27   :  { %v137_v17 = vadd.s32 %v136_v31, %v135_v19  ;;  %v142_v46 = vand.u32 %v141_v32, %v2077_v8  ;;  %vm145_vm4 = vcmp.lt.s32.totalorder %v144_v33, %v2077_v8  ;;  %v2151_v37 = vmul.f32 %v126_v41, %v2091_v23 }
  0x28   :  { %v146_v40 = vsel %vm145_vm4, %v144_v33, %v2077_v8  ;;  %v152_v47 = vand.u32 %v151_v34, %v2077_v8  ;;  %vm154_vm5 = vcmp.lt.s32.totalorder %v153_v36, %v2077_v8  ;;  %v161_v35 = vand.u32 %v160_v39, %v2077_v8 }
  0x29   :  { %v147_v38 = vmul.u32 %v142_v46, %v2084_v12  ;;  %v148_v45 = vmul.u32 %v146_v40, %v2086_v13  ;;  %v155_v49 = vsel %vm154_vm5, %v153_v36, %v2077_v8  ;;  %vm163_vm6 = vcmp.lt.s32.totalorder %v162_v43, %v2077_v8 }
  0x2a   :  { %v156_v50 = vmul.u32 %v152_v47, %v2084_v12  ;;  %v157_v23 = vmul.u32 %v155_v49, %v2086_v13  ;;  %v164_v41 = vsel %vm163_vm6, %v162_v43, %v2077_v8  ;;  %v165_v51 = vmul.u32 %v161_v35, %v2084_v12 }
  0x2b   :  { %v149_v52 = vadd.s32 %v148_v45, %v147_v38  ;;  %v166_v54 = vmul.u32 %v164_v41, %v2086_v13  ;;  %v169_v55 = vxor.u32 %v140_v21, %v2115_v56  ;;  %v171_v57 = vadd.s32 %v143_v22, %v131_v3 }
  0x2c   :  { %v158_v58 = vadd.s32 %v157_v23, %v156_v50  ;;  %v2167_v59 = vperm.slane %v96_v5, 0  ;;  %v2169_v60 = vperm.slane %v96_v5, 1  ;;  %v2171_v61 = vperm.slane %v96_v5, 2 }
  0x2d   :  { %v167_v62 = vadd.s32 %v166_v54, %v165_v51  ;;  %v170_v63 = vand.u32 %v169_v55, %v2077_v8  ;;  %vm172_vm7 = vcmp.lt.s32.totalorder %v171_v57, %v2077_v8  ;;  %v2175_v0 = vperm.slane %v96_v5, 3 }
  0x2e   :  { %4097 = vst [vmem:[#allocation15_spill] sm:$0xff] %v2167_v59  ;;  %v173_v1 = vsel %vm172_vm7, %v171_v57, %v2077_v8  ;;  %v2179_v2 = vperm.slane %v2104_v42, 0  ;;  %v2182_v56 = vperm.slane %v2104_v42, 1  ;;  %v2185_v3 = vperm.slane %v2104_v42, 2 }
  0x2f   :  { %4098 = vst [vmem:[#allocation16_spill] sm:$0xff] %v2169_v60  ;;  %v174_v4 = vmul.u32 %v170_v63, %v2084_v12  ;;  %v175_v6 = vmul.u32 %v173_v1, %v2086_v13  ;;  %v2190_v7 = vperm.slane %v2104_v42, 3  ;;  %v2192_v5 = vperm.slane %v110_v26, 0 }
  0x30   :  { %4099 = vst [vmem:[#allocation17_spill] sm:$0xff] %v2179_v2  ;;  %v2194_v10 = vperm.slane %v110_v26, 1  ;;  %v2196_v8 = vperm.slane %v110_v26, 2  ;;  %v2198_v11 = vperm.slane %v110_v26, 3  ;;  %v2201_v15 = vperm.slane %v2107_v44, 0 }
  0x31   :  { %4100 = vst [vmem:[#allocation18_spill] sm:$0xff] %v2182_v56  ;;  %v176_v16 = vadd.s32 %v175_v6, %v174_v4  ;;  %v2204_v18 = vperm.slane %v2107_v44, 1  ;;  %v2207_v12 = vperm.slane %v2107_v44, 2  ;;  %v2210_v13 = vperm.slane %v2107_v44, 3 }
  0x32   :  { %4101 = vst [vmem:[#allocation19_spill] sm:$0xff] %v2192_v5  ;;  %v2212_v42 = vperm.slane %v125_v30, 0  ;;  %v2214_v19 = vperm.slane %v125_v30, 1  ;;  %v2216_v20 = vperm.slane %v125_v30, 2  ;;  %v2218_v21 = vperm.slane %v125_v30, 3 }
  0x33   :  { %4102 = vst [vmem:[#allocation20_spill] sm:$0xff] %v2194_v10  ;;  %v2221_v22 = vperm.slane %v2109_v48, 0  ;;  %v2224_v26 = vperm.slane %v2109_v48, 1  ;;  %v2227_v27 = vperm.slane %v2109_v48, 2  ;;  %v2230_v44 = vperm.slane %v2109_v48, 3 }
  0x34   :  { %4103 = vst [vmem:[#allocation21_spill] sm:$0xff] %v2201_v15  ;;  %v2232_v31 = vperm.slane %v137_v17, 0  ;;  %v2234_v32 = vperm.slane %v137_v17, 1  ;;  %v2236_v33 = vperm.slane %v137_v17, 2  ;;  %v2238_v30 = vperm.slane %v137_v17, 3 }
  0x35   :  { %4104 = vst [vmem:[#allocation22_spill] sm:$0xff] %v2212_v42  ;;  %v2241_v34 = vperm.slane %v2112_v53, 0  ;;  %v2244_v36 = vperm.slane %v2112_v53, 1  ;;  %v2247_v39 = vperm.slane %v2112_v53, 2  ;;  %v2250_v48 = vperm.slane %v2112_v53, 3 }
  0x36   :  { %4105 = vst [vmem:[#allocation23_spill] sm:$0xff] %v2221_v22  ;;  %v2252_v43 = vperm.slane %v149_v52, 0  ;;  %v2254_v46 = vperm.slane %v149_v52, 1  ;;  %v2256_v40 = vperm.slane %v149_v52, 2  ;;  %v2258_v17 = vperm.slane %v149_v52, 3 }
  0x37   :  { %4106 = vst [vmem:[#allocation24_spill] sm:$0xff] %v2232_v31  ;;  %v2261_v47 = vperm.slane %v2129_v14, 0  ;;  %v2264_v35 = vperm.slane %v2129_v14, 1  ;;  %v2267_v38 = vperm.slane %v2129_v14, 2  ;;  %v2270_v53 = vperm.slane %v2129_v14, 3 }
  0x38   :  { %4107 = vst [vmem:[#allocation25_spill] sm:$0xff] %v2241_v34  ;;  %v2272_v45 = vperm.slane %v158_v58, 0  ;;  %v2274_v49 = vperm.slane %v158_v58, 1  ;;  %v2276_v50 = vperm.slane %v158_v58, 2  ;;  %v2278_v23 = vperm.slane %v158_v58, 3 }
  0x39   :  { %4108 = vst [vmem:[#allocation26_spill] sm:$0xff] %v2252_v43  ;;  %v2281_v41 = vperm.slane %v2141_v28, 0  ;;  %v2284_v51 = vperm.slane %v2141_v28, 1  ;;  %v2287_v52 = vperm.slane %v2141_v28, 2  ;;  %v2290_v14 = vperm.slane %v2141_v28, 3 }
  0x3a   :  { %4109 = vst [vmem:[#allocation27_spill] sm:$0xff] %v2258_v17  ;;  %v2292_v54 = vperm.slane %v167_v62, 0  ;;  %v2294_v55 = vperm.slane %v167_v62, 1  ;;  %v2296_v57 = vperm.slane %v167_v62, 2  ;;  %v2298_v58 = vperm.slane %v167_v62, 3 }
  0x3b   :  { %4110 = vst [vmem:[#allocation28_spill] sm:$0xff] %v2261_v47  ;;  %v2301_v63 = vperm.slane %v2144_v29, 0  ;;  %v2304_v1 = vperm.slane %v2144_v29, 1  ;;  %v2307_v4 = vperm.slane %v2144_v29, 2  ;;  %v2310_v28 = vperm.slane %v2144_v29, 3 }
  0x3c   :  { %4111 = vst [vmem:[#allocation29_spill] sm:$0xff] %v2270_v53  ;;  %v2312_v6 = vperm.slane %v176_v16, 0  ;;  %v2314_v9 = vperm.slane %v176_v16, 1  ;;  %v2318_v62 = vperm.slane %v176_v16, 3  ;;  %v2327_v53 = vperm.slane %v2151_v37, 2 }
  0x3d   :  { %4112 = vst [vmem:[#allocation30_spill] sm:$0xff] %v2272_v45  ;;  %v2330_v29 = vperm.slane %v2151_v37, 3  ;;  %vm255_vm8 = vcmp.eq.s32.totalorder %v2094_v24, %v2167_v59  ;;  %vm259_vm9 = vcmp.eq.s32.totalorder %v2097_v25, %v2167_v59  ;;  %vm460_vm10 = vcmp.eq.s32.totalorder %v2094_v24, %v2192_v5 }
  0x3e   :  { %4113 = vst [vmem:[#allocation31_spill] sm:$0xff] %v2278_v23  ;;  %v2324_v23 = vperm.slane %v2151_v37, 1  ;;  %vm464_vm11 = vcmp.eq.s32.totalorder %v2097_v25, %v2192_v5  ;;  %vm665_vm12 = vcmp.eq.s32.totalorder %v2094_v24, %v2212_v42  ;;  %vm669_vm13 = vcmp.eq.s32.totalorder %v2097_v25, %v2212_v42 }
  0x3f   :  { %4114 = vst [vmem:[#allocation32_spill] sm:$0xff] %v2281_v41  ;;  %v738_v59 = vsel %vm665_vm12, %v2221_v22, 0.0  ;;  %v742_v5 = vsel %vm669_vm13, %v2221_v22, 0.0  ;;  %vm870_vm14 = vcmp.eq.s32.totalorder %v2094_v24, %v2232_v31  ;;  %vm874_vm15 = vcmp.eq.s32.totalorder %v2097_v25, %v2232_v31 }
  0x40   :  { %4115 = vst [vmem:[#allocation33_spill] sm:$0xff] %v2290_v14  ;;  %v2316_v14 = vperm.slane %v176_v16, 2  ;;  %v328_v16 = vsel %vm255_vm8, %v2179_v2, 0.0  ;;  %vm1075_vm0 = vcmp.eq.s32.totalorder %v2094_v24, %v2252_v43  ;;  %vm1079_vm1 = vcmp.eq.s32.totalorder %v2097_v25, %v2252_v43 }
  0x41   :  { %4116 = vst [vmem:[#allocation34_spill] sm:$0xff] %v2292_v54  ;;  %vm1280_vm2 = vcmp.eq.s32.totalorder %v2094_v24, %v2272_v45  ;;  %vm1284_vm3 = vcmp.eq.s32.totalorder %v2097_v25, %v2272_v45  ;;  %vm1485_vm4 = vcmp.eq.s32.totalorder %v2094_v24, %v2292_v54  ;;  %vm1489_vm5 = vcmp.eq.s32.totalorder %v2097_v25, %v2292_v54 }
  0x42   :  { %4117 = vst [vmem:[#allocation35_spill] sm:$0xff] %v2298_v58  ;;  %v2321_v58 = vperm.slane %v2151_v37, 0  ;;  %v537_v37 = vsel %vm464_vm11, %v2201_v15, 0.0  ;;  %v1558_v45 = vsel %vm1485_vm4, %v2301_v63, 0.0  ;;  %vm1690_vm6 = vcmp.eq.s32.totalorder %v2094_v24, %v2312_v6 }
  0x43   :  { %4118 = vst [vmem:[#allocation36_spill] sm:$0xff] %v2301_v63  ;;  %vm1694_vm7 = vcmp.eq.s32.totalorder %v2097_v25, %v2312_v6  ;;  %vm256_vm8 = vcmp.eq.s32.totalorder %v2094_v24, %v2169_v60  ;;  %vm465_vm11 = vcmp.eq.s32.totalorder %v2097_v25, %v2194_v10  ;;  %vm666_vm12 = vcmp.eq.s32.totalorder %v2094_v24, %v2214_v19 }
  0x44   :  { %4119 = vst [vmem:[#allocation37_spill] sm:$0xff] %v2310_v28  ;;  %v533_v28 = vsel %vm460_vm10, %v2201_v15, 0.0  ;;  %vm461_vm10 = vcmp.eq.s32.totalorder %v2094_v24, %v2194_v10  ;;  %vm670_vm13 = vcmp.eq.s32.totalorder %v2097_v25, %v2214_v19  ;;  %vm1486_vm4 = vcmp.eq.s32.totalorder %v2094_v24, %v2294_v55 }
  0x45   :  { %4120 = vst [vmem:[#allocation38_spill] sm:$0xff] %v2312_v6  ;;  %v743_v10 = vsel %vm670_vm13, %v2224_v26, 0.0  ;;  %vm671_vm13 = vcmp.eq.s32.totalorder %v2097_v25, %v2216_v20 }
  0x46   :  { %4121 = vst [vmem:[#allocation39_spill] sm:$0xff] %v2318_v62  ;;  %v332_v62 = vsel %vm259_vm9, %v2179_v2, 0.0  ;;  %vm260_vm9 = vcmp.eq.s32.totalorder %v2097_v25, %v2169_v60  ;;  %v534_v60 = vsel %vm461_vm10, %v2204_v18, 0.0  ;;  %vm462_vm10 = vcmp.eq.s32.totalorder %v2094_v24, %v2196_v8 }
  0x47   :  { %4122 = vst [vmem:[#allocation40_spill] sm:$0xff] %v2321_v58  ;;  %v601_v17 = vadd.f32 %v537_v37, %v332_v62  ;;  %v947_v62 = vsel %vm874_vm15, %v2241_v34, 0.0  ;;  %vm875_vm15 = vcmp.eq.s32.totalorder %v2097_v25, %v2234_v32 }
  0x48   :  { %4123 = vst [vmem:[#allocation41_spill] sm:$0xff] %v2330_v29  ;;  %v597_v29 = vadd.f32 %v533_v28, %v328_v16  ;;  %v943_v28 = vsel %vm870_vm14, %v2241_v34, 0.0  ;;  %vm871_vm14 = vcmp.eq.s32.totalorder %v2094_v24, %v2234_v32 }
  0x49   :  { %v806_v15 = vadd.f32 %v742_v5, %v601_v17  ;;  %v1152_v5 = vsel %vm1079_vm1, %v2261_v47, 0.0  ;;  %v1353_v17 = vsel %vm1280_vm2, %v2281_v41, 0.0  ;;  %vm1080_vm1 = vcmp.eq.s32.totalorder %v2097_v25, %v2254_v46 }
  0x4a   :  { %v802_v2 = vadd.f32 %v738_v59, %v597_v29  ;;  %v1148_v59 = vsel %vm1075_vm0, %v2261_v47, 0.0  ;;  %v1357_v29 = vsel %vm1284_vm3, %v2281_v41, 0.0  ;;  %vm1076_vm0 = vcmp.eq.s32.totalorder %v2094_v24, %v2254_v46 }
  0x4b   :  { %v1011_v37 = vadd.f32 %v947_v62, %v806_v15  ;;  %v1763_v62 = vsel %vm1690_vm6, %v2321_v58, 0.0  ;;  %vm1281_vm2 = vcmp.eq.s32.totalorder %v2094_v24, %v2274_v49  ;;  %vm1285_vm3 = vcmp.eq.s32.totalorder %v2097_v25, %v2274_v49 }
  0x4c   :  { %v1007_v16 = vadd.f32 %v943_v28, %v802_v2  ;;  %v1562_v2 = vsel %vm1489_vm5, %v2301_v63, 0.0  ;;  %vm1490_vm5 = vcmp.eq.s32.totalorder %v2097_v25, %v2294_v55  ;;  %vm1691_vm6 = vcmp.eq.s32.totalorder %v2094_v24, %v2314_v9 }
  0x4d   :  { %v1216_v34 = vadd.f32 %v1152_v5, %v1011_v37  ;;  %v329_v37 = vsel %vm256_vm8, %v2182_v56, 0.0  ;;  %vm257_vm8 = vcmp.eq.s32.totalorder %v2094_v24, %v2171_v61 }
  0x4e   :  { %v1212_v43 = vadd.f32 %v1148_v59, %v1007_v16  ;;  %v1767_v16 = vsel %vm1694_vm7, %v2321_v58, 0.0  ;;  %v333_v59 = vsel %vm260_vm9, %v2182_v56, 0.0  ;;  %v739_v58 = vsel %vm666_vm12, %v2224_v26, 0.0 }
  0x4f   :  { %v1421_v28 = vadd.f32 %v1357_v29, %v1216_v34  ;;  %v538_v34 = vsel %vm465_vm11, %v2204_v18, 0.0  ;;  %vm1695_vm7 = vcmp.eq.s32.totalorder %v2097_v25, %v2314_v9  ;;  %vm261_vm9 = vcmp.eq.s32.totalorder %v2097_v25, %v2171_v61 }
  0x50   :  { %v1417_v15 = vadd.f32 %v1353_v17, %v1212_v43  ;;  %v598_v43 = vadd.f32 %v534_v60, %v329_v37  ;;  %v602_v17 = vadd.f32 %v538_v34, %v333_v59  ;;  %v1354_v37 = vsel %vm1281_vm2, %v2284_v51, 0.0 }
  0x51   :  { %v1626_v6 = vadd.f32 %v1562_v2, %v1421_v28  ;;  %v948_v28 = vsel %vm875_vm15, %v2244_v36, 0.0  ;;  %v1358_v59 = vsel %vm1285_vm3, %v2284_v51, 0.0  ;;  %vm466_vm11 = vcmp.eq.s32.totalorder %v2097_v25, %v2196_v8 }
  0x52   :  { %v1622_v5 = vadd.f32 %v1558_v45, %v1417_v15  ;;  %v803_v45 = vadd.f32 %v739_v58, %v598_v43  ;;  %v807_v2 = vadd.f32 %v743_v10, %v602_v17  ;;  %v944_v15 = vsel %vm871_vm14, %v2244_v36, 0.0 }
  0x53   :  { %v1831_v56 = vadd.f32 %v1767_v16, %v1626_v6  ;;  %v1149_v10 = vsel %vm1076_vm0, %v2264_v35, 0.0  ;;  %v1153_v58 = vsel %vm1080_vm1, %v2264_v35, 0.0  ;;  %v1563_v17 = vsel %vm1490_vm5, %v2304_v1, 0.0 }
  0x54   :  { %v1827_v29 = vadd.f32 %v1763_v62, %v1622_v5  ;;  %v1008_v6 = vadd.f32 %v944_v15, %v803_v45  ;;  %v1012_v62 = vadd.f32 %v948_v28, %v807_v2  ;;  %v1559_v5 = vsel %vm1486_vm4, %v2304_v1, 0.0 }
  0x55   :  { %v1768_v45 = vsel %vm1695_vm7, %v2324_v23, 0.0  ;;  %v330_v15 = vsel %vm257_vm8, %v2185_v3, 0.0  ;;  %v334_v28 = vsel %vm261_vm9, %v2185_v3, 0.0  ;;  %vm667_vm12 = vcmp.eq.s32.totalorder %v2094_v24, %v2216_v20 }
  0x56   :  { %v1863_v60 = vpack.c.bf16 %v1831_v56, %v1827_v29  ;;  %v1213_v56 = vadd.f32 %v1149_v10, %v1008_v6  ;;  %v1217_v16 = vadd.f32 %v1153_v58, %v1012_v62  ;;  %v1764_v29 = vsel %vm1691_vm6, %v2324_v23, 0.0 }
  0x57   :  { %v535_v6 = vsel %vm462_vm10, %v2207_v12, 0.0  ;;  %v539_v58 = vsel %vm466_vm11, %v2207_v12, 0.0  ;;  %vm872_vm14 = vcmp.eq.s32.totalorder %v2094_v24, %v2236_v33  ;;  %vm876_vm15 = vcmp.eq.s32.totalorder %v2097_v25, %v2236_v33 }
  0x58   :  { %1867 = vmatpush.bf16.msra.mxu0 %v1863_v60  ;;  %v1418_v34 = vadd.f32 %v1354_v37, %v1213_v56  ;;  %v1422_v43 = vadd.f32 %v1358_v59, %v1217_v16  ;;  %v599_v56 = vadd.f32 %v535_v6, %v330_v15  ;;  %v603_v16 = vadd.f32 %v539_v58, %v334_v28 }
  0x59   :  { %v740_v37 = vsel %vm667_vm12, %v2227_v27, 0.0  ;;  %v744_v59 = vsel %vm671_vm13, %v2227_v27, 0.0  ;;  %vm1077_vm0 = vcmp.eq.s32.totalorder %v2094_v24, %v2256_v40  ;;  %vm1081_vm1 = vcmp.eq.s32.totalorder %v2097_v25, %v2256_v40 }
  0x5a   :  { %v1623_v2 = vadd.f32 %v1559_v5, %v1418_v34  ;;  %v1627_v60 = vadd.f32 %v1563_v17, %v1422_v43  ;;  %v804_v34 = vadd.f32 %v740_v37, %v599_v56  ;;  %v945_v43 = vsel %vm872_vm14, %v2247_v39, 0.0 }
  0x5b   :  { %v808_v17 = vadd.f32 %v744_v59, %v603_v16  ;;  %vm1282_vm2 = vcmp.eq.s32.totalorder %v2094_v24, %v2276_v50  ;;  %vm1286_vm3 = vcmp.eq.s32.totalorder %v2097_v25, %v2276_v50  ;;  %vm1487_vm4 = vcmp.eq.s32.totalorder %v2094_v24, %v2296_v57 }
  0x5c   :  { %v1828_v62 = vadd.f32 %v1764_v29, %v1623_v2  ;;  %v1832_v10 = vadd.f32 %v1768_v45, %v1627_v60  ;;  %v949_v29 = vsel %vm876_vm15, %v2247_v39, 0.0  ;;  %v1009_v45 = vadd.f32 %v945_v43, %v804_v34 }
  0x5d   :  { %v1150_v2 = vsel %vm1077_vm0, %v2267_v38, 0.0  ;;  %v1154_v60 = vsel %vm1081_vm1, %v2267_v38, 0.0  ;;  %v1013_v15 = vadd.f32 %v949_v29, %v808_v17  ;;  %v1355_v28 = vsel %vm1282_vm2, %v2287_v52, 0.0 }
  0x5e   :  { %v1864_v5 = vpack.c.bf16 %v1832_v10, %v1828_v62  ;;  %v1214_v6 = vadd.f32 %v1150_v2, %v1009_v45  ;;  %v1359_v62 = vsel %vm1286_vm3, %v2287_v52, 0.0  ;;  %vm1491_vm5 = vcmp.eq.s32.totalorder %v2097_v25, %v2296_v57 }
  0x5f   :  { %v1560_v10 = vsel %vm1487_vm4, %v2307_v4, 0.0  ;;  %v1218_v58 = vadd.f32 %v1154_v60, %v1013_v15  ;;  %v1564_v56 = vsel %vm1491_vm5, %v2307_v4, 0.0  ;;  %vm1692_vm6 = vcmp.eq.s32.totalorder %v2094_v24, %v2316_v14 }
  0x60   :  { %1880 = vmatpush.bf16.msra.mxu1 %v1864_v5  ;;  %vm1696_vm7 = vcmp.eq.s32.totalorder %v2097_v25, %v2316_v14  ;;  %v1419_v16 = vadd.f32 %v1355_v28, %v1214_v6  ;;  %v1765_v37 = vsel %vm1692_vm6, %v2327_v53, 0.0  ;;  %vm258_vm8 = vcmp.eq.s32.totalorder %v2094_v24, %v2175_v0 }
  0x61   :  { %v1769_v59 = vsel %vm1696_vm7, %v2327_v53, 0.0  ;;  %v1423_v5 = vadd.f32 %v1359_v62, %v1218_v58  ;;  %vm262_vm9 = vcmp.eq.s32.totalorder %v2097_v25, %v2175_v0  ;;  %v331_v34 = vsel %vm258_vm8, %v2190_v7, 0.0 }
  0x62   :  { %vm463_vm10 = vcmp.eq.s32.totalorder %v2094_v24, %v2198_v11  ;;  %v1624_v43 = vadd.f32 %v1560_v10, %v1419_v16  ;;  %v335_v17 = vsel %vm262_vm9, %v2190_v7, 0.0  ;;  %vm467_vm11 = vcmp.eq.s32.totalorder %v2097_v25, %v2198_v11 }
  0x63   :  { %v536_v29 = vsel %vm463_vm10, %v2210_v13, 0.0  ;;  %v1628_v45 = vadd.f32 %v1564_v56, %v1423_v5  ;;  %v540_v2 = vsel %vm467_vm11, %v2210_v13, 0.0  ;;  %vm668_vm12 = vcmp.eq.s32.totalorder %v2094_v24, %v2218_v21 }
  0x64   :  { %v600_v60 = vadd.f32 %v536_v29, %v331_v34  ;;  %v1829_v15 = vadd.f32 %v1765_v37, %v1624_v43  ;;  %v604_v28 = vadd.f32 %v540_v2, %v335_v17  ;;  %vm672_vm13 = vcmp.eq.s32.totalorder %v2097_v25, %v2218_v21  ;;  %v4124_v37 = vld [vmem:[#allocation27_spill] sm:$0xff]  ;;  %v4125_v17 = vld [vmem:[#allocation29_spill] sm:$0xff] }
  0x65   :  { %v741_v6 = vsel %vm668_vm12, %v2230_v44, 0.0  ;;  %v1833_v62 = vadd.f32 %v1769_v59, %v1628_v45  ;;  %v745_v10 = vsel %vm672_vm13, %v2230_v44, 0.0  ;;  %vm873_vm14 = vcmp.eq.s32.totalorder %v2094_v24, %v2238_v30  ;;  %v4126_v2 = vld [vmem:[#allocation31_spill] sm:$0xff] }
  0x66   :  { %v805_v58 = vadd.f32 %v741_v6, %v600_v60  ;;  %v809_v56 = vadd.f32 %v745_v10, %v604_v28  ;;  %vm877_vm15 = vcmp.eq.s32.totalorder %v2097_v25, %v2238_v30  ;;  %v946_v16 = vsel %vm873_vm14, %v2250_v48, 0.0  ;;  %v4128_v6 = vld [vmem:[#allocation35_spill] sm:$0xff] }
  0x67   :  { %vm1078_vm0 = vcmp.eq.s32.totalorder %v2094_v24, %v4124_v37  ;;  %v1865_v5 = vpack.c.bf16 %v1833_v62, %v1829_v15  ;;  %v950_v34 = vsel %vm877_vm15, %v2250_v48, 0.0  ;;  %vm1082_vm1 = vcmp.eq.s32.totalorder %v2097_v25, %v4124_v37  ;;  %v4127_v15 = vld [vmem:[#allocation33_spill] sm:$0xff] }
  0x68   :  { %v1010_v43 = vadd.f32 %v946_v16, %v805_v58  ;;  %v1014_v59 = vadd.f32 %v950_v34, %v809_v56  ;;  %v1151_v29 = vsel %vm1078_vm0, %v4125_v17, 0.0  ;;  %v1155_v45 = vsel %vm1082_vm1, %v4125_v17, 0.0  ;;  %v4129_v58 = vld [vmem:[#allocation37_spill] sm:$0xff]  ;;  %v4130_v34 = vld [vmem:[#allocation39_spill] sm:$0xff] }
  0x69   :  { %vm1283_vm2 = vcmp.eq.s32.totalorder %v2094_v24, %v4126_v2  ;;  %1893 = vmatpush.bf16.msra.mxu2 %v1865_v5  ;;  %vm1287_vm3 = vcmp.eq.s32.totalorder %v2097_v25, %v4126_v2  ;;  %vm1488_vm4 = vcmp.eq.s32.totalorder %v2094_v24, %v4128_v6  ;;  %vm1492_vm5 = vcmp.eq.s32.totalorder %v2097_v25, %v4128_v6 }
  0x6a   :  { %v1215_v60 = vadd.f32 %v1151_v29, %v1010_v43  ;;  %v1356_v28 = vsel %vm1283_vm2, %v4127_v15, 0.0  ;;  %v1219_v62 = vadd.f32 %v1155_v45, %v1014_v59  ;;  %v1360_v10 = vsel %vm1287_vm3, %v4127_v15, 0.0  ;;  %v4131_v29 = vld [vmem:[#allocation41_spill] sm:$0xff]  ;;  %v4132_v59 = vld [vmem:[#allocation14_spill] sm:$0xff] }
  0x6b   :  { %v1561_v56 = vsel %vm1488_vm4, %v4129_v58, 0.0  ;;  %v1565_v5 = vsel %vm1492_vm5, %v4129_v58, 0.0  ;;  %vm1693_vm6 = vcmp.eq.s32.totalorder %v2094_v24, %v4130_v34  ;;  %vm1697_vm7 = vcmp.eq.s32.totalorder %v2097_v25, %v4130_v34  ;;  %v4134_v24 = vld [vmem:[#allocation19_spill] sm:$0xff] }
  0x6c   :  { %v1420_v16 = vadd.f32 %v1356_v28, %v1215_v60  ;;  %v1424_v43 = vadd.f32 %v1360_v10, %v1219_v62  ;;  %v1766_v2 = vsel %vm1693_vm6, %v4131_v29, 0.0  ;;  %v2524_v45 = vadd.s32 96, %v4132_v59  ;;  %v4133_v28 = vld [vmem:[#allocation15_spill] sm:$0xff]  ;;  %v4135_v62 = vld [vmem:[#allocation17_spill] sm:$0xff] }
  0x6d   :  { %v1770_v6 = vsel %vm1697_vm7, %v4131_v29, 0.0  ;;  %v2528_v17 = vadd.s32 104, %v4132_v59 }
  0x6e   :  { %v1625_v15 = vadd.f32 %v1561_v56, %v1420_v16  ;;  %v1629_v60 = vadd.f32 %v1565_v5, %v1424_v43  ;;  %vm247_vm8 = vcmp.eq.s32.totalorder %v2524_v45, %v4133_v28  ;;  %vm452_vm9 = vcmp.eq.s32.totalorder %v2524_v45, %v4134_v24  ;;  %v4136_v5 = vld [vmem:[#allocation21_spill] sm:$0xff] }
  0x6f   :  { %vm657_vm10 = vcmp.eq.s32.totalorder %v2524_v45, %v2212_v42  ;;  %vm251_vm11 = vcmp.eq.s32.totalorder %v2528_v17, %v4133_v28  ;;  %v320_v10 = vsel %vm247_vm8, %v4135_v62, 0.0  ;;  %vm456_vm12 = vcmp.eq.s32.totalorder %v2528_v17, %v4134_v24 }
  0x70   :  { %v1830_v25 = vadd.f32 %v1766_v2, %v1625_v15  ;;  %v1834_v56 = vadd.f32 %v1770_v6, %v1629_v60  ;;  %v324_v16 = vsel %vm251_vm11, %v4135_v62, 0.0  ;;  %v525_v43 = vsel %vm452_vm9, %v4136_v5, 0.0  ;;  %v4137_v62 = vld [vmem:[#allocation25_spill] sm:$0xff] }
  0x71   :  { %v529_v59 = vsel %vm456_vm12, %v4136_v5, 0.0  ;;  %v589_v29 = vadd.f32 %v525_v43, %v320_v10  ;;  %vm661_vm13 = vcmp.eq.s32.totalorder %v2528_v17, %v2212_v42  ;;  %v730_v2 = vsel %vm657_vm10, %v2221_v22, 0.0  ;;  %v4138_v10 = vld [vmem:[#allocation26_spill] sm:$0xff] }
  0x72   :  { %v593_v34 = vadd.f32 %v529_v59, %v324_v16  ;;  %v1866_v15 = vpack.c.bf16 %v1834_v56, %v1830_v25  ;;  %v734_v28 = vsel %vm661_vm13, %v2221_v22, 0.0  ;;  %vm862_vm14 = vcmp.eq.s32.totalorder %v2524_v45, %v2232_v31  ;;  %v4139_v25 = vld [vmem:[#allocation30_spill] sm:$0xff] }
  0x73   :  { %vm866_vm15 = vcmp.eq.s32.totalorder %v2528_v17, %v2232_v31  ;;  %v794_v6 = vadd.f32 %v730_v2, %v589_v29  ;;  %v935_v5 = vsel %vm862_vm14, %v4137_v62, 0.0  ;;  %vm1067_vm0 = vcmp.eq.s32.totalorder %v2524_v45, %v4138_v10 }
  0x74   :  { %v798_v60 = vadd.f32 %v734_v28, %v593_v34  ;;  %v939_v59 = vsel %vm866_vm15, %v4137_v62, 0.0  ;;  %1906 = vmatpush.bf16.msra.mxu3 %v1866_v15  ;;  %vm1071_vm1 = vcmp.eq.s32.totalorder %v2528_v17, %v4138_v10  ;;  %vm1272_vm2 = vcmp.eq.s32.totalorder %v2524_v45, %v4139_v25 }
  0x75   :  { %vm1276_vm3 = vcmp.eq.s32.totalorder %v2528_v17, %v4139_v25  ;;  %v999_v56 = vadd.f32 %v935_v5, %v794_v6  ;;  %v1140_v34 = vsel %vm1067_vm0, %v2261_v47, 0.0  ;;  %v1144_v28 = vsel %vm1071_vm1, %v2261_v47, 0.0  ;;  %v4140_v6 = vld [vmem:[#allocation38_spill] sm:$0xff]  ;;  %v4144_v47 = vld [vmem:[#allocation20_spill] sm:$0xff] }
  0x76   :  { %v1003_v29 = vadd.f32 %v939_v59, %v798_v60  ;;  %v1345_v16 = vsel %vm1272_vm2, %v2281_v41, 0.0  ;;  %v1349_v43 = vsel %vm1276_vm3, %v2281_v41, 0.0  ;;  %vm1477_vm4 = vcmp.eq.s32.totalorder %v2524_v45, %v2292_v54  ;;  %v4141_v60 = vld [vmem:[#allocation16_spill] sm:$0xff] }
  0x77   :  { %vm1481_vm5 = vcmp.eq.s32.totalorder %v2528_v17, %v2292_v54  ;;  %v1204_v2 = vadd.f32 %v1140_v34, %v999_v56  ;;  %v1550_v25 = vsel %vm1477_vm4, %v2301_v63, 0.0  ;;  %vm1682_vm6 = vcmp.eq.s32.totalorder %v2524_v45, %v4140_v6  ;;  %v4142_v56 = vld [vmem:[#allocation40_spill] sm:$0xff] }
  0x78   :  { %v1208_v15 = vadd.f32 %v1144_v28, %v1003_v29  ;;  %v1554_v5 = vsel %vm1481_vm5, %v2301_v63, 0.0  ;;  %vm1686_vm7 = vcmp.eq.s32.totalorder %v2528_v17, %v4140_v6  ;;  %vm248_vm8 = vcmp.eq.s32.totalorder %v2524_v45, %v4141_v60  ;;  %v4143_v28 = vld [vmem:[#allocation18_spill] sm:$0xff] }
  0x79   :  { %vm252_vm9 = vcmp.eq.s32.totalorder %v2528_v17, %v4141_v60  ;;  %v1409_v59 = vadd.f32 %v1345_v16, %v1204_v2  ;;  %v1755_v29 = vsel %vm1682_vm6, %v4142_v56, 0.0  ;;  %v1759_v34 = vsel %vm1686_vm7, %v4142_v56, 0.0 }
  0x7a   :  { %v1413_v54 = vadd.f32 %v1349_v43, %v1208_v15  ;;  %v321_v63 = vsel %vm248_vm8, %v4143_v28, 0.0  ;;  %v325_v41 = vsel %vm252_vm9, %v4143_v28, 0.0  ;;  %vm453_vm10 = vcmp.eq.s32.totalorder %v2524_v45, %v4144_v47 }
  0x7b   :  { %vm457_vm11 = vcmp.eq.s32.totalorder %v2528_v17, %v4144_v47  ;;  %v1614_v6 = vadd.f32 %v1550_v25, %v1409_v59  ;;  %v526_v60 = vsel %vm453_vm10, %v2204_v18, 0.0  ;;  %vm658_vm12 = vcmp.eq.s32.totalorder %v2524_v45, %v2214_v19 }
  0x7c   :  { %v1618_v10 = vadd.f32 %v1554_v5, %v1413_v54  ;;  %v530_v16 = vsel %vm457_vm11, %v2204_v18, 0.0  ;;  %v590_v43 = vadd.f32 %v526_v60, %v321_v63  ;;  %vm662_vm13 = vcmp.eq.s32.totalorder %v2528_v17, %v2214_v19 }
  0x7d   :  { %v594_v2 = vadd.f32 %v530_v16, %v325_v41  ;;  %v1819_v15 = vadd.f32 %v1755_v29, %v1614_v6  ;;  %v731_v56 = vsel %vm658_vm12, %v2224_v26, 0.0  ;;  %v735_v47 = vsel %vm662_vm13, %v2224_v26, 0.0 }
  0x7e   :  { %v1823_v28 = vadd.f32 %v1759_v34, %v1618_v10  ;;  %v795_v25 = vadd.f32 %v731_v56, %v590_v43  ;;  %vm863_vm14 = vcmp.eq.s32.totalorder %v2524_v45, %v2234_v32  ;;  %vm867_vm15 = vcmp.eq.s32.totalorder %v2528_v17, %v2234_v32 }
  0x7f   :  { %v799_v54 = vadd.f32 %v735_v47, %v594_v2  ;;  %v936_v63 = vsel %vm863_vm14, %v2244_v36, 0.0  ;;  %v940_v5 = vsel %vm867_vm15, %v2244_v36, 0.0  ;;  %vm1068_vm0 = vcmp.eq.s32.totalorder %v2524_v45, %v2254_v46 }
  0x80   :  { %v1859_v41 = vpack.c.bf16 %v1823_v28, %v1819_v15  ;;  %v1000_v10 = vadd.f32 %v936_v63, %v795_v25  ;;  %vm1072_vm1 = vcmp.eq.s32.totalorder %v2528_v17, %v2254_v46  ;;  %v1141_v47 = vsel %vm1068_vm0, %v2264_v35, 0.0 }
  0x81   :  { %v1004_v6 = vadd.f32 %v940_v5, %v799_v54  ;;  %v1145_v60 = vsel %vm1072_vm1, %v2264_v35, 0.0  ;;  %vm1273_vm2 = vcmp.eq.s32.totalorder %v2524_v45, %v2274_v49  ;;  %vm1277_vm3 = vcmp.eq.s32.totalorder %v2528_v17, %v2274_v49 }
  0x82   :  { %1868 = vmatpush.bf16.msra.mxu0 %v1859_v41  ;;  %vm1478_vm4 = vcmp.eq.s32.totalorder %v2524_v45, %v2294_v55  ;;  %v1205_v59 = vadd.f32 %v1141_v47, %v1000_v10  ;;  %v1346_v29 = vsel %vm1273_vm2, %v2284_v51, 0.0  ;;  %v1350_v34 = vsel %vm1277_vm3, %v2284_v51, 0.0 }
  0x83   :  { %v1209_v56 = vadd.f32 %v1145_v60, %v1004_v6  ;;  %vm1482_vm5 = vcmp.eq.s32.totalorder %v2528_v17, %v2294_v55  ;;  %v1551_v28 = vsel %vm1478_vm4, %v2304_v1, 0.0  ;;  %vm1683_vm6 = vcmp.eq.s32.totalorder %v2524_v45, %v2314_v9 }
  0x84   :  { %vm1687_vm7 = vcmp.eq.s32.totalorder %v2528_v17, %v2314_v9  ;;  %v1410_v16 = vadd.f32 %v1346_v29, %v1205_v59  ;;  %v1555_v2 = vsel %vm1482_vm5, %v2304_v1, 0.0  ;;  %v1756_v15 = vsel %vm1683_vm6, %v2324_v23, 0.0 }
  0x85   :  { %v1414_v43 = vadd.f32 %v1350_v34, %v1209_v56  ;;  %v1760_v25 = vsel %vm1687_vm7, %v2324_v23, 0.0  ;;  %vm249_vm8 = vcmp.eq.s32.totalorder %v2524_v45, %v2171_v61  ;;  %vm253_vm9 = vcmp.eq.s32.totalorder %v2528_v17, %v2171_v61 }
  0x86   :  { %vm454_vm10 = vcmp.eq.s32.totalorder %v2524_v45, %v2196_v8  ;;  %v1615_v54 = vadd.f32 %v1551_v28, %v1410_v16  ;;  %v322_v63 = vsel %vm249_vm8, %v2185_v3, 0.0  ;;  %v326_v5 = vsel %vm253_vm9, %v2185_v3, 0.0 }
  0x87   :  { %v1619_v41 = vadd.f32 %v1555_v2, %v1414_v43  ;;  %vm458_vm11 = vcmp.eq.s32.totalorder %v2528_v17, %v2196_v8  ;;  %v527_v10 = vsel %vm454_vm10, %v2207_v12, 0.0  ;;  %vm659_vm12 = vcmp.eq.s32.totalorder %v2524_v45, %v2216_v20 }
  0x88   :  { %vm663_vm13 = vcmp.eq.s32.totalorder %v2528_v17, %v2216_v20  ;;  %v1820_v6 = vadd.f32 %v1756_v15, %v1615_v54  ;;  %v531_v60 = vsel %vm458_vm11, %v2207_v12, 0.0  ;;  %v591_v59 = vadd.f32 %v527_v10, %v322_v63 }
  0x89   :  { %v1824_v47 = vadd.f32 %v1760_v25, %v1619_v41  ;;  %v595_v56 = vadd.f32 %v531_v60, %v326_v5  ;;  %v732_v29 = vsel %vm659_vm12, %v2227_v27, 0.0  ;;  %v736_v34 = vsel %vm663_vm13, %v2227_v27, 0.0 }
  0x8a   :  { %vm864_vm14 = vcmp.eq.s32.totalorder %v2524_v45, %v2236_v33  ;;  %v796_v16 = vadd.f32 %v732_v29, %v591_v59  ;;  %vm868_vm15 = vcmp.eq.s32.totalorder %v2528_v17, %v2236_v33  ;;  %vm1069_vm0 = vcmp.eq.s32.totalorder %v2524_v45, %v2256_v40 }
  0x8b   :  { %v1860_v28 = vpack.c.bf16 %v1824_v47, %v1820_v6  ;;  %v937_v43 = vsel %vm864_vm14, %v2247_v39, 0.0  ;;  %v800_v2 = vadd.f32 %v736_v34, %v595_v56  ;;  %v941_v15 = vsel %vm868_vm15, %v2247_v39, 0.0 }
  0x8c   :  { %vm1073_vm1 = vcmp.eq.s32.totalorder %v2528_v17, %v2256_v40  ;;  %v1001_v25 = vadd.f32 %v937_v43, %v796_v16  ;;  %v1142_v54 = vsel %vm1069_vm0, %v2267_v38, 0.0  ;;  %vm1274_vm2 = vcmp.eq.s32.totalorder %v2524_v45, %v2276_v50 }
  0x8d   :  { %1881 = vmatpush.bf16.msra.mxu1 %v1860_v28  ;;  %v1146_v41 = vsel %vm1073_vm1, %v2267_v38, 0.0  ;;  %v1005_v63 = vadd.f32 %v941_v15, %v800_v2  ;;  %vm1278_vm3 = vcmp.eq.s32.totalorder %v2528_v17, %v2276_v50  ;;  %v1347_v5 = vsel %vm1274_vm2, %v2287_v52, 0.0 }
  0x8e   :  { %vm1479_vm4 = vcmp.eq.s32.totalorder %v2524_v45, %v2296_v57  ;;  %v1206_v10 = vadd.f32 %v1142_v54, %v1001_v25  ;;  %v1351_v6 = vsel %vm1278_vm3, %v2287_v52, 0.0  ;;  %vm1483_vm5 = vcmp.eq.s32.totalorder %v2528_v17, %v2296_v57 }
  0x8f   :  { %v1552_v47 = vsel %vm1479_vm4, %v2307_v4, 0.0  ;;  %v1210_v60 = vadd.f32 %v1146_v41, %v1005_v63  ;;  %v1556_v59 = vsel %vm1483_vm5, %v2307_v4, 0.0  ;;  %vm1684_vm6 = vcmp.eq.s32.totalorder %v2524_v45, %v2316_v14 }
  0x90   :  { %vm1688_vm7 = vcmp.eq.s32.totalorder %v2528_v17, %v2316_v14  ;;  %v1411_v56 = vadd.f32 %v1347_v5, %v1206_v10  ;;  %v1757_v29 = vsel %vm1684_vm6, %v2327_v53, 0.0  ;;  %vm250_vm8 = vcmp.eq.s32.totalorder %v2524_v45, %v2175_v0 }
  0x91   :  { %v1761_v34 = vsel %vm1688_vm7, %v2327_v53, 0.0  ;;  %v1415_v28 = vadd.f32 %v1351_v6, %v1210_v60  ;;  %vm254_vm9 = vcmp.eq.s32.totalorder %v2528_v17, %v2175_v0  ;;  %v323_v16 = vsel %vm250_vm8, %v2190_v7, 0.0 }
  0x92   :  { %vm455_vm10 = vcmp.eq.s32.totalorder %v2524_v45, %v2198_v11  ;;  %v1616_v43 = vadd.f32 %v1552_v47, %v1411_v56  ;;  %v327_v2 = vsel %vm254_vm9, %v2190_v7, 0.0  ;;  %vm459_vm11 = vcmp.eq.s32.totalorder %v2528_v17, %v2198_v11 }
  0x93   :  { %v528_v15 = vsel %vm455_vm10, %v2210_v13, 0.0  ;;  %v1620_v25 = vadd.f32 %v1556_v59, %v1415_v28  ;;  %v532_v54 = vsel %vm459_vm11, %v2210_v13, 0.0  ;;  %vm660_vm12 = vcmp.eq.s32.totalorder %v2524_v45, %v2218_v21 }
  0x94   :  { %v592_v41 = vadd.f32 %v528_v15, %v323_v16  ;;  %v1821_v63 = vadd.f32 %v1757_v29, %v1616_v43  ;;  %v596_v5 = vadd.f32 %v532_v54, %v327_v2  ;;  %vm664_vm13 = vcmp.eq.s32.totalorder %v2528_v17, %v2218_v21  ;;  %v4145_v43 = vld [vmem:[#allocation29_spill] sm:$0xff] }
  0x95   :  { %v733_v10 = vsel %vm660_vm12, %v2230_v44, 0.0  ;;  %v1825_v6 = vadd.f32 %v1761_v34, %v1620_v25  ;;  %v737_v47 = vsel %vm664_vm13, %v2230_v44, 0.0  ;;  %vm865_vm14 = vcmp.eq.s32.totalorder %v2524_v45, %v2238_v30  ;;  %v4146_v25 = vld [vmem:[#allocation31_spill] sm:$0xff] }
  0x96   :  { %v797_v60 = vadd.f32 %v733_v10, %v592_v41  ;;  %v801_v59 = vadd.f32 %v737_v47, %v596_v5  ;;  %vm869_vm15 = vcmp.eq.s32.totalorder %v2528_v17, %v2238_v30  ;;  %v938_v56 = vsel %vm865_vm14, %v2250_v48, 0.0  ;;  %v4147_v41 = vld [vmem:[#allocation33_spill] sm:$0xff]  ;;  %v4148_v5 = vld [vmem:[#allocation35_spill] sm:$0xff] }
  0x97   :  { %vm1070_vm0 = vcmp.eq.s32.totalorder %v2524_v45, %v4124_v37  ;;  %v1861_v29 = vpack.c.bf16 %v1825_v6, %v1821_v63  ;;  %v942_v28 = vsel %vm869_vm15, %v2250_v48, 0.0  ;;  %vm1074_vm1 = vcmp.eq.s32.totalorder %v2528_v17, %v4124_v37 }
  0x98   :  { %v1002_v16 = vadd.f32 %v938_v56, %v797_v60  ;;  %v1006_v34 = vadd.f32 %v942_v28, %v801_v59  ;;  %v1143_v2 = vsel %vm1070_vm0, %v4145_v43, 0.0  ;;  %v1147_v15 = vsel %vm1074_vm1, %v4145_v43, 0.0  ;;  %v4149_v56 = vld [vmem:[#allocation39_spill] sm:$0xff]  ;;  %v4150_v28 = vld [vmem:[#allocation41_spill] sm:$0xff] }
  0x99   :  { %vm1275_vm2 = vcmp.eq.s32.totalorder %v2524_v45, %v4146_v25  ;;  %1894 = vmatpush.bf16.msra.mxu2 %v1861_v29  ;;  %vm1279_vm3 = vcmp.eq.s32.totalorder %v2528_v17, %v4146_v25  ;;  %vm1480_vm4 = vcmp.eq.s32.totalorder %v2524_v45, %v4148_v5  ;;  %vm1484_vm5 = vcmp.eq.s32.totalorder %v2528_v17, %v4148_v5 }
  0x9a   :  { %v1207_v54 = vadd.f32 %v1143_v2, %v1002_v16  ;;  %v1348_v63 = vsel %vm1275_vm2, %v4147_v41, 0.0  ;;  %v1211_v10 = vadd.f32 %v1147_v15, %v1006_v34  ;;  %v1352_v6 = vsel %vm1279_vm3, %v4147_v41, 0.0  ;;  %v4151_v34 = vld [vmem:[#allocation14_spill] sm:$0xff] }
  0x9b   :  { %v1553_v47 = vsel %vm1480_vm4, %v4129_v58, 0.0  ;;  %v1557_v59 = vsel %vm1484_vm5, %v4129_v58, 0.0  ;;  %vm1685_vm6 = vcmp.eq.s32.totalorder %v2524_v45, %v4149_v56  ;;  %vm1689_vm7 = vcmp.eq.s32.totalorder %v2528_v17, %v4149_v56  ;;  %v4153_v45 = vld [vmem:[#allocation17_spill] sm:$0xff] }
  0x9c   :  { %v1412_v60 = vadd.f32 %v1348_v63, %v1207_v54  ;;  %v1416_v29 = vadd.f32 %v1352_v6, %v1211_v10  ;;  %v1758_v16 = vsel %vm1685_vm6, %v4150_v28, 0.0  ;;  %v2722_v2 = vadd.s32 80, %v4151_v34  ;;  %v4152_v63 = vld [vmem:[#allocation15_spill] sm:$0xff] }
  0x9d   :  { %v1762_v5 = vsel %vm1689_vm7, %v4150_v28, 0.0  ;;  %v2726_v41 = vadd.s32 88, %v4151_v34 }
  0x9e   :  { %v1617_v15 = vadd.f32 %v1553_v47, %v1412_v60  ;;  %v1621_v54 = vadd.f32 %v1557_v59, %v1416_v29  ;;  %vm239_vm8 = vcmp.eq.s32.totalorder %v2722_v2, %v4152_v63  ;;  %vm444_vm9 = vcmp.eq.s32.totalorder %v2722_v2, %v4134_v24  ;;  %v4154_v60 = vld [vmem:[#allocation21_spill] sm:$0xff] }
  0x9f   :  { %vm649_vm10 = vcmp.eq.s32.totalorder %v2722_v2, %v2212_v42  ;;  %vm243_vm11 = vcmp.eq.s32.totalorder %v2726_v41, %v4152_v63  ;;  %v312_v10 = vsel %vm239_vm8, %v4153_v45, 0.0  ;;  %vm448_vm12 = vcmp.eq.s32.totalorder %v2726_v41, %v4134_v24 }
  0xa0   :  { %v1822_v17 = vadd.f32 %v1758_v16, %v1617_v15  ;;  %v1826_v6 = vadd.f32 %v1762_v5, %v1621_v54  ;;  %v316_v47 = vsel %vm243_vm11, %v4153_v45, 0.0  ;;  %v517_v59 = vsel %vm444_vm9, %v4154_v60, 0.0 }
  0xa1   :  { %v521_v29 = vsel %vm448_vm12, %v4154_v60, 0.0  ;;  %v581_v34 = vadd.f32 %v517_v59, %v312_v10  ;;  %vm653_vm13 = vcmp.eq.s32.totalorder %v2726_v41, %v2212_v42  ;;  %v722_v16 = vsel %vm649_vm10, %v2221_v22, 0.0 }
  0xa2   :  { %v585_v28 = vadd.f32 %v521_v29, %v316_v47  ;;  %v1862_v15 = vpack.c.bf16 %v1826_v6, %v1822_v17  ;;  %v726_v63 = vsel %vm653_vm13, %v2221_v22, 0.0  ;;  %vm854_vm14 = vcmp.eq.s32.totalorder %v2722_v2, %v2232_v31  ;;  %v4155_v47 = vld [vmem:[#allocation26_spill] sm:$0xff]  ;;  %v4158_v29 = vld [vmem:[#allocation32_spill] sm:$0xff] }
  0xa3   :  { %vm858_vm15 = vcmp.eq.s32.totalorder %v2726_v41, %v2232_v31  ;;  %v786_v5 = vadd.f32 %v722_v16, %v581_v34  ;;  %v927_v60 = vsel %vm854_vm14, %v4137_v62, 0.0  ;;  %vm1059_vm0 = vcmp.eq.s32.totalorder %v2722_v2, %v4155_v47  ;;  %v4156_v17 = vld [vmem:[#allocation30_spill] sm:$0xff]  ;;  %v4160_v22 = vld [vmem:[#allocation36_spill] sm:$0xff] }
  0xa4   :  { %v790_v54 = vadd.f32 %v726_v63, %v585_v28  ;;  %v931_v10 = vsel %vm858_vm15, %v4137_v62, 0.0  ;;  %1907 = vmatpush.bf16.msra.mxu3 %v1862_v15  ;;  %vm1063_vm1 = vcmp.eq.s32.totalorder %v2726_v41, %v4155_v47  ;;  %vm1264_vm2 = vcmp.eq.s32.totalorder %v2722_v2, %v4156_v17  ;;  %v4157_v28 = vld [vmem:[#allocation28_spill] sm:$0xff]  ;;  %v4159_v62 = vld [vmem:[#allocation34_spill] sm:$0xff] }
  0xa5   :  { %vm1268_vm3 = vcmp.eq.s32.totalorder %v2726_v41, %v4156_v17  ;;  %v991_v6 = vadd.f32 %v927_v60, %v786_v5  ;;  %v1132_v63 = vsel %vm1059_vm0, %v4157_v28, 0.0  ;;  %v1136_v59 = vsel %vm1063_vm1, %v4157_v28, 0.0  ;;  %v4161_v5 = vld [vmem:[#allocation38_spill] sm:$0xff]  ;;  %v4165_v28 = vld [vmem:[#allocation20_spill] sm:$0xff] }
  0xa6   :  { %v995_v34 = vadd.f32 %v931_v10, %v790_v54  ;;  %v1337_v16 = vsel %vm1264_vm2, %v4158_v29, 0.0  ;;  %v1341_v15 = vsel %vm1268_vm3, %v4158_v29, 0.0  ;;  %vm1469_vm4 = vcmp.eq.s32.totalorder %v2722_v2, %v4159_v62  ;;  %v4162_v54 = vld [vmem:[#allocation16_spill] sm:$0xff] }
  0xa7   :  { %vm1473_vm5 = vcmp.eq.s32.totalorder %v2726_v41, %v4159_v62  ;;  %v1196_v47 = vadd.f32 %v1132_v63, %v991_v6  ;;  %v1542_v17 = vsel %vm1469_vm4, %v4160_v22, 0.0  ;;  %vm1674_vm6 = vcmp.eq.s32.totalorder %v2722_v2, %v4161_v5  ;;  %v4163_v6 = vld [vmem:[#allocation40_spill] sm:$0xff] }
  0xa8   :  { %v1200_v31 = vadd.f32 %v1136_v59, %v995_v34  ;;  %v1546_v60 = vsel %vm1473_vm5, %v4160_v22, 0.0  ;;  %vm1678_vm7 = vcmp.eq.s32.totalorder %v2726_v41, %v4161_v5  ;;  %vm240_vm8 = vcmp.eq.s32.totalorder %v2722_v2, %v4162_v54  ;;  %v4164_v59 = vld [vmem:[#allocation18_spill] sm:$0xff] }
  0xa9   :  { %vm244_vm9 = vcmp.eq.s32.totalorder %v2726_v41, %v4162_v54  ;;  %v1401_v10 = vadd.f32 %v1337_v16, %v1196_v47  ;;  %v1747_v34 = vsel %vm1674_vm6, %v4163_v6, 0.0  ;;  %v1751_v63 = vsel %vm1678_vm7, %v4163_v6, 0.0 }
  0xaa   :  { %v1405_v62 = vadd.f32 %v1341_v15, %v1200_v31  ;;  %v313_v22 = vsel %vm240_vm8, %v4164_v59, 0.0  ;;  %v317_v29 = vsel %vm244_vm9, %v4164_v59, 0.0  ;;  %vm445_vm10 = vcmp.eq.s32.totalorder %v2722_v2, %v4165_v28 }
  0xab   :  { %vm449_vm11 = vcmp.eq.s32.totalorder %v2726_v41, %v4165_v28  ;;  %v1606_v5 = vadd.f32 %v1542_v17, %v1401_v10  ;;  %v518_v54 = vsel %vm445_vm10, %v2204_v18, 0.0  ;;  %vm650_vm12 = vcmp.eq.s32.totalorder %v2722_v2, %v2214_v19 }
  0xac   :  { %v1610_v45 = vadd.f32 %v1546_v60, %v1405_v62  ;;  %v522_v31 = vsel %vm449_vm11, %v2204_v18, 0.0  ;;  %v582_v47 = vadd.f32 %v518_v54, %v313_v22  ;;  %vm654_vm13 = vcmp.eq.s32.totalorder %v2726_v41, %v2214_v19 }
  0xad   :  { %v586_v16 = vadd.f32 %v522_v31, %v317_v29  ;;  %v1811_v15 = vadd.f32 %v1747_v34, %v1606_v5  ;;  %v723_v6 = vsel %vm650_vm12, %v2224_v26, 0.0  ;;  %v727_v28 = vsel %vm654_vm13, %v2224_v26, 0.0 }
  0xae   :  { %v1815_v59 = vadd.f32 %v1751_v63, %v1610_v45  ;;  %v787_v17 = vadd.f32 %v723_v6, %v582_v47  ;;  %vm855_vm14 = vcmp.eq.s32.totalorder %v2722_v2, %v2234_v32  ;;  %vm859_vm15 = vcmp.eq.s32.totalorder %v2726_v41, %v2234_v32 }
  0xaf   :  { %v791_v62 = vadd.f32 %v727_v28, %v586_v16  ;;  %v928_v29 = vsel %vm855_vm14, %v2244_v36, 0.0  ;;  %v932_v60 = vsel %vm859_vm15, %v2244_v36, 0.0  ;;  %vm1060_vm0 = vcmp.eq.s32.totalorder %v2722_v2, %v2254_v46 }
  0xb0   :  { %v1855_v22 = vpack.c.bf16 %v1815_v59, %v1811_v15  ;;  %v992_v45 = vadd.f32 %v928_v29, %v787_v17  ;;  %vm1064_vm1 = vcmp.eq.s32.totalorder %v2726_v41, %v2254_v46  ;;  %v1133_v28 = vsel %vm1060_vm0, %v2264_v35, 0.0 }
  0xb1   :  { %v996_v5 = vadd.f32 %v932_v60, %v791_v62  ;;  %v1137_v54 = vsel %vm1064_vm1, %v2264_v35, 0.0  ;;  %vm1265_vm2 = vcmp.eq.s32.totalorder %v2722_v2, %v2274_v49  ;;  %vm1269_vm3 = vcmp.eq.s32.totalorder %v2726_v41, %v2274_v49 }
  0xb2   :  { %1869 = vmatpush.bf16.msra.mxu0 %v1855_v22  ;;  %vm1470_vm4 = vcmp.eq.s32.totalorder %v2722_v2, %v2294_v55  ;;  %v1197_v10 = vadd.f32 %v1133_v28, %v992_v45  ;;  %v1338_v34 = vsel %vm1265_vm2, %v2284_v51, 0.0  ;;  %v1342_v63 = vsel %vm1269_vm3, %v2284_v51, 0.0 }
  0xb3   :  { %v1201_v6 = vadd.f32 %v1137_v54, %v996_v5  ;;  %vm1474_vm5 = vcmp.eq.s32.totalorder %v2726_v41, %v2294_v55  ;;  %v1543_v59 = vsel %vm1470_vm4, %v2304_v1, 0.0  ;;  %vm1675_vm6 = vcmp.eq.s32.totalorder %v2722_v2, %v2314_v9 }
  0xb4   :  { %vm1679_vm7 = vcmp.eq.s32.totalorder %v2726_v41, %v2314_v9  ;;  %v1402_v31 = vadd.f32 %v1338_v34, %v1197_v10  ;;  %v1547_v16 = vsel %vm1474_vm5, %v2304_v1, 0.0  ;;  %v1748_v15 = vsel %vm1675_vm6, %v2324_v23, 0.0 }
  0xb5   :  { %v1406_v47 = vadd.f32 %v1342_v63, %v1201_v6  ;;  %v1752_v17 = vsel %vm1679_vm7, %v2324_v23, 0.0  ;;  %vm241_vm8 = vcmp.eq.s32.totalorder %v2722_v2, %v2171_v61  ;;  %vm245_vm9 = vcmp.eq.s32.totalorder %v2726_v41, %v2171_v61 }
  0xb6   :  { %vm446_vm10 = vcmp.eq.s32.totalorder %v2722_v2, %v2196_v8  ;;  %v1607_v62 = vadd.f32 %v1543_v59, %v1402_v31  ;;  %v314_v29 = vsel %vm241_vm8, %v2185_v3, 0.0  ;;  %v318_v60 = vsel %vm245_vm9, %v2185_v3, 0.0 }
  0xb7   :  { %v1611_v22 = vadd.f32 %v1547_v16, %v1406_v47  ;;  %vm450_vm11 = vcmp.eq.s32.totalorder %v2726_v41, %v2196_v8  ;;  %v519_v45 = vsel %vm446_vm10, %v2207_v12, 0.0  ;;  %vm651_vm12 = vcmp.eq.s32.totalorder %v2722_v2, %v2216_v20 }
  0xb8   :  { %vm655_vm13 = vcmp.eq.s32.totalorder %v2726_v41, %v2216_v20  ;;  %v1812_v5 = vadd.f32 %v1748_v15, %v1607_v62  ;;  %v523_v54 = vsel %vm450_vm11, %v2207_v12, 0.0  ;;  %v583_v10 = vadd.f32 %v519_v45, %v314_v29 }
  0xb9   :  { %v1816_v28 = vadd.f32 %v1752_v17, %v1611_v22  ;;  %v587_v6 = vadd.f32 %v523_v54, %v318_v60  ;;  %v724_v34 = vsel %vm651_vm12, %v2227_v27, 0.0  ;;  %v728_v63 = vsel %vm655_vm13, %v2227_v27, 0.0 }
  0xba   :  { %vm856_vm14 = vcmp.eq.s32.totalorder %v2722_v2, %v2236_v33  ;;  %v788_v31 = vadd.f32 %v724_v34, %v583_v10  ;;  %vm860_vm15 = vcmp.eq.s32.totalorder %v2726_v41, %v2236_v33  ;;  %vm1061_vm0 = vcmp.eq.s32.totalorder %v2722_v2, %v2256_v40 }
  0xbb   :  { %v1856_v59 = vpack.c.bf16 %v1816_v28, %v1812_v5  ;;  %v929_v47 = vsel %vm856_vm14, %v2247_v39, 0.0  ;;  %v792_v16 = vadd.f32 %v728_v63, %v587_v6  ;;  %v933_v15 = vsel %vm860_vm15, %v2247_v39, 0.0 }
  0xbc   :  { %vm1065_vm1 = vcmp.eq.s32.totalorder %v2726_v41, %v2256_v40  ;;  %v993_v17 = vadd.f32 %v929_v47, %v788_v31  ;;  %v1134_v62 = vsel %vm1061_vm0, %v2267_v38, 0.0  ;;  %vm1266_vm2 = vcmp.eq.s32.totalorder %v2722_v2, %v2276_v50 }
  0xbd   :  { %1882 = vmatpush.bf16.msra.mxu1 %v1856_v59  ;;  %v1138_v22 = vsel %vm1065_vm1, %v2267_v38, 0.0  ;;  %v997_v29 = vadd.f32 %v933_v15, %v792_v16  ;;  %vm1270_vm3 = vcmp.eq.s32.totalorder %v2726_v41, %v2276_v50  ;;  %v1339_v60 = vsel %vm1266_vm2, %v2287_v52, 0.0 }
  0xbe   :  { %vm1471_vm4 = vcmp.eq.s32.totalorder %v2722_v2, %v2296_v57  ;;  %v1198_v45 = vadd.f32 %v1134_v62, %v993_v17  ;;  %v1343_v5 = vsel %vm1270_vm3, %v2287_v52, 0.0  ;;  %vm1475_vm5 = vcmp.eq.s32.totalorder %v2726_v41, %v2296_v57 }
  0xbf   :  { %v1544_v28 = vsel %vm1471_vm4, %v2307_v4, 0.0  ;;  %v1202_v54 = vadd.f32 %v1138_v22, %v997_v29  ;;  %v1548_v10 = vsel %vm1475_vm5, %v2307_v4, 0.0  ;;  %vm1676_vm6 = vcmp.eq.s32.totalorder %v2722_v2, %v2316_v14 }
  0xc0   :  { %vm1680_vm7 = vcmp.eq.s32.totalorder %v2726_v41, %v2316_v14  ;;  %v1403_v6 = vadd.f32 %v1339_v60, %v1198_v45  ;;  %v1749_v34 = vsel %vm1676_vm6, %v2327_v53, 0.0  ;;  %vm242_vm8 = vcmp.eq.s32.totalorder %v2722_v2, %v2175_v0 }
  0xc1   :  { %v1753_v63 = vsel %vm1680_vm7, %v2327_v53, 0.0  ;;  %v1407_v59 = vadd.f32 %v1343_v5, %v1202_v54  ;;  %vm246_vm9 = vcmp.eq.s32.totalorder %v2726_v41, %v2175_v0  ;;  %v315_v31 = vsel %vm242_vm8, %v2190_v7, 0.0 }
  0xc2   :  { %vm447_vm10 = vcmp.eq.s32.totalorder %v2722_v2, %v2198_v11  ;;  %v1608_v47 = vadd.f32 %v1544_v28, %v1403_v6  ;;  %v319_v16 = vsel %vm246_vm9, %v2190_v7, 0.0  ;;  %vm451_vm11 = vcmp.eq.s32.totalorder %v2726_v41, %v2198_v11 }
  0xc3   :  { %v520_v15 = vsel %vm447_vm10, %v2210_v13, 0.0  ;;  %v1612_v17 = vadd.f32 %v1548_v10, %v1407_v59  ;;  %v524_v62 = vsel %vm451_vm11, %v2210_v13, 0.0  ;;  %vm652_vm12 = vcmp.eq.s32.totalorder %v2722_v2, %v2218_v21 }
  0xc4   :  { %v584_v22 = vadd.f32 %v520_v15, %v315_v31  ;;  %v1813_v29 = vadd.f32 %v1749_v34, %v1608_v47  ;;  %v588_v60 = vadd.f32 %v524_v62, %v319_v16  ;;  %vm656_vm13 = vcmp.eq.s32.totalorder %v2726_v41, %v2218_v21 }
  0xc5   :  { %v725_v45 = vsel %vm652_vm12, %v2230_v44, 0.0  ;;  %v1817_v5 = vadd.f32 %v1753_v63, %v1612_v17  ;;  %v729_v28 = vsel %vm656_vm13, %v2230_v44, 0.0  ;;  %vm857_vm14 = vcmp.eq.s32.totalorder %v2722_v2, %v2238_v30  ;;  %v4166_v17 = vld [vmem:[#allocation33_spill] sm:$0xff] }
  0xc6   :  { %v789_v54 = vadd.f32 %v725_v45, %v584_v22  ;;  %v793_v10 = vadd.f32 %v729_v28, %v588_v60  ;;  %vm861_vm15 = vcmp.eq.s32.totalorder %v2726_v41, %v2238_v30  ;;  %v930_v6 = vsel %vm857_vm14, %v2250_v48, 0.0  ;;  %v4167_v22 = vld [vmem:[#allocation35_spill] sm:$0xff] }
  0xc7   :  { %vm1062_vm0 = vcmp.eq.s32.totalorder %v2722_v2, %v4124_v37  ;;  %v1857_v34 = vpack.c.bf16 %v1817_v5, %v1813_v29  ;;  %v934_v59 = vsel %vm861_vm15, %v2250_v48, 0.0  ;;  %vm1066_vm1 = vcmp.eq.s32.totalorder %v2726_v41, %v4124_v37 }
  0xc8   :  { %v994_v31 = vadd.f32 %v930_v6, %v789_v54  ;;  %v998_v63 = vadd.f32 %v934_v59, %v793_v10  ;;  %v1135_v47 = vsel %vm1062_vm0, %v4145_v43, 0.0  ;;  %v1139_v16 = vsel %vm1066_vm1, %v4145_v43, 0.0  ;;  %v4168_v10 = vld [vmem:[#allocation41_spill] sm:$0xff] }
  0xc9   :  { %vm1267_vm2 = vcmp.eq.s32.totalorder %v2722_v2, %v4146_v25  ;;  %1895 = vmatpush.bf16.msra.mxu2 %v1857_v34  ;;  %vm1271_vm3 = vcmp.eq.s32.totalorder %v2726_v41, %v4146_v25  ;;  %vm1472_vm4 = vcmp.eq.s32.totalorder %v2722_v2, %v4167_v22  ;;  %vm1476_vm5 = vcmp.eq.s32.totalorder %v2726_v41, %v4167_v22  ;;  %v4169_v34 = vld [vmem:[#allocation14_spill] sm:$0xff] }
  0xca   :  { %v1199_v15 = vadd.f32 %v1135_v47, %v994_v31  ;;  %v1340_v62 = vsel %vm1267_vm2, %v4166_v17, 0.0  ;;  %v1203_v29 = vadd.f32 %v1139_v16, %v998_v63  ;;  %v1344_v60 = vsel %vm1271_vm3, %v4166_v17, 0.0 }
  0xcb   :  { %v1545_v45 = vsel %vm1472_vm4, %v4129_v58, 0.0  ;;  %v1549_v28 = vsel %vm1476_vm5, %v4129_v58, 0.0  ;;  %vm1677_vm6 = vcmp.eq.s32.totalorder %v2722_v2, %v4149_v56  ;;  %vm1681_vm7 = vcmp.eq.s32.totalorder %v2726_v41, %v4149_v56  ;;  %v4171_v2 = vld [vmem:[#allocation17_spill] sm:$0xff]  ;;  %v4174_v56 = vld [vmem:[#allocation24_spill] sm:$0xff] }
  0xcc   :  { %v1404_v5 = vadd.f32 %v1340_v62, %v1199_v15  ;;  %v1408_v54 = vadd.f32 %v1344_v60, %v1203_v29  ;;  %v1750_v6 = vsel %vm1677_vm6, %v4168_v10, 0.0  ;;  %v2920_v59 = vadd.s32 64, %v4169_v34  ;;  %v4170_v15 = vld [vmem:[#allocation15_spill] sm:$0xff] }
  0xcd   :  { %v1754_v63 = vsel %vm1681_vm7, %v4168_v10, 0.0  ;;  %v2924_v47 = vadd.s32 72, %v4169_v34 }
  0xce   :  { %v1609_v31 = vadd.f32 %v1545_v45, %v1404_v5  ;;  %v1613_v16 = vadd.f32 %v1549_v28, %v1408_v54  ;;  %vm231_vm8 = vcmp.eq.s32.totalorder %v2920_v59, %v4170_v15  ;;  %vm436_vm9 = vcmp.eq.s32.totalorder %v2920_v59, %v4134_v24  ;;  %v4172_v45 = vld [vmem:[#allocation21_spill] sm:$0xff] }
  0xcf   :  { %vm641_vm10 = vcmp.eq.s32.totalorder %v2920_v59, %v2212_v42  ;;  %vm235_vm11 = vcmp.eq.s32.totalorder %v2924_v47, %v4170_v15  ;;  %v304_v62 = vsel %vm231_vm8, %v4171_v2, 0.0  ;;  %vm440_vm12 = vcmp.eq.s32.totalorder %v2924_v47, %v4134_v24 }
  0xd0   :  { %v1814_v41 = vadd.f32 %v1750_v6, %v1609_v31  ;;  %v1818_v29 = vadd.f32 %v1754_v63, %v1613_v16  ;;  %v308_v60 = vsel %vm235_vm11, %v4171_v2, 0.0  ;;  %v509_v5 = vsel %vm436_vm9, %v4172_v45, 0.0  ;;  %v4173_v6 = vld [vmem:[#allocation23_spill] sm:$0xff]  ;;  %v4175_v2 = vld [vmem:[#allocation25_spill] sm:$0xff] }
  0xd1   :  { %v513_v28 = vsel %vm440_vm12, %v4172_v45, 0.0  ;;  %v573_v54 = vadd.f32 %v509_v5, %v304_v62  ;;  %vm645_vm13 = vcmp.eq.s32.totalorder %v2924_v47, %v2212_v42  ;;  %v714_v31 = vsel %vm641_vm10, %v4173_v6, 0.0 }
  0xd2   :  { %v577_v34 = vadd.f32 %v513_v28, %v308_v60  ;;  %v1858_v15 = vpack.c.bf16 %v1818_v29, %v1814_v41  ;;  %v718_v10 = vsel %vm645_vm13, %v4173_v6, 0.0  ;;  %vm846_vm14 = vcmp.eq.s32.totalorder %v2920_v59, %v4174_v56  ;;  %v4176_v60 = vld [vmem:[#allocation26_spill] sm:$0xff]  ;;  %v4181_v6 = vld [vmem:[#allocation36_spill] sm:$0xff] }
  0xd3   :  { %vm850_vm15 = vcmp.eq.s32.totalorder %v2924_v47, %v4174_v56  ;;  %v778_v63 = vadd.f32 %v714_v31, %v573_v54  ;;  %v919_v45 = vsel %vm846_vm14, %v4175_v2, 0.0  ;;  %vm1051_vm0 = vcmp.eq.s32.totalorder %v2920_v59, %v4176_v60  ;;  %v4177_v41 = vld [vmem:[#allocation30_spill] sm:$0xff]  ;;  %v4179_v54 = vld [vmem:[#allocation32_spill] sm:$0xff] }
  0xd4   :  { %v782_v16 = vadd.f32 %v718_v10, %v577_v34  ;;  %v923_v62 = vsel %vm850_vm15, %v4175_v2, 0.0  ;;  %1908 = vmatpush.bf16.msra.mxu3 %v1858_v15  ;;  %vm1055_vm1 = vcmp.eq.s32.totalorder %v2924_v47, %v4176_v60  ;;  %vm1256_vm2 = vcmp.eq.s32.totalorder %v2920_v59, %v4177_v41  ;;  %v4178_v10 = vld [vmem:[#allocation28_spill] sm:$0xff]  ;;  %v4180_v2 = vld [vmem:[#allocation34_spill] sm:$0xff] }
  0xd5   :  { %vm1260_vm3 = vcmp.eq.s32.totalorder %v2924_v47, %v4177_v41  ;;  %v983_v29 = vadd.f32 %v919_v45, %v778_v63  ;;  %v1124_v34 = vsel %vm1051_vm0, %v4178_v10, 0.0  ;;  %v1128_v28 = vsel %vm1055_vm1, %v4178_v10, 0.0  ;;  %v4182_v63 = vld [vmem:[#allocation38_spill] sm:$0xff]  ;;  %v4186_v10 = vld [vmem:[#allocation20_spill] sm:$0xff] }
  0xd6   :  { %v987_v5 = vadd.f32 %v923_v62, %v782_v16  ;;  %v1329_v15 = vsel %vm1256_vm2, %v4179_v54, 0.0  ;;  %v1333_v31 = vsel %vm1260_vm3, %v4179_v54, 0.0  ;;  %vm1461_vm4 = vcmp.eq.s32.totalorder %v2920_v59, %v4180_v2  ;;  %v4183_v16 = vld [vmem:[#allocation16_spill] sm:$0xff] }
  0xd7   :  { %vm1465_vm5 = vcmp.eq.s32.totalorder %v2924_v47, %v4180_v2  ;;  %v1188_v60 = vadd.f32 %v1124_v34, %v983_v29  ;;  %v1534_v41 = vsel %vm1461_vm4, %v4181_v6, 0.0  ;;  %vm1666_vm6 = vcmp.eq.s32.totalorder %v2920_v59, %v4182_v63  ;;  %v4184_v29 = vld [vmem:[#allocation40_spill] sm:$0xff] }
  0xd8   :  { %v1192_v56 = vadd.f32 %v1128_v28, %v987_v5  ;;  %v1538_v45 = vsel %vm1465_vm5, %v4181_v6, 0.0  ;;  %vm1670_vm7 = vcmp.eq.s32.totalorder %v2924_v47, %v4182_v63  ;;  %vm232_vm8 = vcmp.eq.s32.totalorder %v2920_v59, %v4183_v16  ;;  %v4185_v28 = vld [vmem:[#allocation18_spill] sm:$0xff] }
  0xd9   :  { %vm236_vm9 = vcmp.eq.s32.totalorder %v2924_v47, %v4183_v16  ;;  %v1393_v62 = vadd.f32 %v1329_v15, %v1188_v60  ;;  %v1739_v5 = vsel %vm1666_vm6, %v4184_v29, 0.0  ;;  %v1743_v34 = vsel %vm1670_vm7, %v4184_v29, 0.0 }
  0xda   :  { %v1397_v2 = vadd.f32 %v1333_v31, %v1192_v56  ;;  %v305_v6 = vsel %vm232_vm8, %v4185_v28, 0.0  ;;  %v309_v54 = vsel %vm236_vm9, %v4185_v28, 0.0  ;;  %vm437_vm10 = vcmp.eq.s32.totalorder %v2920_v59, %v4186_v10 }
  0xdb   :  { %vm441_vm11 = vcmp.eq.s32.totalorder %v2924_v47, %v4186_v10  ;;  %v1598_v63 = vadd.f32 %v1534_v41, %v1393_v62  ;;  %v510_v16 = vsel %vm437_vm10, %v2204_v18, 0.0  ;;  %vm642_vm12 = vcmp.eq.s32.totalorder %v2920_v59, %v2214_v19 }
  0xdc   :  { %v1602_v42 = vadd.f32 %v1538_v45, %v1397_v2  ;;  %v514_v56 = vsel %vm441_vm11, %v2204_v18, 0.0  ;;  %v574_v60 = vadd.f32 %v510_v16, %v305_v6  ;;  %vm646_vm13 = vcmp.eq.s32.totalorder %v2924_v47, %v2214_v19 }
  0xdd   :  { %v578_v15 = vadd.f32 %v514_v56, %v309_v54  ;;  %v1803_v31 = vadd.f32 %v1739_v5, %v1598_v63  ;;  %v715_v29 = vsel %vm642_vm12, %v2224_v26, 0.0  ;;  %v719_v10 = vsel %vm646_vm13, %v2224_v26, 0.0 }
  0xde   :  { %v1807_v28 = vadd.f32 %v1743_v34, %v1602_v42  ;;  %v779_v41 = vadd.f32 %v715_v29, %v574_v60  ;;  %vm847_vm14 = vcmp.eq.s32.totalorder %v2920_v59, %v2234_v32  ;;  %vm851_vm15 = vcmp.eq.s32.totalorder %v2924_v47, %v2234_v32 }
  0xdf   :  { %v783_v2 = vadd.f32 %v719_v10, %v578_v15  ;;  %v920_v54 = vsel %vm847_vm14, %v2244_v36, 0.0  ;;  %v924_v45 = vsel %vm851_vm15, %v2244_v36, 0.0  ;;  %vm1052_vm0 = vcmp.eq.s32.totalorder %v2920_v59, %v2254_v46 }
  0xe0   :  { %v1851_v6 = vpack.c.bf16 %v1807_v28, %v1803_v31  ;;  %v984_v42 = vadd.f32 %v920_v54, %v779_v41  ;;  %vm1056_vm1 = vcmp.eq.s32.totalorder %v2924_v47, %v2254_v46  ;;  %v1125_v10 = vsel %vm1052_vm0, %v2264_v35, 0.0 }
  0xe1   :  { %v988_v63 = vadd.f32 %v924_v45, %v783_v2  ;;  %v1129_v16 = vsel %vm1056_vm1, %v2264_v35, 0.0  ;;  %vm1257_vm2 = vcmp.eq.s32.totalorder %v2920_v59, %v2274_v49  ;;  %vm1261_vm3 = vcmp.eq.s32.totalorder %v2924_v47, %v2274_v49 }
  0xe2   :  { %1870 = vmatpush.bf16.msra.mxu0 %v1851_v6  ;;  %vm1462_vm4 = vcmp.eq.s32.totalorder %v2920_v59, %v2294_v55  ;;  %v1189_v62 = vadd.f32 %v1125_v10, %v984_v42  ;;  %v1330_v5 = vsel %vm1257_vm2, %v2284_v51, 0.0  ;;  %v1334_v34 = vsel %vm1261_vm3, %v2284_v51, 0.0 }
  0xe3   :  { %v1193_v29 = vadd.f32 %v1129_v16, %v988_v63  ;;  %vm1466_vm5 = vcmp.eq.s32.totalorder %v2924_v47, %v2294_v55  ;;  %v1535_v28 = vsel %vm1462_vm4, %v2304_v1, 0.0  ;;  %vm1667_vm6 = vcmp.eq.s32.totalorder %v2920_v59, %v2314_v9 }
  0xe4   :  { %vm1671_vm7 = vcmp.eq.s32.totalorder %v2924_v47, %v2314_v9  ;;  %v1394_v56 = vadd.f32 %v1330_v5, %v1189_v62  ;;  %v1539_v15 = vsel %vm1466_vm5, %v2304_v1, 0.0  ;;  %v1740_v31 = vsel %vm1667_vm6, %v2324_v23, 0.0 }
  0xe5   :  { %v1398_v60 = vadd.f32 %v1334_v34, %v1193_v29  ;;  %v1744_v41 = vsel %vm1671_vm7, %v2324_v23, 0.0  ;;  %vm233_vm8 = vcmp.eq.s32.totalorder %v2920_v59, %v2171_v61  ;;  %vm237_vm9 = vcmp.eq.s32.totalorder %v2924_v47, %v2171_v61 }
  0xe6   :  { %vm438_vm10 = vcmp.eq.s32.totalorder %v2920_v59, %v2196_v8  ;;  %v1599_v2 = vadd.f32 %v1535_v28, %v1394_v56  ;;  %v306_v54 = vsel %vm233_vm8, %v2185_v3, 0.0  ;;  %v310_v45 = vsel %vm237_vm9, %v2185_v3, 0.0 }
  0xe7   :  { %v1603_v6 = vadd.f32 %v1539_v15, %v1398_v60  ;;  %vm442_vm11 = vcmp.eq.s32.totalorder %v2924_v47, %v2196_v8  ;;  %v511_v42 = vsel %vm438_vm10, %v2207_v12, 0.0  ;;  %vm643_vm12 = vcmp.eq.s32.totalorder %v2920_v59, %v2216_v20 }
  0xe8   :  { %vm647_vm13 = vcmp.eq.s32.totalorder %v2924_v47, %v2216_v20  ;;  %v1804_v63 = vadd.f32 %v1740_v31, %v1599_v2  ;;  %v515_v16 = vsel %vm442_vm11, %v2207_v12, 0.0  ;;  %v575_v62 = vadd.f32 %v511_v42, %v306_v54 }
  0xe9   :  { %v1808_v10 = vadd.f32 %v1744_v41, %v1603_v6  ;;  %v579_v29 = vadd.f32 %v515_v16, %v310_v45  ;;  %v716_v5 = vsel %vm643_vm12, %v2227_v27, 0.0  ;;  %v720_v34 = vsel %vm647_vm13, %v2227_v27, 0.0 }
  0xea   :  { %vm848_vm14 = vcmp.eq.s32.totalorder %v2920_v59, %v2236_v33  ;;  %v780_v56 = vadd.f32 %v716_v5, %v575_v62  ;;  %vm852_vm15 = vcmp.eq.s32.totalorder %v2924_v47, %v2236_v33  ;;  %vm1053_vm0 = vcmp.eq.s32.totalorder %v2920_v59, %v2256_v40 }
  0xeb   :  { %v1852_v28 = vpack.c.bf16 %v1808_v10, %v1804_v63  ;;  %v921_v60 = vsel %vm848_vm14, %v2247_v39, 0.0  ;;  %v784_v15 = vadd.f32 %v720_v34, %v579_v29  ;;  %v925_v31 = vsel %vm852_vm15, %v2247_v39, 0.0 }
  0xec   :  { %vm1057_vm1 = vcmp.eq.s32.totalorder %v2924_v47, %v2256_v40  ;;  %v985_v41 = vadd.f32 %v921_v60, %v780_v56  ;;  %v1126_v2 = vsel %vm1053_vm0, %v2267_v38, 0.0  ;;  %vm1258_vm2 = vcmp.eq.s32.totalorder %v2920_v59, %v2276_v50 }
  0xed   :  { %1883 = vmatpush.bf16.msra.mxu1 %v1852_v28  ;;  %v1130_v6 = vsel %vm1057_vm1, %v2267_v38, 0.0  ;;  %v989_v54 = vadd.f32 %v925_v31, %v784_v15  ;;  %vm1262_vm3 = vcmp.eq.s32.totalorder %v2924_v47, %v2276_v50  ;;  %v1331_v45 = vsel %vm1258_vm2, %v2287_v52, 0.0 }
  0xee   :  { %vm1463_vm4 = vcmp.eq.s32.totalorder %v2920_v59, %v2296_v57  ;;  %v1190_v42 = vadd.f32 %v1126_v2, %v985_v41  ;;  %v1335_v63 = vsel %vm1262_vm3, %v2287_v52, 0.0  ;;  %vm1467_vm5 = vcmp.eq.s32.totalorder %v2924_v47, %v2296_v57 }
  0xef   :  { %v1536_v10 = vsel %vm1463_vm4, %v2307_v4, 0.0  ;;  %v1194_v16 = vadd.f32 %v1130_v6, %v989_v54  ;;  %v1540_v62 = vsel %vm1467_vm5, %v2307_v4, 0.0  ;;  %vm1668_vm6 = vcmp.eq.s32.totalorder %v2920_v59, %v2316_v14 }
  0xf0   :  { %vm1672_vm7 = vcmp.eq.s32.totalorder %v2924_v47, %v2316_v14  ;;  %v1395_v29 = vadd.f32 %v1331_v45, %v1190_v42  ;;  %v1741_v5 = vsel %vm1668_vm6, %v2327_v53, 0.0  ;;  %vm234_vm8 = vcmp.eq.s32.totalorder %v2920_v59, %v2175_v0 }
  0xf1   :  { %v1745_v34 = vsel %vm1672_vm7, %v2327_v53, 0.0  ;;  %v1399_v28 = vadd.f32 %v1335_v63, %v1194_v16  ;;  %vm238_vm9 = vcmp.eq.s32.totalorder %v2924_v47, %v2175_v0  ;;  %v307_v56 = vsel %vm234_vm8, %v2190_v7, 0.0 }
  0xf2   :  { %vm439_vm10 = vcmp.eq.s32.totalorder %v2920_v59, %v2198_v11  ;;  %v1600_v60 = vadd.f32 %v1536_v10, %v1395_v29  ;;  %v311_v15 = vsel %vm238_vm9, %v2190_v7, 0.0  ;;  %vm443_vm11 = vcmp.eq.s32.totalorder %v2924_v47, %v2198_v11 }
  0xf3   :  { %v512_v31 = vsel %vm439_vm10, %v2210_v13, 0.0  ;;  %v1604_v41 = vadd.f32 %v1540_v62, %v1399_v28  ;;  %v516_v2 = vsel %vm443_vm11, %v2210_v13, 0.0  ;;  %vm644_vm12 = vcmp.eq.s32.totalorder %v2920_v59, %v2218_v21 }
  0xf4   :  { %v576_v6 = vadd.f32 %v512_v31, %v307_v56  ;;  %v1805_v54 = vadd.f32 %v1741_v5, %v1600_v60  ;;  %v580_v45 = vadd.f32 %v516_v2, %v311_v15  ;;  %vm648_vm13 = vcmp.eq.s32.totalorder %v2924_v47, %v2218_v21 }
  0xf5   :  { %v717_v42 = vsel %vm644_vm12, %v2230_v44, 0.0  ;;  %v1809_v63 = vadd.f32 %v1745_v34, %v1604_v41  ;;  %v721_v10 = vsel %vm648_vm13, %v2230_v44, 0.0  ;;  %vm849_vm14 = vcmp.eq.s32.totalorder %v2920_v59, %v2238_v30 }
  0xf6   :  { %v781_v16 = vadd.f32 %v717_v42, %v576_v6  ;;  %v785_v62 = vadd.f32 %v721_v10, %v580_v45  ;;  %vm853_vm15 = vcmp.eq.s32.totalorder %v2924_v47, %v2238_v30  ;;  %v922_v29 = vsel %vm849_vm14, %v2250_v48, 0.0 }
  0xf7   :  { %vm1054_vm0 = vcmp.eq.s32.totalorder %v2920_v59, %v4124_v37  ;;  %v1853_v5 = vpack.c.bf16 %v1809_v63, %v1805_v54  ;;  %v926_v28 = vsel %vm853_vm15, %v2250_v48, 0.0  ;;  %vm1058_vm1 = vcmp.eq.s32.totalorder %v2924_v47, %v4124_v37  ;;  %v4187_v63 = vld [vmem:[#allocation39_spill] sm:$0xff] }
  0xf8   :  { %v986_v56 = vadd.f32 %v922_v29, %v781_v16  ;;  %v990_v34 = vadd.f32 %v926_v28, %v785_v62  ;;  %v1127_v60 = vsel %vm1054_vm0, %v4145_v43, 0.0  ;;  %v1131_v15 = vsel %vm1058_vm1, %v4145_v43, 0.0  ;;  %v4188_v16 = vld [vmem:[#allocation41_spill] sm:$0xff]  ;;  %v4189_v29 = vld [vmem:[#allocation14_spill] sm:$0xff] }
  0xf9   :  { %vm1259_vm2 = vcmp.eq.s32.totalorder %v2920_v59, %v4146_v25  ;;  %1896 = vmatpush.bf16.msra.mxu2 %v1853_v5  ;;  %vm1263_vm3 = vcmp.eq.s32.totalorder %v2924_v47, %v4146_v25  ;;  %vm1464_vm4 = vcmp.eq.s32.totalorder %v2920_v59, %v4167_v22  ;;  %vm1468_vm5 = vcmp.eq.s32.totalorder %v2924_v47, %v4167_v22 }
  0xfa   :  { %v1191_v31 = vadd.f32 %v1127_v60, %v986_v56  ;;  %v1332_v41 = vsel %vm1259_vm2, %v4166_v17, 0.0  ;;  %v1195_v2 = vadd.f32 %v1131_v15, %v990_v34  ;;  %v1336_v6 = vsel %vm1263_vm3, %v4166_v17, 0.0  ;;  %v4190_v15 = vld [vmem:[#allocation15_spill] sm:$0xff] }
  0xfb   :  { %v1537_v54 = vsel %vm1464_vm4, %v4129_v58, 0.0  ;;  %v1541_v42 = vsel %vm1468_vm5, %v4129_v58, 0.0  ;;  %vm1669_vm6 = vcmp.eq.s32.totalorder %v2920_v59, %v4187_v63  ;;  %vm1673_vm7 = vcmp.eq.s32.totalorder %v2924_v47, %v4187_v63  ;;  %v4191_v59 = vld [vmem:[#allocation22_spill] sm:$0xff]  ;;  %v4195_v63 = vld [vmem:[#allocation24_spill] sm:$0xff] }
  0xfc   :  { %v1396_v45 = vadd.f32 %v1332_v41, %v1191_v31  ;;  %v1400_v10 = vadd.f32 %v1336_v6, %v1195_v2  ;;  %v1742_v62 = vsel %vm1669_vm6, %v4188_v16, 0.0  ;;  %v3118_v5 = vadd.s32 48, %v4189_v29  ;;  %v4192_v31 = vld [vmem:[#allocation17_spill] sm:$0xff] }
  0xfd   :  { %v1746_v56 = vsel %vm1673_vm7, %v4188_v16, 0.0  ;;  %v3122_v34 = vadd.s32 56, %v4189_v29 }
  0xfe   :  { %v1601_v28 = vadd.f32 %v1537_v54, %v1396_v45  ;;  %v1605_v60 = vadd.f32 %v1541_v42, %v1400_v10  ;;  %vm223_vm8 = vcmp.eq.s32.totalorder %v3118_v5, %v4190_v15  ;;  %vm428_vm9 = vcmp.eq.s32.totalorder %v3118_v5, %v4134_v24  ;;  %v4193_v54 = vld [vmem:[#allocation21_spill] sm:$0xff] }
  0xff   :  { %vm633_vm10 = vcmp.eq.s32.totalorder %v3118_v5, %v4191_v59  ;;  %vm227_vm11 = vcmp.eq.s32.totalorder %v3122_v34, %v4190_v15  ;;  %v296_v41 = vsel %vm223_vm8, %v4192_v31, 0.0  ;;  %vm432_vm12 = vcmp.eq.s32.totalorder %v3122_v34, %v4134_v24 }
 0x100   :  { %v1806_v47 = vadd.f32 %v1742_v62, %v1601_v28  ;;  %v1810_v2 = vadd.f32 %v1746_v56, %v1605_v60  ;;  %v300_v6 = vsel %vm227_vm11, %v4192_v31, 0.0  ;;  %v501_v45 = vsel %vm428_vm9, %v4193_v54, 0.0  ;;  %v4194_v62 = vld [vmem:[#allocation23_spill] sm:$0xff]  ;;  %v4196_v31 = vld [vmem:[#allocation25_spill] sm:$0xff] }
 0x101   :  { %v505_v42 = vsel %vm432_vm12, %v4193_v54, 0.0  ;;  %v565_v10 = vadd.f32 %v501_v45, %v296_v41  ;;  %vm637_vm13 = vcmp.eq.s32.totalorder %v3122_v34, %v4191_v59  ;;  %v706_v28 = vsel %vm633_vm10, %v4194_v62, 0.0 }
 0x102   :  { %v569_v29 = vadd.f32 %v505_v42, %v300_v6  ;;  %v1854_v15 = vpack.c.bf16 %v1810_v2, %v1806_v47  ;;  %v710_v16 = vsel %vm637_vm13, %v4194_v62, 0.0  ;;  %vm838_vm14 = vcmp.eq.s32.totalorder %v3118_v5, %v4195_v63  ;;  %v4197_v6 = vld [vmem:[#allocation26_spill] sm:$0xff]  ;;  %v4202_v62 = vld [vmem:[#allocation36_spill] sm:$0xff] }
 0x103   :  { %vm842_vm15 = vcmp.eq.s32.totalorder %v3122_v34, %v4195_v63  ;;  %v770_v56 = vadd.f32 %v706_v28, %v565_v10  ;;  %v911_v54 = vsel %vm838_vm14, %v4196_v31, 0.0  ;;  %vm1043_vm0 = vcmp.eq.s32.totalorder %v3118_v5, %v4197_v6  ;;  %v4198_v47 = vld [vmem:[#allocation30_spill] sm:$0xff]  ;;  %v4200_v10 = vld [vmem:[#allocation32_spill] sm:$0xff] }
 0x104   :  { %v774_v60 = vadd.f32 %v710_v16, %v569_v29  ;;  %v915_v41 = vsel %vm842_vm15, %v4196_v31, 0.0  ;;  %1909 = vmatpush.bf16.msra.mxu3 %v1854_v15  ;;  %vm1047_vm1 = vcmp.eq.s32.totalorder %v3122_v34, %v4197_v6  ;;  %vm1248_vm2 = vcmp.eq.s32.totalorder %v3118_v5, %v4198_v47  ;;  %v4199_v16 = vld [vmem:[#allocation28_spill] sm:$0xff]  ;;  %v4201_v31 = vld [vmem:[#allocation34_spill] sm:$0xff] }
 0x105   :  { %vm1252_vm3 = vcmp.eq.s32.totalorder %v3122_v34, %v4198_v47  ;;  %v975_v2 = vadd.f32 %v911_v54, %v770_v56  ;;  %v1116_v29 = vsel %vm1043_vm0, %v4199_v16, 0.0  ;;  %v1120_v42 = vsel %vm1047_vm1, %v4199_v16, 0.0  ;;  %v4203_v56 = vld [vmem:[#allocation38_spill] sm:$0xff]  ;;  %v4207_v16 = vld [vmem:[#allocation20_spill] sm:$0xff] }
 0x106   :  { %v979_v45 = vadd.f32 %v915_v41, %v774_v60  ;;  %v1321_v15 = vsel %vm1248_vm2, %v4200_v10, 0.0  ;;  %v1325_v28 = vsel %vm1252_vm3, %v4200_v10, 0.0  ;;  %vm1453_vm4 = vcmp.eq.s32.totalorder %v3118_v5, %v4201_v31  ;;  %v4204_v60 = vld [vmem:[#allocation16_spill] sm:$0xff] }
 0x107   :  { %vm1457_vm5 = vcmp.eq.s32.totalorder %v3122_v34, %v4201_v31  ;;  %v1180_v6 = vadd.f32 %v1116_v29, %v975_v2  ;;  %v1526_v47 = vsel %vm1453_vm4, %v4202_v62, 0.0  ;;  %vm1658_vm6 = vcmp.eq.s32.totalorder %v3118_v5, %v4203_v56  ;;  %v4205_v2 = vld [vmem:[#allocation40_spill] sm:$0xff] }
 0x108   :  { %v1184_v63 = vadd.f32 %v1120_v42, %v979_v45  ;;  %v1530_v54 = vsel %vm1457_vm5, %v4202_v62, 0.0  ;;  %vm1662_vm7 = vcmp.eq.s32.totalorder %v3122_v34, %v4203_v56  ;;  %vm224_vm8 = vcmp.eq.s32.totalorder %v3118_v5, %v4204_v60  ;;  %v4206_v42 = vld [vmem:[#allocation18_spill] sm:$0xff] }
 0x109   :  { %vm228_vm9 = vcmp.eq.s32.totalorder %v3122_v34, %v4204_v60  ;;  %v1385_v41 = vadd.f32 %v1321_v15, %v1180_v6  ;;  %v1731_v45 = vsel %vm1658_vm6, %v4205_v2, 0.0  ;;  %v1735_v29 = vsel %vm1662_vm7, %v4205_v2, 0.0 }
 0x10a   :  { %v1389_v31 = vadd.f32 %v1325_v28, %v1184_v63  ;;  %v297_v62 = vsel %vm224_vm8, %v4206_v42, 0.0  ;;  %v301_v10 = vsel %vm228_vm9, %v4206_v42, 0.0  ;;  %vm429_vm10 = vcmp.eq.s32.totalorder %v3118_v5, %v4207_v16 }
 0x10b   :  { %vm433_vm11 = vcmp.eq.s32.totalorder %v3122_v34, %v4207_v16  ;;  %v1590_v56 = vadd.f32 %v1526_v47, %v1385_v41  ;;  %v502_v60 = vsel %vm429_vm10, %v2204_v18, 0.0  ;;  %vm634_vm12 = vcmp.eq.s32.totalorder %v3118_v5, %v2214_v19 }
 0x10c   :  { %v1594_v59 = vadd.f32 %v1530_v54, %v1389_v31  ;;  %v506_v63 = vsel %vm433_vm11, %v2204_v18, 0.0  ;;  %v566_v6 = vadd.f32 %v502_v60, %v297_v62  ;;  %vm638_vm13 = vcmp.eq.s32.totalorder %v3122_v34, %v2214_v19 }
 0x10d   :  { %v570_v15 = vadd.f32 %v506_v63, %v301_v10  ;;  %v1795_v28 = vadd.f32 %v1731_v45, %v1590_v56  ;;  %v707_v2 = vsel %vm634_vm12, %v2224_v26, 0.0  ;;  %v711_v16 = vsel %vm638_vm13, %v2224_v26, 0.0 }
 0x10e   :  { %v1799_v42 = vadd.f32 %v1735_v29, %v1594_v59  ;;  %v771_v47 = vadd.f32 %v707_v2, %v566_v6  ;;  %vm839_vm14 = vcmp.eq.s32.totalorder %v3118_v5, %v2234_v32  ;;  %vm843_vm15 = vcmp.eq.s32.totalorder %v3122_v34, %v2234_v32 }
 0x10f   :  { %v775_v31 = vadd.f32 %v711_v16, %v570_v15  ;;  %v912_v10 = vsel %vm839_vm14, %v2244_v36, 0.0  ;;  %v916_v54 = vsel %vm843_vm15, %v2244_v36, 0.0  ;;  %vm1044_vm0 = vcmp.eq.s32.totalorder %v3118_v5, %v2254_v46 }
 0x110   :  { %v1847_v62 = vpack.c.bf16 %v1799_v42, %v1795_v28  ;;  %v976_v59 = vadd.f32 %v912_v10, %v771_v47  ;;  %vm1048_vm1 = vcmp.eq.s32.totalorder %v3122_v34, %v2254_v46  ;;  %v1117_v16 = vsel %vm1044_vm0, %v2264_v35, 0.0 }
 0x111   :  { %v980_v56 = vadd.f32 %v916_v54, %v775_v31  ;;  %v1121_v60 = vsel %vm1048_vm1, %v2264_v35, 0.0  ;;  %vm1249_vm2 = vcmp.eq.s32.totalorder %v3118_v5, %v2274_v49  ;;  %vm1253_vm3 = vcmp.eq.s32.totalorder %v3122_v34, %v2274_v49 }
 0x112   :  { %1871 = vmatpush.bf16.msra.mxu0 %v1847_v62  ;;  %vm1454_vm4 = vcmp.eq.s32.totalorder %v3118_v5, %v2294_v55  ;;  %v1181_v41 = vadd.f32 %v1117_v16, %v976_v59  ;;  %v1322_v45 = vsel %vm1249_vm2, %v2284_v51, 0.0  ;;  %v1326_v29 = vsel %vm1253_vm3, %v2284_v51, 0.0 }
 0x113   :  { %v1185_v2 = vadd.f32 %v1121_v60, %v980_v56  ;;  %vm1458_vm5 = vcmp.eq.s32.totalorder %v3122_v34, %v2294_v55  ;;  %v1527_v42 = vsel %vm1454_vm4, %v2304_v1, 0.0  ;;  %vm1659_vm6 = vcmp.eq.s32.totalorder %v3118_v5, %v2314_v9 }
 0x114   :  { %vm1663_vm7 = vcmp.eq.s32.totalorder %v3122_v34, %v2314_v9  ;;  %v1386_v63 = vadd.f32 %v1322_v45, %v1181_v41  ;;  %v1531_v15 = vsel %vm1458_vm5, %v2304_v1, 0.0  ;;  %v1732_v28 = vsel %vm1659_vm6, %v2324_v23, 0.0 }
 0x115   :  { %v1390_v6 = vadd.f32 %v1326_v29, %v1185_v2  ;;  %v1736_v47 = vsel %vm1663_vm7, %v2324_v23, 0.0  ;;  %vm225_vm8 = vcmp.eq.s32.totalorder %v3118_v5, %v2171_v61  ;;  %vm229_vm9 = vcmp.eq.s32.totalorder %v3122_v34, %v2171_v61 }
 0x116   :  { %vm430_vm10 = vcmp.eq.s32.totalorder %v3118_v5, %v2196_v8  ;;  %v1591_v31 = vadd.f32 %v1527_v42, %v1386_v63  ;;  %v298_v10 = vsel %vm225_vm8, %v2185_v3, 0.0  ;;  %v302_v54 = vsel %vm229_vm9, %v2185_v3, 0.0 }
 0x117   :  { %v1595_v62 = vadd.f32 %v1531_v15, %v1390_v6  ;;  %vm434_vm11 = vcmp.eq.s32.totalorder %v3122_v34, %v2196_v8  ;;  %v503_v59 = vsel %vm430_vm10, %v2207_v12, 0.0  ;;  %vm635_vm12 = vcmp.eq.s32.totalorder %v3118_v5, %v2216_v20 }
 0x118   :  { %vm639_vm13 = vcmp.eq.s32.totalorder %v3122_v34, %v2216_v20  ;;  %v1796_v56 = vadd.f32 %v1732_v28, %v1591_v31  ;;  %v507_v60 = vsel %vm434_vm11, %v2207_v12, 0.0  ;;  %v567_v41 = vadd.f32 %v503_v59, %v298_v10 }
 0x119   :  { %v1800_v16 = vadd.f32 %v1736_v47, %v1595_v62  ;;  %v571_v2 = vadd.f32 %v507_v60, %v302_v54  ;;  %v708_v45 = vsel %vm635_vm12, %v2227_v27, 0.0  ;;  %v712_v29 = vsel %vm639_vm13, %v2227_v27, 0.0 }
 0x11a   :  { %vm840_vm14 = vcmp.eq.s32.totalorder %v3118_v5, %v2236_v33  ;;  %v772_v63 = vadd.f32 %v708_v45, %v567_v41  ;;  %vm844_vm15 = vcmp.eq.s32.totalorder %v3122_v34, %v2236_v33  ;;  %vm1045_vm0 = vcmp.eq.s32.totalorder %v3118_v5, %v2256_v40 }
 0x11b   :  { %v1848_v42 = vpack.c.bf16 %v1800_v16, %v1796_v56  ;;  %v913_v6 = vsel %vm840_vm14, %v2247_v39, 0.0  ;;  %v776_v15 = vadd.f32 %v712_v29, %v571_v2  ;;  %v917_v28 = vsel %vm844_vm15, %v2247_v39, 0.0 }
 0x11c   :  { %vm1049_vm1 = vcmp.eq.s32.totalorder %v3122_v34, %v2256_v40  ;;  %v977_v47 = vadd.f32 %v913_v6, %v772_v63  ;;  %v1118_v31 = vsel %vm1045_vm0, %v2267_v38, 0.0  ;;  %vm1250_vm2 = vcmp.eq.s32.totalorder %v3118_v5, %v2276_v50 }
 0x11d   :  { %1884 = vmatpush.bf16.msra.mxu1 %v1848_v42  ;;  %v1122_v62 = vsel %vm1049_vm1, %v2267_v38, 0.0  ;;  %v981_v10 = vadd.f32 %v917_v28, %v776_v15  ;;  %vm1254_vm3 = vcmp.eq.s32.totalorder %v3122_v34, %v2276_v50  ;;  %v1323_v54 = vsel %vm1250_vm2, %v2287_v52, 0.0 }
 0x11e   :  { %vm1455_vm4 = vcmp.eq.s32.totalorder %v3118_v5, %v2296_v57  ;;  %v1182_v59 = vadd.f32 %v1118_v31, %v977_v47  ;;  %v1327_v56 = vsel %vm1254_vm3, %v2287_v52, 0.0  ;;  %vm1459_vm5 = vcmp.eq.s32.totalorder %v3122_v34, %v2296_v57 }
 0x11f   :  { %v1528_v16 = vsel %vm1455_vm4, %v2307_v4, 0.0  ;;  %v1186_v60 = vadd.f32 %v1122_v62, %v981_v10  ;;  %v1532_v41 = vsel %vm1459_vm5, %v2307_v4, 0.0  ;;  %vm1660_vm6 = vcmp.eq.s32.totalorder %v3118_v5, %v2316_v14 }
 0x120   :  { %vm1664_vm7 = vcmp.eq.s32.totalorder %v3122_v34, %v2316_v14  ;;  %v1387_v2 = vadd.f32 %v1323_v54, %v1182_v59  ;;  %v1733_v45 = vsel %vm1660_vm6, %v2327_v53, 0.0  ;;  %vm226_vm8 = vcmp.eq.s32.totalorder %v3118_v5, %v2175_v0 }
 0x121   :  { %v1737_v29 = vsel %vm1664_vm7, %v2327_v53, 0.0  ;;  %v1391_v42 = vadd.f32 %v1327_v56, %v1186_v60  ;;  %vm230_vm9 = vcmp.eq.s32.totalorder %v3122_v34, %v2175_v0  ;;  %v299_v63 = vsel %vm226_vm8, %v2190_v7, 0.0 }
 0x122   :  { %vm431_vm10 = vcmp.eq.s32.totalorder %v3118_v5, %v2198_v11  ;;  %v1592_v6 = vadd.f32 %v1528_v16, %v1387_v2  ;;  %v303_v15 = vsel %vm230_vm9, %v2190_v7, 0.0  ;;  %vm435_vm11 = vcmp.eq.s32.totalorder %v3122_v34, %v2198_v11 }
 0x123   :  { %v504_v28 = vsel %vm431_vm10, %v2210_v13, 0.0  ;;  %v1596_v47 = vadd.f32 %v1532_v41, %v1391_v42  ;;  %v508_v31 = vsel %vm435_vm11, %v2210_v13, 0.0  ;;  %vm636_vm12 = vcmp.eq.s32.totalorder %v3118_v5, %v2218_v21 }
 0x124   :  { %v568_v62 = vadd.f32 %v504_v28, %v299_v63  ;;  %v1797_v10 = vadd.f32 %v1733_v45, %v1592_v6  ;;  %v572_v54 = vadd.f32 %v508_v31, %v303_v15  ;;  %vm640_vm13 = vcmp.eq.s32.totalorder %v3122_v34, %v2218_v21 }
 0x125   :  { %v709_v59 = vsel %vm636_vm12, %v2230_v44, 0.0  ;;  %v1801_v56 = vadd.f32 %v1737_v29, %v1596_v47  ;;  %v713_v16 = vsel %vm640_vm13, %v2230_v44, 0.0  ;;  %vm841_vm14 = vcmp.eq.s32.totalorder %v3118_v5, %v2238_v30 }
 0x126   :  { %v773_v60 = vadd.f32 %v709_v59, %v568_v62  ;;  %v777_v41 = vadd.f32 %v713_v16, %v572_v54  ;;  %vm845_vm15 = vcmp.eq.s32.totalorder %v3122_v34, %v2238_v30  ;;  %v914_v2 = vsel %vm841_vm14, %v2250_v48, 0.0 }
 0x127   :  { %vm1046_vm0 = vcmp.eq.s32.totalorder %v3118_v5, %v4124_v37  ;;  %v1849_v45 = vpack.c.bf16 %v1801_v56, %v1797_v10  ;;  %v918_v42 = vsel %vm845_vm15, %v2250_v48, 0.0  ;;  %vm1050_vm1 = vcmp.eq.s32.totalorder %v3122_v34, %v4124_v37  ;;  %v4208_v56 = vld [vmem:[#allocation39_spill] sm:$0xff] }
 0x128   :  { %v978_v63 = vadd.f32 %v914_v2, %v773_v60  ;;  %v982_v29 = vadd.f32 %v918_v42, %v777_v41  ;;  %v1119_v6 = vsel %vm1046_vm0, %v4145_v43, 0.0  ;;  %v1123_v15 = vsel %vm1050_vm1, %v4145_v43, 0.0  ;;  %v4209_v60 = vld [vmem:[#allocation41_spill] sm:$0xff]  ;;  %v4210_v2 = vld [vmem:[#allocation14_spill] sm:$0xff] }
 0x129   :  { %vm1251_vm2 = vcmp.eq.s32.totalorder %v3118_v5, %v4146_v25  ;;  %1897 = vmatpush.bf16.msra.mxu2 %v1849_v45  ;;  %vm1255_vm3 = vcmp.eq.s32.totalorder %v3122_v34, %v4146_v25  ;;  %vm1456_vm4 = vcmp.eq.s32.totalorder %v3118_v5, %v4167_v22  ;;  %vm1460_vm5 = vcmp.eq.s32.totalorder %v3122_v34, %v4167_v22 }
 0x12a   :  { %v1183_v28 = vadd.f32 %v1119_v6, %v978_v63  ;;  %v1324_v47 = vsel %vm1251_vm2, %v4166_v17, 0.0  ;;  %v1187_v31 = vadd.f32 %v1123_v15, %v982_v29  ;;  %v1328_v62 = vsel %vm1255_vm3, %v4166_v17, 0.0  ;;  %v4211_v15 = vld [vmem:[#allocation15_spill] sm:$0xff] }
 0x12b   :  { %v1529_v10 = vsel %vm1456_vm4, %v4129_v58, 0.0  ;;  %v1533_v59 = vsel %vm1460_vm5, %v4129_v58, 0.0  ;;  %vm1661_vm6 = vcmp.eq.s32.totalorder %v3118_v5, %v4208_v56  ;;  %vm1665_vm7 = vcmp.eq.s32.totalorder %v3122_v34, %v4208_v56  ;;  %v4212_v5 = vld [vmem:[#allocation22_spill] sm:$0xff]  ;;  %v4216_v56 = vld [vmem:[#allocation24_spill] sm:$0xff] }
 0x12c   :  { %v1388_v54 = vadd.f32 %v1324_v47, %v1183_v28  ;;  %v1392_v16 = vadd.f32 %v1328_v62, %v1187_v31  ;;  %v1734_v41 = vsel %vm1661_vm6, %v4209_v60, 0.0  ;;  %v3316_v45 = vadd.s32 32, %v4210_v2  ;;  %v4213_v28 = vld [vmem:[#allocation17_spill] sm:$0xff] }
 0x12d   :  { %v1738_v63 = vsel %vm1665_vm7, %v4209_v60, 0.0  ;;  %v3320_v29 = vadd.s32 40, %v4210_v2 }
 0x12e   :  { %v1593_v42 = vadd.f32 %v1529_v10, %v1388_v54  ;;  %v1597_v6 = vadd.f32 %v1533_v59, %v1392_v16  ;;  %vm215_vm8 = vcmp.eq.s32.totalorder %v3316_v45, %v4211_v15  ;;  %vm420_vm9 = vcmp.eq.s32.totalorder %v3316_v45, %v4134_v24  ;;  %v4214_v10 = vld [vmem:[#allocation21_spill] sm:$0xff] }
 0x12f   :  { %vm625_vm10 = vcmp.eq.s32.totalorder %v3316_v45, %v4212_v5  ;;  %vm219_vm11 = vcmp.eq.s32.totalorder %v3320_v29, %v4211_v15  ;;  %v288_v47 = vsel %vm215_vm8, %v4213_v28, 0.0  ;;  %vm424_vm12 = vcmp.eq.s32.totalorder %v3320_v29, %v4134_v24 }
 0x130   :  { %v1798_v34 = vadd.f32 %v1734_v41, %v1593_v42  ;;  %v1802_v31 = vadd.f32 %v1738_v63, %v1597_v6  ;;  %v292_v62 = vsel %vm219_vm11, %v4213_v28, 0.0  ;;  %v493_v54 = vsel %vm420_vm9, %v4214_v10, 0.0  ;;  %v4215_v41 = vld [vmem:[#allocation23_spill] sm:$0xff]  ;;  %v4217_v28 = vld [vmem:[#allocation25_spill] sm:$0xff] }
 0x131   :  { %v497_v59 = vsel %vm424_vm12, %v4214_v10, 0.0  ;;  %v557_v16 = vadd.f32 %v493_v54, %v288_v47  ;;  %vm629_vm13 = vcmp.eq.s32.totalorder %v3320_v29, %v4212_v5  ;;  %v698_v42 = vsel %vm625_vm10, %v4215_v41, 0.0 }
 0x132   :  { %v561_v2 = vadd.f32 %v497_v59, %v292_v62  ;;  %v1850_v15 = vpack.c.bf16 %v1802_v31, %v1798_v34  ;;  %v702_v60 = vsel %vm629_vm13, %v4215_v41, 0.0  ;;  %vm830_vm14 = vcmp.eq.s32.totalorder %v3316_v45, %v4216_v56  ;;  %v4218_v62 = vld [vmem:[#allocation26_spill] sm:$0xff]  ;;  %v4223_v41 = vld [vmem:[#allocation36_spill] sm:$0xff] }
 0x133   :  { %vm834_vm15 = vcmp.eq.s32.totalorder %v3320_v29, %v4216_v56  ;;  %v762_v63 = vadd.f32 %v698_v42, %v557_v16  ;;  %v903_v10 = vsel %vm830_vm14, %v4217_v28, 0.0  ;;  %vm1035_vm0 = vcmp.eq.s32.totalorder %v3316_v45, %v4218_v62  ;;  %v4219_v34 = vld [vmem:[#allocation30_spill] sm:$0xff]  ;;  %v4221_v16 = vld [vmem:[#allocation32_spill] sm:$0xff] }
 0x134   :  { %v766_v6 = vadd.f32 %v702_v60, %v561_v2  ;;  %v907_v47 = vsel %vm834_vm15, %v4217_v28, 0.0  ;;  %1910 = vmatpush.bf16.msra.mxu3 %v1850_v15  ;;  %vm1039_vm1 = vcmp.eq.s32.totalorder %v3320_v29, %v4218_v62  ;;  %vm1240_vm2 = vcmp.eq.s32.totalorder %v3316_v45, %v4219_v34  ;;  %v4220_v60 = vld [vmem:[#allocation28_spill] sm:$0xff]  ;;  %v4222_v28 = vld [vmem:[#allocation34_spill] sm:$0xff] }
 0x135   :  { %vm1244_vm3 = vcmp.eq.s32.totalorder %v3320_v29, %v4219_v34  ;;  %v967_v31 = vadd.f32 %v903_v10, %v762_v63  ;;  %v1108_v2 = vsel %vm1035_vm0, %v4220_v60, 0.0  ;;  %v1112_v59 = vsel %vm1039_vm1, %v4220_v60, 0.0  ;;  %v4224_v63 = vld [vmem:[#allocation38_spill] sm:$0xff]  ;;  %v4228_v60 = vld [vmem:[#allocation20_spill] sm:$0xff] }
 0x136   :  { %v971_v54 = vadd.f32 %v907_v47, %v766_v6  ;;  %v1313_v15 = vsel %vm1240_vm2, %v4221_v16, 0.0  ;;  %v1317_v42 = vsel %vm1244_vm3, %v4221_v16, 0.0  ;;  %vm1445_vm4 = vcmp.eq.s32.totalorder %v3316_v45, %v4222_v28  ;;  %v4225_v6 = vld [vmem:[#allocation16_spill] sm:$0xff] }
 0x137   :  { %vm1449_vm5 = vcmp.eq.s32.totalorder %v3320_v29, %v4222_v28  ;;  %v1172_v62 = vadd.f32 %v1108_v2, %v967_v31  ;;  %v1518_v34 = vsel %vm1445_vm4, %v4223_v41, 0.0  ;;  %vm1650_vm6 = vcmp.eq.s32.totalorder %v3316_v45, %v4224_v63  ;;  %v4226_v31 = vld [vmem:[#allocation40_spill] sm:$0xff] }
 0x138   :  { %v1176_v56 = vadd.f32 %v1112_v59, %v971_v54  ;;  %v1522_v10 = vsel %vm1449_vm5, %v4223_v41, 0.0  ;;  %vm1654_vm7 = vcmp.eq.s32.totalorder %v3320_v29, %v4224_v63  ;;  %vm216_vm8 = vcmp.eq.s32.totalorder %v3316_v45, %v4225_v6  ;;  %v4227_v59 = vld [vmem:[#allocation18_spill] sm:$0xff] }
 0x139   :  { %vm220_vm9 = vcmp.eq.s32.totalorder %v3320_v29, %v4225_v6  ;;  %v1377_v47 = vadd.f32 %v1313_v15, %v1172_v62  ;;  %v1723_v54 = vsel %vm1650_vm6, %v4226_v31, 0.0  ;;  %v1727_v2 = vsel %vm1654_vm7, %v4226_v31, 0.0 }
 0x13a   :  { %v1381_v28 = vadd.f32 %v1317_v42, %v1176_v56  ;;  %v289_v41 = vsel %vm216_vm8, %v4227_v59, 0.0  ;;  %v293_v16 = vsel %vm220_vm9, %v4227_v59, 0.0  ;;  %vm421_vm10 = vcmp.eq.s32.totalorder %v3316_v45, %v4228_v60 }
 0x13b   :  { %vm425_vm11 = vcmp.eq.s32.totalorder %v3320_v29, %v4228_v60  ;;  %v1582_v63 = vadd.f32 %v1518_v34, %v1377_v47  ;;  %v494_v6 = vsel %vm421_vm10, %v2204_v18, 0.0  ;;  %vm626_vm12 = vcmp.eq.s32.totalorder %v3316_v45, %v2214_v19 }
 0x13c   :  { %v1586_v5 = vadd.f32 %v1522_v10, %v1381_v28  ;;  %v498_v56 = vsel %vm425_vm11, %v2204_v18, 0.0  ;;  %v558_v62 = vadd.f32 %v494_v6, %v289_v41  ;;  %vm630_vm13 = vcmp.eq.s32.totalorder %v3320_v29, %v2214_v19 }
 0x13d   :  { %v562_v15 = vadd.f32 %v498_v56, %v293_v16  ;;  %v1787_v42 = vadd.f32 %v1723_v54, %v1582_v63  ;;  %v699_v31 = vsel %vm626_vm12, %v2224_v26, 0.0  ;;  %v703_v60 = vsel %vm630_vm13, %v2224_v26, 0.0 }
 0x13e   :  { %v1791_v59 = vadd.f32 %v1727_v2, %v1586_v5  ;;  %v763_v34 = vadd.f32 %v699_v31, %v558_v62  ;;  %vm831_vm14 = vcmp.eq.s32.totalorder %v3316_v45, %v2234_v32  ;;  %vm835_vm15 = vcmp.eq.s32.totalorder %v3320_v29, %v2234_v32 }
 0x13f   :  { %v767_v28 = vadd.f32 %v703_v60, %v562_v15  ;;  %v904_v16 = vsel %vm831_vm14, %v2244_v36, 0.0  ;;  %v908_v10 = vsel %vm835_vm15, %v2244_v36, 0.0  ;;  %vm1036_vm0 = vcmp.eq.s32.totalorder %v3316_v45, %v2254_v46 }
 0x140   :  { %v1843_v41 = vpack.c.bf16 %v1791_v59, %v1787_v42  ;;  %v968_v5 = vadd.f32 %v904_v16, %v763_v34  ;;  %vm1040_vm1 = vcmp.eq.s32.totalorder %v3320_v29, %v2254_v46  ;;  %v1109_v60 = vsel %vm1036_vm0, %v2264_v35, 0.0 }
 0x141   :  { %v972_v63 = vadd.f32 %v908_v10, %v767_v28  ;;  %v1113_v6 = vsel %vm1040_vm1, %v2264_v35, 0.0  ;;  %vm1241_vm2 = vcmp.eq.s32.totalorder %v3316_v45, %v2274_v49  ;;  %vm1245_vm3 = vcmp.eq.s32.totalorder %v3320_v29, %v2274_v49 }
 0x142   :  { %1872 = vmatpush.bf16.msra.mxu0 %v1843_v41  ;;  %vm1446_vm4 = vcmp.eq.s32.totalorder %v3316_v45, %v2294_v55  ;;  %v1173_v47 = vadd.f32 %v1109_v60, %v968_v5  ;;  %v1314_v54 = vsel %vm1241_vm2, %v2284_v51, 0.0  ;;  %v1318_v2 = vsel %vm1245_vm3, %v2284_v51, 0.0 }
 0x143   :  { %v1177_v31 = vadd.f32 %v1113_v6, %v972_v63  ;;  %vm1450_vm5 = vcmp.eq.s32.totalorder %v3320_v29, %v2294_v55  ;;  %v1519_v59 = vsel %vm1446_vm4, %v2304_v1, 0.0  ;;  %vm1651_vm6 = vcmp.eq.s32.totalorder %v3316_v45, %v2314_v9 }
 0x144   :  { %vm1655_vm7 = vcmp.eq.s32.totalorder %v3320_v29, %v2314_v9  ;;  %v1378_v56 = vadd.f32 %v1314_v54, %v1173_v47  ;;  %v1523_v15 = vsel %vm1450_vm5, %v2304_v1, 0.0  ;;  %v1724_v42 = vsel %vm1651_vm6, %v2324_v23, 0.0 }
 0x145   :  { %v1382_v62 = vadd.f32 %v1318_v2, %v1177_v31  ;;  %v1728_v34 = vsel %vm1655_vm7, %v2324_v23, 0.0  ;;  %vm217_vm8 = vcmp.eq.s32.totalorder %v3316_v45, %v2171_v61  ;;  %vm221_vm9 = vcmp.eq.s32.totalorder %v3320_v29, %v2171_v61 }
 0x146   :  { %vm422_vm10 = vcmp.eq.s32.totalorder %v3316_v45, %v2196_v8  ;;  %v1583_v28 = vadd.f32 %v1519_v59, %v1378_v56  ;;  %v290_v16 = vsel %vm217_vm8, %v2185_v3, 0.0  ;;  %v294_v10 = vsel %vm221_vm9, %v2185_v3, 0.0 }
 0x147   :  { %v1587_v41 = vadd.f32 %v1523_v15, %v1382_v62  ;;  %vm426_vm11 = vcmp.eq.s32.totalorder %v3320_v29, %v2196_v8  ;;  %v495_v5 = vsel %vm422_vm10, %v2207_v12, 0.0  ;;  %vm627_vm12 = vcmp.eq.s32.totalorder %v3316_v45, %v2216_v20 }
 0x148   :  { %vm631_vm13 = vcmp.eq.s32.totalorder %v3320_v29, %v2216_v20  ;;  %v1788_v63 = vadd.f32 %v1724_v42, %v1583_v28  ;;  %v499_v6 = vsel %vm426_vm11, %v2207_v12, 0.0  ;;  %v559_v47 = vadd.f32 %v495_v5, %v290_v16 }
 0x149   :  { %v1792_v60 = vadd.f32 %v1728_v34, %v1587_v41  ;;  %v563_v31 = vadd.f32 %v499_v6, %v294_v10  ;;  %v700_v54 = vsel %vm627_vm12, %v2227_v27, 0.0  ;;  %v704_v2 = vsel %vm631_vm13, %v2227_v27, 0.0 }
 0x14a   :  { %vm832_vm14 = vcmp.eq.s32.totalorder %v3316_v45, %v2236_v33  ;;  %v764_v56 = vadd.f32 %v700_v54, %v559_v47  ;;  %vm836_vm15 = vcmp.eq.s32.totalorder %v3320_v29, %v2236_v33  ;;  %vm1037_vm0 = vcmp.eq.s32.totalorder %v3316_v45, %v2256_v40 }
 0x14b   :  { %v1844_v59 = vpack.c.bf16 %v1792_v60, %v1788_v63  ;;  %v905_v62 = vsel %vm832_vm14, %v2247_v39, 0.0  ;;  %v768_v15 = vadd.f32 %v704_v2, %v563_v31  ;;  %v909_v42 = vsel %vm836_vm15, %v2247_v39, 0.0 }
 0x14c   :  { %vm1041_vm1 = vcmp.eq.s32.totalorder %v3320_v29, %v2256_v40  ;;  %v969_v34 = vadd.f32 %v905_v62, %v764_v56  ;;  %v1110_v28 = vsel %vm1037_vm0, %v2267_v38, 0.0  ;;  %vm1242_vm2 = vcmp.eq.s32.totalorder %v3316_v45, %v2276_v50 }
 0x14d   :  { %1885 = vmatpush.bf16.msra.mxu1 %v1844_v59  ;;  %v1114_v41 = vsel %vm1041_vm1, %v2267_v38, 0.0  ;;  %v973_v16 = vadd.f32 %v909_v42, %v768_v15  ;;  %vm1246_vm3 = vcmp.eq.s32.totalorder %v3320_v29, %v2276_v50  ;;  %v1315_v10 = vsel %vm1242_vm2, %v2287_v52, 0.0 }
 0x14e   :  { %vm1447_vm4 = vcmp.eq.s32.totalorder %v3316_v45, %v2296_v57  ;;  %v1174_v5 = vadd.f32 %v1110_v28, %v969_v34  ;;  %v1319_v63 = vsel %vm1246_vm3, %v2287_v52, 0.0  ;;  %vm1451_vm5 = vcmp.eq.s32.totalorder %v3320_v29, %v2296_v57 }
 0x14f   :  { %v1520_v60 = vsel %vm1447_vm4, %v2307_v4, 0.0  ;;  %v1178_v6 = vadd.f32 %v1114_v41, %v973_v16  ;;  %v1524_v47 = vsel %vm1451_vm5, %v2307_v4, 0.0  ;;  %vm1652_vm6 = vcmp.eq.s32.totalorder %v3316_v45, %v2316_v14 }
 0x150   :  { %vm1656_vm7 = vcmp.eq.s32.totalorder %v3320_v29, %v2316_v14  ;;  %v1379_v31 = vadd.f32 %v1315_v10, %v1174_v5  ;;  %v1725_v54 = vsel %vm1652_vm6, %v2327_v53, 0.0  ;;  %vm218_vm8 = vcmp.eq.s32.totalorder %v3316_v45, %v2175_v0 }
 0x151   :  { %v1729_v2 = vsel %vm1656_vm7, %v2327_v53, 0.0  ;;  %v1383_v59 = vadd.f32 %v1319_v63, %v1178_v6  ;;  %vm222_vm9 = vcmp.eq.s32.totalorder %v3320_v29, %v2175_v0  ;;  %v291_v56 = vsel %vm218_vm8, %v2190_v7, 0.0 }
 0x152   :  { %vm423_vm10 = vcmp.eq.s32.totalorder %v3316_v45, %v2198_v11  ;;  %v1584_v62 = vadd.f32 %v1520_v60, %v1379_v31  ;;  %v295_v15 = vsel %vm222_vm9, %v2190_v7, 0.0  ;;  %vm427_vm11 = vcmp.eq.s32.totalorder %v3320_v29, %v2198_v11 }
 0x153   :  { %v496_v42 = vsel %vm423_vm10, %v2210_v13, 0.0  ;;  %v1588_v34 = vadd.f32 %v1524_v47, %v1383_v59  ;;  %v500_v28 = vsel %vm427_vm11, %v2210_v13, 0.0  ;;  %vm628_vm12 = vcmp.eq.s32.totalorder %v3316_v45, %v2218_v21 }
 0x154   :  { %v560_v41 = vadd.f32 %v496_v42, %v291_v56  ;;  %v1789_v16 = vadd.f32 %v1725_v54, %v1584_v62  ;;  %v564_v10 = vadd.f32 %v500_v28, %v295_v15  ;;  %vm632_vm13 = vcmp.eq.s32.totalorder %v3320_v29, %v2218_v21 }
 0x155   :  { %v701_v5 = vsel %vm628_vm12, %v2230_v44, 0.0  ;;  %v1793_v63 = vadd.f32 %v1729_v2, %v1588_v34  ;;  %v705_v60 = vsel %vm632_vm13, %v2230_v44, 0.0  ;;  %vm833_vm14 = vcmp.eq.s32.totalorder %v3316_v45, %v2238_v30 }
 0x156   :  { %v765_v6 = vadd.f32 %v701_v5, %v560_v41  ;;  %v769_v47 = vadd.f32 %v705_v60, %v564_v10  ;;  %vm837_vm15 = vcmp.eq.s32.totalorder %v3320_v29, %v2238_v30  ;;  %v906_v31 = vsel %vm833_vm14, %v2250_v48, 0.0 }
 0x157   :  { %vm1038_vm0 = vcmp.eq.s32.totalorder %v3316_v45, %v4124_v37  ;;  %v1845_v54 = vpack.c.bf16 %v1793_v63, %v1789_v16  ;;  %v910_v59 = vsel %vm837_vm15, %v2250_v48, 0.0  ;;  %vm1042_vm1 = vcmp.eq.s32.totalorder %v3320_v29, %v4124_v37  ;;  %v4229_v63 = vld [vmem:[#allocation39_spill] sm:$0xff] }
 0x158   :  { %v970_v56 = vadd.f32 %v906_v31, %v765_v6  ;;  %v974_v2 = vadd.f32 %v910_v59, %v769_v47  ;;  %v1111_v62 = vsel %vm1038_vm0, %v4145_v43, 0.0  ;;  %v1115_v15 = vsel %vm1042_vm1, %v4145_v43, 0.0  ;;  %v4230_v6 = vld [vmem:[#allocation41_spill] sm:$0xff]  ;;  %v4231_v31 = vld [vmem:[#allocation14_spill] sm:$0xff] }
 0x159   :  { %vm1243_vm2 = vcmp.eq.s32.totalorder %v3316_v45, %v4146_v25  ;;  %1898 = vmatpush.bf16.msra.mxu2 %v1845_v54  ;;  %vm1247_vm3 = vcmp.eq.s32.totalorder %v3320_v29, %v4146_v25  ;;  %vm1448_vm4 = vcmp.eq.s32.totalorder %v3316_v45, %v4167_v22  ;;  %vm1452_vm5 = vcmp.eq.s32.totalorder %v3320_v29, %v4167_v22 }
 0x15a   :  { %v1175_v42 = vadd.f32 %v1111_v62, %v970_v56  ;;  %v1316_v34 = vsel %vm1243_vm2, %v4166_v17, 0.0  ;;  %v1179_v28 = vadd.f32 %v1115_v15, %v974_v2  ;;  %v1320_v41 = vsel %vm1247_vm3, %v4166_v17, 0.0  ;;  %v4232_v15 = vld [vmem:[#allocation15_spill] sm:$0xff] }
 0x15b   :  { %v1521_v16 = vsel %vm1448_vm4, %v4129_v58, 0.0  ;;  %v1525_v5 = vsel %vm1452_vm5, %v4129_v58, 0.0  ;;  %vm1653_vm6 = vcmp.eq.s32.totalorder %v3316_v45, %v4229_v63  ;;  %vm1657_vm7 = vcmp.eq.s32.totalorder %v3320_v29, %v4229_v63  ;;  %v4233_v45 = vld [vmem:[#allocation22_spill] sm:$0xff]  ;;  %v4237_v63 = vld [vmem:[#allocation24_spill] sm:$0xff] }
 0x15c   :  { %v1380_v10 = vadd.f32 %v1316_v34, %v1175_v42  ;;  %v1384_v60 = vadd.f32 %v1320_v41, %v1179_v28  ;;  %v1726_v47 = vsel %vm1653_vm6, %v4230_v6, 0.0  ;;  %v3514_v54 = vadd.s32 16, %v4231_v31  ;;  %v4234_v42 = vld [vmem:[#allocation17_spill] sm:$0xff] }
 0x15d   :  { %v1730_v56 = vsel %vm1657_vm7, %v4230_v6, 0.0  ;;  %v3518_v2 = vadd.s32 24, %v4231_v31 }
 0x15e   :  { %v1585_v59 = vadd.f32 %v1521_v16, %v1380_v10  ;;  %v1589_v62 = vadd.f32 %v1525_v5, %v1384_v60  ;;  %vm207_vm8 = vcmp.eq.s32.totalorder %v3514_v54, %v4232_v15  ;;  %vm412_vm9 = vcmp.eq.s32.totalorder %v3514_v54, %v4134_v24  ;;  %v4235_v16 = vld [vmem:[#allocation21_spill] sm:$0xff] }
 0x15f   :  { %vm617_vm10 = vcmp.eq.s32.totalorder %v3514_v54, %v4233_v45  ;;  %vm211_vm11 = vcmp.eq.s32.totalorder %v3518_v2, %v4232_v15  ;;  %v280_v34 = vsel %vm207_vm8, %v4234_v42, 0.0  ;;  %vm416_vm12 = vcmp.eq.s32.totalorder %v3518_v2, %v4134_v24 }
 0x160   :  { %v1790_v29 = vadd.f32 %v1726_v47, %v1585_v59  ;;  %v1794_v28 = vadd.f32 %v1730_v56, %v1589_v62  ;;  %v284_v41 = vsel %vm211_vm11, %v4234_v42, 0.0  ;;  %v485_v10 = vsel %vm412_vm9, %v4235_v16, 0.0  ;;  %v4236_v47 = vld [vmem:[#allocation23_spill] sm:$0xff]  ;;  %v4238_v42 = vld [vmem:[#allocation25_spill] sm:$0xff] }
 0x161   :  { %v489_v5 = vsel %vm416_vm12, %v4235_v16, 0.0  ;;  %v549_v60 = vadd.f32 %v485_v10, %v280_v34  ;;  %vm621_vm13 = vcmp.eq.s32.totalorder %v3518_v2, %v4233_v45  ;;  %v690_v59 = vsel %vm617_vm10, %v4236_v47, 0.0 }
 0x162   :  { %v553_v31 = vadd.f32 %v489_v5, %v284_v41  ;;  %v1846_v15 = vpack.c.bf16 %v1794_v28, %v1790_v29  ;;  %v694_v6 = vsel %vm621_vm13, %v4236_v47, 0.0  ;;  %vm822_vm14 = vcmp.eq.s32.totalorder %v3514_v54, %v4237_v63  ;;  %v4239_v41 = vld [vmem:[#allocation26_spill] sm:$0xff]  ;;  %v4244_v47 = vld [vmem:[#allocation36_spill] sm:$0xff] }
 0x163   :  { %vm826_vm15 = vcmp.eq.s32.totalorder %v3518_v2, %v4237_v63  ;;  %v754_v56 = vadd.f32 %v690_v59, %v549_v60  ;;  %v895_v16 = vsel %vm822_vm14, %v4238_v42, 0.0  ;;  %vm1027_vm0 = vcmp.eq.s32.totalorder %v3514_v54, %v4239_v41  ;;  %v4240_v29 = vld [vmem:[#allocation30_spill] sm:$0xff]  ;;  %v4242_v60 = vld [vmem:[#allocation32_spill] sm:$0xff] }
 0x164   :  { %v758_v62 = vadd.f32 %v694_v6, %v553_v31  ;;  %v899_v34 = vsel %vm826_vm15, %v4238_v42, 0.0  ;;  %1911 = vmatpush.bf16.msra.mxu3 %v1846_v15  ;;  %vm1031_vm1 = vcmp.eq.s32.totalorder %v3518_v2, %v4239_v41  ;;  %vm1232_vm2 = vcmp.eq.s32.totalorder %v3514_v54, %v4240_v29  ;;  %v4241_v6 = vld [vmem:[#allocation28_spill] sm:$0xff]  ;;  %v4243_v42 = vld [vmem:[#allocation34_spill] sm:$0xff] }
 0x165   :  { %vm1236_vm3 = vcmp.eq.s32.totalorder %v3518_v2, %v4240_v29  ;;  %v959_v28 = vadd.f32 %v895_v16, %v754_v56  ;;  %v1100_v31 = vsel %vm1027_vm0, %v4241_v6, 0.0  ;;  %v1104_v5 = vsel %vm1031_vm1, %v4241_v6, 0.0  ;;  %v4245_v56 = vld [vmem:[#allocation38_spill] sm:$0xff]  ;;  %v4249_v6 = vld [vmem:[#allocation20_spill] sm:$0xff] }
 0x166   :  { %v963_v10 = vadd.f32 %v899_v34, %v758_v62  ;;  %v1305_v15 = vsel %vm1232_vm2, %v4242_v60, 0.0  ;;  %v1309_v59 = vsel %vm1236_vm3, %v4242_v60, 0.0  ;;  %vm1437_vm4 = vcmp.eq.s32.totalorder %v3514_v54, %v4243_v42  ;;  %v4246_v62 = vld [vmem:[#allocation16_spill] sm:$0xff] }
 0x167   :  { %vm1441_vm5 = vcmp.eq.s32.totalorder %v3518_v2, %v4243_v42  ;;  %v1164_v41 = vadd.f32 %v1100_v31, %v959_v28  ;;  %v1510_v29 = vsel %vm1437_vm4, %v4244_v47, 0.0  ;;  %vm1642_vm6 = vcmp.eq.s32.totalorder %v3514_v54, %v4245_v56  ;;  %v4247_v28 = vld [vmem:[#allocation40_spill] sm:$0xff] }
 0x168   :  { %v1168_v63 = vadd.f32 %v1104_v5, %v963_v10  ;;  %v1514_v16 = vsel %vm1441_vm5, %v4244_v47, 0.0  ;;  %vm1646_vm7 = vcmp.eq.s32.totalorder %v3518_v2, %v4245_v56  ;;  %vm208_vm8 = vcmp.eq.s32.totalorder %v3514_v54, %v4246_v62  ;;  %v4248_v5 = vld [vmem:[#allocation18_spill] sm:$0xff] }
 0x169   :  { %vm212_vm9 = vcmp.eq.s32.totalorder %v3518_v2, %v4246_v62  ;;  %v1369_v34 = vadd.f32 %v1305_v15, %v1164_v41  ;;  %v1715_v10 = vsel %vm1642_vm6, %v4247_v28, 0.0  ;;  %v1719_v31 = vsel %vm1646_vm7, %v4247_v28, 0.0 }
 0x16a   :  { %v1373_v42 = vadd.f32 %v1309_v59, %v1168_v63  ;;  %v281_v47 = vsel %vm208_vm8, %v4248_v5, 0.0  ;;  %v285_v60 = vsel %vm212_vm9, %v4248_v5, 0.0  ;;  %vm413_vm10 = vcmp.eq.s32.totalorder %v3514_v54, %v4249_v6 }
 0x16b   :  { %vm417_vm11 = vcmp.eq.s32.totalorder %v3518_v2, %v4249_v6  ;;  %v1574_v56 = vadd.f32 %v1510_v29, %v1369_v34  ;;  %v486_v62 = vsel %vm413_vm10, %v2204_v18, 0.0  ;;  %vm618_vm12 = vcmp.eq.s32.totalorder %v3514_v54, %v2214_v19 }
 0x16c   :  { %v1578_v45 = vadd.f32 %v1514_v16, %v1373_v42  ;;  %v490_v63 = vsel %vm417_vm11, %v2204_v18, 0.0  ;;  %v550_v41 = vadd.f32 %v486_v62, %v281_v47  ;;  %vm622_vm13 = vcmp.eq.s32.totalorder %v3518_v2, %v2214_v19 }
 0x16d   :  { %v554_v15 = vadd.f32 %v490_v63, %v285_v60  ;;  %v1779_v59 = vadd.f32 %v1715_v10, %v1574_v56  ;;  %v691_v28 = vsel %vm618_vm12, %v2224_v26, 0.0  ;;  %v695_v6 = vsel %vm622_vm13, %v2224_v26, 0.0 }
 0x16e   :  { %v1783_v5 = vadd.f32 %v1719_v31, %v1578_v45  ;;  %v755_v29 = vadd.f32 %v691_v28, %v550_v41  ;;  %vm823_vm14 = vcmp.eq.s32.totalorder %v3514_v54, %v2234_v32  ;;  %vm827_vm15 = vcmp.eq.s32.totalorder %v3518_v2, %v2234_v32 }
 0x16f   :  { %v759_v42 = vadd.f32 %v695_v6, %v554_v15  ;;  %v896_v60 = vsel %vm823_vm14, %v2244_v36, 0.0  ;;  %v900_v16 = vsel %vm827_vm15, %v2244_v36, 0.0  ;;  %vm1028_vm0 = vcmp.eq.s32.totalorder %v3514_v54, %v2254_v46 }
 0x170   :  { %v1839_v47 = vpack.c.bf16 %v1783_v5, %v1779_v59  ;;  %v960_v45 = vadd.f32 %v896_v60, %v755_v29  ;;  %vm1032_vm1 = vcmp.eq.s32.totalorder %v3518_v2, %v2254_v46  ;;  %v1101_v6 = vsel %vm1028_vm0, %v2264_v35, 0.0 }
 0x171   :  { %v964_v56 = vadd.f32 %v900_v16, %v759_v42  ;;  %v1105_v62 = vsel %vm1032_vm1, %v2264_v35, 0.0  ;;  %vm1233_vm2 = vcmp.eq.s32.totalorder %v3514_v54, %v2274_v49  ;;  %vm1237_vm3 = vcmp.eq.s32.totalorder %v3518_v2, %v2274_v49 }
 0x172   :  { %1873 = vmatpush.bf16.msra.mxu0 %v1839_v47  ;;  %vm1438_vm4 = vcmp.eq.s32.totalorder %v3514_v54, %v2294_v55  ;;  %v1165_v34 = vadd.f32 %v1101_v6, %v960_v45  ;;  %v1306_v10 = vsel %vm1233_vm2, %v2284_v51, 0.0  ;;  %v1310_v31 = vsel %vm1237_vm3, %v2284_v51, 0.0 }
 0x173   :  { %v1169_v28 = vadd.f32 %v1105_v62, %v964_v56  ;;  %vm1442_vm5 = vcmp.eq.s32.totalorder %v3518_v2, %v2294_v55  ;;  %v1511_v5 = vsel %vm1438_vm4, %v2304_v1, 0.0  ;;  %vm1643_vm6 = vcmp.eq.s32.totalorder %v3514_v54, %v2314_v9 }
 0x174   :  { %vm1647_vm7 = vcmp.eq.s32.totalorder %v3518_v2, %v2314_v9  ;;  %v1370_v63 = vadd.f32 %v1306_v10, %v1165_v34  ;;  %v1515_v15 = vsel %vm1442_vm5, %v2304_v1, 0.0  ;;  %v1716_v59 = vsel %vm1643_vm6, %v2324_v23, 0.0 }
 0x175   :  { %v1374_v41 = vadd.f32 %v1310_v31, %v1169_v28  ;;  %v1720_v29 = vsel %vm1647_vm7, %v2324_v23, 0.0  ;;  %vm209_vm8 = vcmp.eq.s32.totalorder %v3514_v54, %v2171_v61  ;;  %vm213_vm9 = vcmp.eq.s32.totalorder %v3518_v2, %v2171_v61 }
 0x176   :  { %vm414_vm10 = vcmp.eq.s32.totalorder %v3514_v54, %v2196_v8  ;;  %v1575_v42 = vadd.f32 %v1511_v5, %v1370_v63  ;;  %v282_v60 = vsel %vm209_vm8, %v2185_v3, 0.0  ;;  %v286_v16 = vsel %vm213_vm9, %v2185_v3, 0.0 }
 0x177   :  { %v1579_v47 = vadd.f32 %v1515_v15, %v1374_v41  ;;  %vm418_vm11 = vcmp.eq.s32.totalorder %v3518_v2, %v2196_v8  ;;  %v487_v45 = vsel %vm414_vm10, %v2207_v12, 0.0  ;;  %vm619_vm12 = vcmp.eq.s32.totalorder %v3514_v54, %v2216_v20 }
 0x178   :  { %vm623_vm13 = vcmp.eq.s32.totalorder %v3518_v2, %v2216_v20  ;;  %v1780_v56 = vadd.f32 %v1716_v59, %v1575_v42  ;;  %v491_v62 = vsel %vm418_vm11, %v2207_v12, 0.0  ;;  %v551_v34 = vadd.f32 %v487_v45, %v282_v60 }
 0x179   :  { %v1784_v6 = vadd.f32 %v1720_v29, %v1579_v47  ;;  %v555_v28 = vadd.f32 %v491_v62, %v286_v16  ;;  %v692_v10 = vsel %vm619_vm12, %v2227_v27, 0.0  ;;  %v696_v31 = vsel %vm623_vm13, %v2227_v27, 0.0 }
 0x17a   :  { %vm824_vm14 = vcmp.eq.s32.totalorder %v3514_v54, %v2236_v33  ;;  %v756_v63 = vadd.f32 %v692_v10, %v551_v34  ;;  %vm828_vm15 = vcmp.eq.s32.totalorder %v3518_v2, %v2236_v33  ;;  %vm1029_vm0 = vcmp.eq.s32.totalorder %v3514_v54, %v2256_v40 }
 0x17b   :  { %v1840_v5 = vpack.c.bf16 %v1784_v6, %v1780_v56  ;;  %v897_v41 = vsel %vm824_vm14, %v2247_v39, 0.0  ;;  %v760_v15 = vadd.f32 %v696_v31, %v555_v28  ;;  %v901_v59 = vsel %vm828_vm15, %v2247_v39, 0.0 }
 0x17c   :  { %vm1033_vm1 = vcmp.eq.s32.totalorder %v3518_v2, %v2256_v40  ;;  %v961_v29 = vadd.f32 %v897_v41, %v756_v63  ;;  %v1102_v42 = vsel %vm1029_vm0, %v2267_v38, 0.0  ;;  %vm1234_vm2 = vcmp.eq.s32.totalorder %v3514_v54, %v2276_v50 }
 0x17d   :  { %1886 = vmatpush.bf16.msra.mxu1 %v1840_v5  ;;  %v1106_v47 = vsel %vm1033_vm1, %v2267_v38, 0.0  ;;  %v965_v60 = vadd.f32 %v901_v59, %v760_v15  ;;  %vm1238_vm3 = vcmp.eq.s32.totalorder %v3518_v2, %v2276_v50  ;;  %v1307_v16 = vsel %vm1234_vm2, %v2287_v52, 0.0 }
 0x17e   :  { %vm1439_vm4 = vcmp.eq.s32.totalorder %v3514_v54, %v2296_v57  ;;  %v1166_v45 = vadd.f32 %v1102_v42, %v961_v29  ;;  %v1311_v56 = vsel %vm1238_vm3, %v2287_v52, 0.0  ;;  %vm1443_vm5 = vcmp.eq.s32.totalorder %v3518_v2, %v2296_v57 }
 0x17f   :  { %v1512_v6 = vsel %vm1439_vm4, %v2307_v4, 0.0  ;;  %v1170_v62 = vadd.f32 %v1106_v47, %v965_v60  ;;  %v1516_v34 = vsel %vm1443_vm5, %v2307_v4, 0.0  ;;  %vm1644_vm6 = vcmp.eq.s32.totalorder %v3514_v54, %v2316_v14 }
 0x180   :  { %vm1648_vm7 = vcmp.eq.s32.totalorder %v3518_v2, %v2316_v14  ;;  %v1371_v28 = vadd.f32 %v1307_v16, %v1166_v45  ;;  %v1717_v10 = vsel %vm1644_vm6, %v2327_v53, 0.0  ;;  %vm210_vm8 = vcmp.eq.s32.totalorder %v3514_v54, %v2175_v0 }
 0x181   :  { %v1721_v31 = vsel %vm1648_vm7, %v2327_v53, 0.0  ;;  %v1375_v5 = vadd.f32 %v1311_v56, %v1170_v62  ;;  %vm214_vm9 = vcmp.eq.s32.totalorder %v3518_v2, %v2175_v0  ;;  %v283_v63 = vsel %vm210_vm8, %v2190_v7, 0.0 }
 0x182   :  { %vm415_vm10 = vcmp.eq.s32.totalorder %v3514_v54, %v2198_v11  ;;  %v1576_v41 = vadd.f32 %v1512_v6, %v1371_v28  ;;  %v287_v15 = vsel %vm214_vm9, %v2190_v7, 0.0  ;;  %vm419_vm11 = vcmp.eq.s32.totalorder %v3518_v2, %v2198_v11 }
 0x183   :  { %v488_v59 = vsel %vm415_vm10, %v2210_v13, 0.0  ;;  %v1580_v29 = vadd.f32 %v1516_v34, %v1375_v5  ;;  %v492_v42 = vsel %vm419_vm11, %v2210_v13, 0.0  ;;  %vm620_vm12 = vcmp.eq.s32.totalorder %v3514_v54, %v2218_v21 }
 0x184   :  { %v552_v47 = vadd.f32 %v488_v59, %v283_v63  ;;  %v1781_v60 = vadd.f32 %v1717_v10, %v1576_v41  ;;  %v556_v16 = vadd.f32 %v492_v42, %v287_v15  ;;  %vm624_vm13 = vcmp.eq.s32.totalorder %v3518_v2, %v2218_v21 }
 0x185   :  { %v693_v45 = vsel %vm620_vm12, %v2230_v44, 0.0  ;;  %v1785_v56 = vadd.f32 %v1721_v31, %v1580_v29  ;;  %v697_v6 = vsel %vm624_vm13, %v2230_v44, 0.0  ;;  %vm825_vm14 = vcmp.eq.s32.totalorder %v3514_v54, %v2238_v30 }
 0x186   :  { %v757_v62 = vadd.f32 %v693_v45, %v552_v47  ;;  %v761_v34 = vadd.f32 %v697_v6, %v556_v16  ;;  %vm829_vm15 = vcmp.eq.s32.totalorder %v3518_v2, %v2238_v30  ;;  %v898_v28 = vsel %vm825_vm14, %v2250_v48, 0.0 }
 0x187   :  { %vm1030_vm0 = vcmp.eq.s32.totalorder %v3514_v54, %v4124_v37  ;;  %v1841_v10 = vpack.c.bf16 %v1785_v56, %v1781_v60  ;;  %v902_v5 = vsel %vm829_vm15, %v2250_v48, 0.0  ;;  %vm1034_vm1 = vcmp.eq.s32.totalorder %v3518_v2, %v4124_v37  ;;  %v4250_v56 = vld [vmem:[#allocation39_spill] sm:$0xff] }
 0x188   :  { %v962_v63 = vadd.f32 %v898_v28, %v757_v62  ;;  %v966_v31 = vadd.f32 %v902_v5, %v761_v34  ;;  %v1103_v41 = vsel %vm1030_vm0, %v4145_v43, 0.0  ;;  %v1107_v15 = vsel %vm1034_vm1, %v4145_v43, 0.0  ;;  %v4251_v62 = vld [vmem:[#allocation41_spill] sm:$0xff] }
 0x189   :  { %vm1235_vm2 = vcmp.eq.s32.totalorder %v3514_v54, %v4146_v25  ;;  %1899 = vmatpush.bf16.msra.mxu2 %v1841_v10  ;;  %vm1239_vm3 = vcmp.eq.s32.totalorder %v3518_v2, %v4146_v25  ;;  %vm1440_vm4 = vcmp.eq.s32.totalorder %v3514_v54, %v4167_v22  ;;  %vm1444_vm5 = vcmp.eq.s32.totalorder %v3518_v2, %v4167_v22  ;;  %v4252_v10 = vld [vmem:[#allocation14_spill] sm:$0xff] }
 0x18a   :  { %v1167_v59 = vadd.f32 %v1103_v41, %v962_v63  ;;  %v1308_v29 = vsel %vm1235_vm2, %v4166_v17, 0.0  ;;  %v1171_v42 = vadd.f32 %v1107_v15, %v966_v31  ;;  %v1312_v47 = vsel %vm1239_vm3, %v4166_v17, 0.0  ;;  %v4253_v31 = vld [vmem:[#allocation15_spill] sm:$0xff]  ;;  %v4254_v41 = vld [vmem:[#allocation22_spill] sm:$0xff] }
 0x18b   :  { %v1513_v60 = vsel %vm1440_vm4, %v4129_v58, 0.0  ;;  %v1517_v45 = vsel %vm1444_vm5, %v4129_v58, 0.0  ;;  %vm1645_vm6 = vcmp.eq.s32.totalorder %v3514_v54, %v4250_v56  ;;  %vm1649_vm7 = vcmp.eq.s32.totalorder %v3518_v2, %v4250_v56  ;;  %v4255_v2 = vld [vmem:[#allocation17_spill] sm:$0xff]  ;;  %v4258_v58 = vld [vmem:[#allocation24_spill] sm:$0xff] }
 0x18c   :  { %v1372_v16 = vadd.f32 %v1308_v29, %v1167_v59  ;;  %v1376_v6 = vadd.f32 %v1312_v47, %v1171_v42  ;;  %v1718_v34 = vsel %vm1645_vm6, %v4251_v62, 0.0  ;;  %v1722_v28 = vsel %vm1649_vm7, %v4251_v62, 0.0  ;;  %v4256_v42 = vld [vmem:[#allocation21_spill] sm:$0xff] }
 0x18d   :  { %v3713_v5 = vadd.s32 8, %v4252_v10  ;;  %vm199_vm8 = vcmp.eq.s32.totalorder %v4252_v10, %v4253_v31  ;;  %vm404_vm9 = vcmp.eq.s32.totalorder %v4252_v10, %v4134_v24  ;;  %vm609_vm10 = vcmp.eq.s32.totalorder %v4252_v10, %v4254_v41 }
 0x18e   :  { %v1577_v63 = vadd.f32 %v1513_v60, %v1372_v16  ;;  %v1581_v54 = vadd.f32 %v1517_v45, %v1376_v6  ;;  %v272_v15 = vsel %vm199_vm8, %v4255_v2, 0.0  ;;  %v477_v47 = vsel %vm404_vm9, %v4256_v42, 0.0  ;;  %v4257_v45 = vld [vmem:[#allocation23_spill] sm:$0xff] }
 0x18f   :  { %vm203_vm11 = vcmp.eq.s32.totalorder %v3713_v5, %v4253_v31  ;;  %vm408_vm12 = vcmp.eq.s32.totalorder %v3713_v5, %v4134_v24  ;;  %v541_v62 = vadd.f32 %v477_v47, %v272_v15  ;;  %vm613_vm13 = vcmp.eq.s32.totalorder %v3713_v5, %v4254_v41  ;;  %v4260_v15 = vld [vmem:[#allocation26_spill] sm:$0xff] }
 0x190   :  { %v1782_v59 = vadd.f32 %v1718_v34, %v1577_v63  ;;  %v276_v29 = vsel %vm203_vm11, %v4255_v2, 0.0  ;;  %v481_v60 = vsel %vm408_vm12, %v4256_v42, 0.0  ;;  %v1786_v16 = vadd.f32 %v1722_v28, %v1581_v54  ;;  %v4259_v2 = vld [vmem:[#allocation25_spill] sm:$0xff]  ;;  %v4261_v41 = vld [vmem:[#allocation30_spill] sm:$0xff] }
 0x191   :  { %v545_v56 = vadd.f32 %v481_v60, %v276_v29  ;;  %v682_v6 = vsel %vm609_vm10, %v4257_v45, 0.0  ;;  %v686_v31 = vsel %vm613_vm13, %v4257_v45, 0.0  ;;  %vm814_vm14 = vcmp.eq.s32.totalorder %v4252_v10, %v4258_v58  ;;  %v4264_v60 = vld [vmem:[#allocation34_spill] sm:$0xff] }
 0x192   :  { %vm818_vm15 = vcmp.eq.s32.totalorder %v3713_v5, %v4258_v58  ;;  %v1842_v24 = vpack.c.bf16 %v1786_v16, %v1782_v59  ;;  %v746_v34 = vadd.f32 %v682_v6, %v541_v62  ;;  %v887_v28 = vsel %vm814_vm14, %v4259_v2, 0.0  ;;  %v4262_v58 = vld [vmem:[#allocation28_spill] sm:$0xff] }
 0x193   :  { %v750_v63 = vadd.f32 %v686_v31, %v545_v56  ;;  %v891_v54 = vsel %vm818_vm15, %v4259_v2, 0.0  ;;  %vm1019_vm0 = vcmp.eq.s32.totalorder %v4252_v10, %v4260_v15  ;;  %vm1023_vm1 = vcmp.eq.s32.totalorder %v3713_v5, %v4260_v15  ;;  %v4263_v62 = vld [vmem:[#allocation32_spill] sm:$0xff] }
 0x194   :  { %vm1224_vm2 = vcmp.eq.s32.totalorder %v4252_v10, %v4261_v41  ;;  %1912 = vmatpush.bf16.msra.mxu3 %v1842_v24  ;;  %v951_v29 = vadd.f32 %v887_v28, %v746_v34  ;;  %v1092_v59 = vsel %vm1019_vm0, %v4262_v58, 0.0  ;;  %v1096_v56 = vsel %vm1023_vm1, %v4262_v58, 0.0  ;;  %v4265_v31 = vld [vmem:[#allocation36_spill] sm:$0xff] }
 0x195   :  { %v955_v42 = vadd.f32 %v891_v54, %v750_v63  ;;  %vm1228_vm3 = vcmp.eq.s32.totalorder %v3713_v5, %v4261_v41  ;;  %v1297_v47 = vsel %vm1224_vm2, %v4263_v62, 0.0  ;;  %vm1429_vm4 = vcmp.eq.s32.totalorder %v4252_v10, %v4264_v60  ;;  %v4266_v63 = vld [vmem:[#allocation38_spill] sm:$0xff]  ;;  %v4267_v2 = vld [vmem:[#allocation16_spill] sm:$0xff] }
 0x196   :  { %vm1433_vm5 = vcmp.eq.s32.totalorder %v3713_v5, %v4264_v60  ;;  %v1156_v16 = vadd.f32 %v1092_v59, %v951_v29  ;;  %v1301_v6 = vsel %vm1228_vm3, %v4263_v62, 0.0  ;;  %v1502_v24 = vsel %vm1429_vm4, %v4265_v31, 0.0  ;;  %v4268_v15 = vld [vmem:[#allocation40_spill] sm:$0xff] }
 0x197   :  { %v1160_v45 = vadd.f32 %v1096_v56, %v955_v42  ;;  %v1506_v34 = vsel %vm1433_vm5, %v4265_v31, 0.0  ;;  %vm1634_vm6 = vcmp.eq.s32.totalorder %v4252_v10, %v4266_v63  ;;  %vm1638_vm7 = vcmp.eq.s32.totalorder %v3713_v5, %v4266_v63  ;;  %v4269_v42 = vld [vmem:[#allocation18_spill] sm:$0xff]  ;;  %v4270_v59 = vld [vmem:[#allocation20_spill] sm:$0xff] }
 0x198   :  { %vm200_vm8 = vcmp.eq.s32.totalorder %v4252_v10, %v4267_v2  ;;  %v1361_v28 = vadd.f32 %v1297_v47, %v1156_v16  ;;  %v1707_v41 = vsel %vm1634_vm6, %v4268_v15, 0.0  ;;  %v1711_v29 = vsel %vm1638_vm7, %v4268_v15, 0.0 }
 0x199   :  { %v1365_v54 = vadd.f32 %v1301_v6, %v1160_v45  ;;  %vm204_vm9 = vcmp.eq.s32.totalorder %v3713_v5, %v4267_v2  ;;  %v273_v58 = vsel %vm200_vm8, %v4269_v42, 0.0  ;;  %vm405_vm10 = vcmp.eq.s32.totalorder %v4252_v10, %v4270_v59 }
 0x19a   :  { %vm409_vm11 = vcmp.eq.s32.totalorder %v3713_v5, %v4270_v59  ;;  %v1566_v56 = vadd.f32 %v1502_v24, %v1361_v28  ;;  %v277_v47 = vsel %vm204_vm9, %v4269_v42, 0.0  ;;  %v478_v60 = vsel %vm405_vm10, %v2204_v18, 0.0  ;;  %v3813_v59 = vld [vmem:[%s3924_s5] sm:$0xf]  ;;  %s2020_s5 = smov [#allocation10]  }
 0x19b   :  { %v1570_v62 = vadd.f32 %v1506_v34, %v1365_v54  ;;  %v482_v16 = vsel %vm409_vm11, %v2204_v18, 0.0  ;;  %v542_v45 = vadd.f32 %v478_v60, %v273_v58  ;;  %vm610_vm12 = vcmp.eq.s32.totalorder %v4252_v10, %v2214_v19  ;;  %s1928_s17 = sshll.u32 %s2020_s5, 4  ;;  %s1929_s17 = int_to_ptr.vmem [resolvable:$true] %s1928_s17 }
 0x19c   :  { %vm614_vm13 = vcmp.eq.s32.totalorder %v3713_v5, %v2214_v19  ;;  %v1771_v6 = vadd.f32 %v1707_v41, %v1566_v56  ;;  %v546_v63 = vadd.f32 %v482_v16, %v277_v47  ;;  %v683_v2 = vsel %vm610_vm12, %v2224_v26, 0.0 }
 0x19d   :  { %v1775_v31 = vadd.f32 %v1711_v29, %v1570_v62  ;;  %v687_v24 = vsel %vm614_vm13, %v2224_v26, 0.0  ;;  %v747_v34 = vadd.f32 %v683_v2, %v542_v45  ;;  %vm815_vm14 = vcmp.eq.s32.totalorder %v4252_v10, %v2234_v32 }
 0x19e   :  { %vm819_vm15 = vcmp.eq.s32.totalorder %v3713_v5, %v2234_v32  ;;  %v751_v28 = vadd.f32 %v687_v24, %v546_v63  ;;  %v888_v54 = vsel %vm815_vm14, %v2244_v36, 0.0  ;;  %vm1020_vm0 = vcmp.eq.s32.totalorder %v4252_v10, %v2254_v46 }
 0x19f   :  { %v1835_v18 = vpack.c.bf16 %v1775_v31, %v1771_v6  ;;  %v892_v19 = vsel %vm819_vm15, %v2244_v36, 0.0  ;;  %v952_v15 = vadd.f32 %v888_v54, %v747_v34  ;;  %vm1024_vm1 = vcmp.eq.s32.totalorder %v3713_v5, %v2254_v46 }
 0x1a0   :  { %vm1225_vm2 = vcmp.eq.s32.totalorder %v4252_v10, %v2274_v49  ;;  %v956_v26 = vadd.f32 %v892_v19, %v751_v28  ;;  %v1093_v32 = vsel %vm1020_vm0, %v2264_v35, 0.0  ;;  %v1097_v41 = vsel %vm1024_vm1, %v2264_v35, 0.0 }
 0x1a1   :  { %1874 = vmatpush.bf16.msra.mxu0 %v1835_v18  ;;  %vm1229_vm3 = vcmp.eq.s32.totalorder %v3713_v5, %v2274_v49  ;;  %v1157_v36 = vadd.f32 %v1093_v32, %v952_v15  ;;  %v1298_v29 = vsel %vm1225_vm2, %v2284_v51, 0.0  ;;  %vm1430_vm4 = vcmp.eq.s32.totalorder %v4252_v10, %v2294_v55 }
 0x1a2   :  { %v1302_v42 = vsel %vm1229_vm3, %v2284_v51, 0.0  ;;  %v1161_v46 = vadd.f32 %v1097_v41, %v956_v26  ;;  %vm1434_vm5 = vcmp.eq.s32.totalorder %v3713_v5, %v2294_v55  ;;  %v1503_v58 = vsel %vm1430_vm4, %v2304_v1, 0.0 }
 0x1a3   :  { %vm1635_vm6 = vcmp.eq.s32.totalorder %v4252_v10, %v2314_v9  ;;  %v1362_v35 = vadd.f32 %v1298_v29, %v1157_v36  ;;  %v1507_v49 = vsel %vm1434_vm5, %v2304_v1, 0.0  ;;  %vm1639_vm7 = vcmp.eq.s32.totalorder %v3713_v5, %v2314_v9 }
 0x1a4   :  { %v1708_v51 = vsel %vm1635_vm6, %v2324_v23, 0.0  ;;  %v1366_v56 = vadd.f32 %v1302_v42, %v1161_v46  ;;  %v1712_v55 = vsel %vm1639_vm7, %v2324_v23, 0.0  ;;  %vm201_vm8 = vcmp.eq.s32.totalorder %v4252_v10, %v2171_v61  ;;  %1875 = vmatmul.bf16.vlgmr.msra.gmra.mxu0 %v3813_v59 }
 0x1a5   :  { %vm205_vm9 = vcmp.eq.s32.totalorder %v3713_v5, %v2171_v61  ;;  %v1567_v1 = vadd.f32 %v1503_v58, %v1362_v35  ;;  %v274_v9 = vsel %vm201_vm8, %v2185_v3, 0.0  ;;  %vm406_vm10 = vcmp.eq.s32.totalorder %v4252_v10, %v2196_v8 }
 0x1a6   :  { %v278_v62 = vsel %vm205_vm9, %v2185_v3, 0.0  ;;  %v1571_v47 = vadd.f32 %v1507_v49, %v1366_v56  ;;  %vm410_vm11 = vcmp.eq.s32.totalorder %v3713_v5, %v2196_v8  ;;  %v479_v23 = vsel %vm406_vm10, %v2207_v12, 0.0 }
 0x1a7   :  { %vm611_vm12 = vcmp.eq.s32.totalorder %v4252_v10, %v2216_v20  ;;  %v1772_v61 = vadd.f32 %v1708_v51, %v1567_v1  ;;  %v483_v60 = vsel %vm410_vm11, %v2207_v12, 0.0  ;;  %v543_v16 = vadd.f32 %v479_v23, %v274_v9  ;;  %v4272_v9 = vld [vmem:[#allocation39_spill] sm:$0xff] }
 0x1a8   :  { %vm615_vm13 = vcmp.eq.s32.totalorder %v3713_v5, %v2216_v20  ;;  %v1776_v3 = vadd.f32 %v1712_v55, %v1571_v47  ;;  %v547_v45 = vadd.f32 %v483_v60, %v278_v62  ;;  %v684_v6 = vsel %vm611_vm12, %v2227_v27, 0.0 }
 0x1a9   :  { %v688_v31 = vsel %vm615_vm13, %v2227_v27, 0.0  ;;  %v748_v63 = vadd.f32 %v684_v6, %v543_v16  ;;  %vm816_vm14 = vcmp.eq.s32.totalorder %v4252_v10, %v2236_v33  ;;  %vm820_vm15 = vcmp.eq.s32.totalorder %v3713_v5, %v2236_v33 }
 0x1aa   :  { %vm1021_vm0 = vcmp.eq.s32.totalorder %v4252_v10, %v2256_v40  ;;  %v1836_v8 = vpack.c.bf16 %v1776_v3, %v1772_v61  ;;  %v752_v12 = vadd.f32 %v688_v31, %v547_v45  ;;  %v889_v20 = vsel %vm816_vm14, %v2247_v39, 0.0 }
 0x1ab   :  { %v893_v2 = vsel %vm820_vm15, %v2247_v39, 0.0  ;;  %v953_v24 = vadd.f32 %v889_v20, %v748_v63  ;;  %vm1025_vm1 = vcmp.eq.s32.totalorder %v3713_v5, %v2256_v40  ;;  %v1094_v27 = vsel %vm1021_vm0, %v2267_v38, 0.0 }
 0x1ac   :  { %vm1226_vm2 = vcmp.eq.s32.totalorder %v4252_v10, %v2276_v50  ;;  %1887 = vmatpush.bf16.msra.mxu1 %v1836_v8  ;;  %v957_v33 = vadd.f32 %v893_v2, %v752_v12  ;;  %v1098_v34 = vsel %vm1025_vm1, %v2267_v38, 0.0  ;;  %vm1230_vm3 = vcmp.eq.s32.totalorder %v3713_v5, %v2276_v50 }
 0x1ad   :  { %v1299_v18 = vsel %vm1226_vm2, %v2287_v52, 0.0  ;;  %v1158_v28 = vadd.f32 %v1094_v27, %v953_v24  ;;  %v1303_v39 = vsel %vm1230_vm3, %v2287_v52, 0.0  ;;  %vm1431_vm4 = vcmp.eq.s32.totalorder %v4252_v10, %v2296_v57 }
 0x1ae   :  { %vm1435_vm5 = vcmp.eq.s32.totalorder %v3713_v5, %v2296_v57  ;;  %v1162_v40 = vadd.f32 %v1098_v34, %v957_v33  ;;  %v1504_v54 = vsel %vm1431_vm4, %v2307_v4, 0.0  ;;  %vm1636_vm6 = vcmp.eq.s32.totalorder %v4252_v10, %v2316_v14 }
 0x1af   :  { %v1508_v19 = vsel %vm1435_vm5, %v2307_v4, 0.0  ;;  %v1363_v38 = vadd.f32 %v1299_v18, %v1158_v28  ;;  %vm1640_vm7 = vcmp.eq.s32.totalorder %v3713_v5, %v2316_v14  ;;  %v1709_v50 = vsel %vm1636_vm6, %v2327_v53, 0.0  ;;  %1888 = vmatmul.bf16.vlgmr.msra.gmra.mxu1 %v3813_v59 }
 0x1b0   :  { %vm202_vm8 = vcmp.eq.s32.totalorder %v4252_v10, %v2175_v0  ;;  %v1367_v52 = vadd.f32 %v1303_v39, %v1162_v40  ;;  %v1713_v57 = vsel %vm1640_vm7, %v2327_v53, 0.0  ;;  %vm206_vm9 = vcmp.eq.s32.totalorder %v3713_v5, %v2175_v0 }
 0x1b1   :  { %v275_v4 = vsel %vm202_vm8, %v2190_v7, 0.0  ;;  %v1568_v15 = vadd.f32 %v1504_v54, %v1363_v38  ;;  %v279_v26 = vsel %vm206_vm9, %v2190_v7, 0.0  ;;  %vm407_vm10 = vcmp.eq.s32.totalorder %v4252_v10, %v2198_v11 }
 0x1b2   :  { %vm411_vm11 = vcmp.eq.s32.totalorder %v3713_v5, %v2198_v11  ;;  %v1572_v14 = vadd.f32 %v1508_v19, %v1367_v52  ;;  %v480_v32 = vsel %vm407_vm10, %v2210_v13, 0.0  ;;  %vm612_vm12 = vcmp.eq.s32.totalorder %v4252_v10, %v2218_v21 }
 0x1b3   :  { %v484_v41 = vsel %vm411_vm11, %v2210_v13, 0.0  ;;  %v1773_v0 = vadd.f32 %v1709_v50, %v1568_v15  ;;  %v544_v53 = vadd.f32 %v480_v32, %v275_v4  ;;  %vm616_vm13 = vcmp.eq.s32.totalorder %v3713_v5, %v2218_v21 }
 0x1b4   :  { %v548_v36 = vadd.f32 %v484_v41, %v279_v26  ;;  %v1777_v7 = vadd.f32 %v1713_v57, %v1572_v14  ;;  %v685_v29 = vsel %vm612_vm12, %v2230_v44, 0.0  ;;  %v689_v42 = vsel %vm616_vm13, %v2230_v44, 0.0 }
 0x1b5   :  { %vm817_vm14 = vcmp.eq.s32.totalorder %v4252_v10, %v2238_v30  ;;  %v749_v11 = vadd.f32 %v685_v29, %v544_v53  ;;  %vm821_vm15 = vcmp.eq.s32.totalorder %v3713_v5, %v2238_v30  ;;  %vm1022_vm0 = vcmp.eq.s32.totalorder %v4252_v10, %v4124_v37 }
 0x1b6   :  { %v753_v46 = vadd.f32 %v689_v42, %v548_v36  ;;  %v890_v13 = vsel %vm817_vm14, %v2250_v48, 0.0  ;;  %v1837_v58 = vpack.c.bf16 %v1777_v7, %v1773_v0  ;;  %v894_v35 = vsel %vm821_vm15, %v2250_v48, 0.0 }
 0x1b7   :  { %vm1026_vm1 = vcmp.eq.s32.totalorder %v3713_v5, %v4124_v37  ;;  %v954_v21 = vadd.f32 %v890_v13, %v749_v11  ;;  %v1095_v49 = vsel %vm1022_vm0, %v4145_v43, 0.0  ;;  %vm1227_vm2 = vcmp.eq.s32.totalorder %v4252_v10, %v4146_v25 }
 0x1b8   :  { %v958_v44 = vadd.f32 %v894_v35, %v753_v46  ;;  %v1099_v51 = vsel %vm1026_vm1, %v4145_v43, 0.0  ;;  %1900 = vmatpush.bf16.msra.mxu2 %v1837_v58  ;;  %vm1231_vm3 = vcmp.eq.s32.totalorder %v3713_v5, %v4146_v25  ;;  %vm1432_vm4 = vcmp.eq.s32.totalorder %v4252_v10, %v4167_v22  ;;  %v4271_v43 = vld [vmem:[#allocation37_spill] sm:$0xff] }
 0x1b9   :  { %vm1436_vm5 = vcmp.eq.s32.totalorder %v3713_v5, %v4167_v22  ;;  %v1159_v30 = vadd.f32 %v1095_v49, %v954_v21  ;;  %v1300_v37 = vsel %vm1227_vm2, %v4166_v17, 0.0  ;;  %v1304_v56 = vsel %vm1231_vm3, %v4166_v17, 0.0  ;;  %v4273_v22 = vld [vmem:[#allocation41_spill] sm:$0xff] }
 0x1ba   :  { %v1163_v48 = vadd.f32 %v1099_v51, %v958_v44  ;;  %v1505_v55 = vsel %vm1432_vm4, %v4271_v43, 0.0  ;;  %v1509_v1 = vsel %vm1436_vm5, %v4271_v43, 0.0  ;;  %vm1637_vm6 = vcmp.eq.s32.totalorder %v4252_v10, %v4272_v9 }
 0x1bb   :  { %vm1641_vm7 = vcmp.eq.s32.totalorder %v3713_v5, %v4272_v9  ;;  %v1364_v25 = vadd.f32 %v1300_v37, %v1159_v30  ;;  %1901 = vmatmul.bf16.vlgmr.msra.gmra.mxu2 %v3813_v59  ;;  %v1710_v47 = vsel %vm1637_vm6, %v4273_v22, 0.0 }
 0x1bc   :  { %v1368_v62 = vadd.f32 %v1304_v56, %v1163_v48  ;;  %v1714_v23 = vsel %vm1641_vm7, %v4273_v22, 0.0 }
 0x1bd   :  { %v1569_v61 = vadd.f32 %v1505_v55, %v1364_v25 }
 0x1be   :  { %v1573_v17 = vadd.f32 %v1509_v1, %v1368_v62 }
 0x1bf   :  { %v1774_v60 = vadd.f32 %v1710_v47, %v1569_v61 }
 0x1c0   :  { %v1778_v16 = vadd.f32 %v1714_v23, %v1573_v17 }
 0x1c2   :  { %v1838_v3 = vpack.c.bf16 %v1778_v16, %v1774_v60 }
 0x1c4   :  { %1913 = vmatpush.bf16.msra.mxu3 %v1838_v3 }
 0x1c7   :  { %1914 = vmatmul.bf16.vlgmr.msra.gmra.mxu3 %v3813_v59 }
 0x221   :  { %v1876_v10 = vpop.f32.mrf.mxu0 }
 0x222   :  { %1919 = vst [vmem:[#allocation10] sm:$0xff] %v1876_v10 }
 0x229   :  { %v1878_v45 = vpop.f32.mrf.mxu0 }
 0x22c   :  { %v1889_v5 = vpop.f32.mrf.mxu1 }
 0x22d   :  { %1920 = vst [vmem:[#allocation10 + $0x8] sm:$0xff] %v1889_v5 }
 0x234   :  { %v1891_v6 = vpop.f32.mrf.mxu1 }
 0x23e   :  { %v1902_v31 = vpop.f32.mrf.mxu2 }
 0x23f   :  { %1921 = vst [vmem:[#allocation10 + $0x10] sm:$0xff] %v1902_v31 }
 0x246   :  { %v1904_v63 = vpop.f32.mrf.mxu2 }
 0x24a   :  { %v1915_v8 = vpop.f32.mrf.mxu3 }
 0x24b   :  { %1922 = vst [vmem:[#allocation10 + $0x18] sm:$0xff] %v1915_v8 }
 0x24c   :  { %1933 = dma.vmem_to_hbm [thread:$0]  %s1929_s17, 512, %s1931_s20, [#allocation9]  }
 0x252   :  { %v1917_v59 = vpop.f32.mrf.mxu3 }
 0x253   :  { %2016 = dma.done.wait [#allocation9], 512  }
 0x254   :  { %2017 = vsyncadd [#allocation9], 4294966784 }
 0x255   :  { %1938 = vsyncpa [#allocation8], 1 }
 0x256   :  { %1939 = vsyncpa [#allocation9], 1 }

</bundles_post_ra>
